<compile_context>
chip_gen: v7x
topology: tpu7x:2x2x1
jax: 0.10.0
libtpu: 0.0.40
codegen_flags: <defaults>
</compile_context>

<pallas_src>
import jax
import jax.numpy as jnp
from jax.experimental import pallas as pl
from jax.experimental.pallas import tpu as pltpu


# =============================================================================
# Pass A: fused grouped 3x3 conv + 1x1 conv + per-strip BN partial statistics.
# grid = (N, H // tH), both axes "parallel".
# x is passed three times: the main (tH, W) strip plus one clamped 8-row block
# just above and one just below; only their boundary rows are used as the halo.
# =============================================================================
def _fused_dw_pw_stats_kernel(x_ref, xtop_ref, xbot_ref, dww_ref, pww_ref,
                              bias_ref, z_ref, stats_ref):
    # x_ref:     (1, Cin, tH, W)   main H-strip of the input (VMEM)
    # xtop_ref:  (1, Cin, hR, W)   rows just above the strip (clamped block)
    # xbot_ref:  (1, Cin, hR, W)   rows just below the strip (clamped block)
    # dww_ref:   (Cmid, 9)         SMEM grouped 3x3 taps, t = 3*ky + kx
    # pww_ref:   (Cmid, Cout)      SMEM 1x1 conv weights
    # bias_ref:  (Cout,)           SMEM folded bias (pw_b + dw_b @ pw_w)
    # z_ref:     (1, Cout, tH, W)  pre-BN activations for this strip
    # stats_ref: (1, 1, 2*Cout, W) per-strip partial column sums / sums of sq.
    _, Cin, tH, W = x_ref.shape
    Cout = z_ref.shape[1]
    Cmid = pww_ref.shape[0]
    mult = Cmid // Cin           # groups == Cin -> mid channel m reads x[m // mult]
    hR = xtop_ref.shape[2]

    h = pl.program_id(1)
    last = pl.num_programs(1) - 1
    # 0/1 validity of the halo rows (zero padding at the image top/bottom edge).
    top_scale = jnp.where(h > 0, 1.0, 0.0).astype(jnp.float32)
    bot_scale = jnp.where(h < last, 1.0, 0.0).astype(jnp.float32)

    # dx (lane) shifts: XLU roll + edge mask when lane-aligned, else a cheap
    # zero-column shift (for W < 128 the shifted plane is a fraction of a vreg row).
    if W % 128 == 0:
        col = jax.lax.broadcasted_iota(jnp.int32, (tH, W), 1)
        not_first = col >= 1
        not_last = col <= W - 2

        def shift_left(v):   # out[w] = v[w - 1], zero at w == 0
            return jnp.where(not_first, pltpu.roll(v, 1, axis=1), 0.0)

        def shift_right(v):  # out[w] = v[w + 1], zero at w == W - 1
            return jnp.where(not_last, pltpu.roll(v, -1, axis=1), 0.0)
    else:
        zcol = jnp.zeros((tH, 1), jnp.float32)

        def shift_left(v):
            return jnp.concatenate([zcol, v[:, :W - 1]], axis=1)

        def shift_right(v):
            return jnp.concatenate([v[:, 1:], zcol], axis=1)

    # 9 shifted tap planes per input channel, built once and reused by every
    # mid channel of that group (groups == Cin).
    taps = []
    for i in range(Cin):
        xc = x_ref[0, i, :, :].astype(jnp.float32)                       # (tH, W)
        trow = xtop_ref[0, i, hR - 1:hR, :].astype(jnp.float32) * top_scale
        brow = xbot_ref[0, i, 0:1, :].astype(jnp.float32) * bot_scale
        x_up = jnp.concatenate([trow, xc[:-1, :]], axis=0)               # x[y-1]
        x_dn = jnp.concatenate([xc[1:, :], brow], axis=0)                # x[y+1]
        ch = []
        for xv in (x_up, xc, x_dn):                                      # ky = 0,1,2
            ch.append(shift_left(xv))                                    # kx = 0
            ch.append(xv)                                                # kx = 1
            ch.append(shift_right(xv))                                   # kx = 2
        taps.append(ch)

    # Grouped 3x3 conv: SMEM scalar tap weights broadcast-MAC'd on the VPU.
    d = []
    for m in range(Cmid):
        t_i = taps[m // mult]
        a = t_i[0] * dww_ref[m, 0]
        for t in range(1, 9):
            a = a + t_i[t] * dww_ref[m, t]
        d.append(a)                                                      # (tH, W)

    # 1x1 conv: direct per-channel write (no concat) + per-strip BN partials
    # taken straight from the accumulator.
    # TODO(synk): for DLUNet's deeper blocks (Cmid/Cout >= 64) this stage should
    # become an MXU matmul over a channels-minor tile instead of VPU MACs.
    for c in range(Cout):
        acc = jnp.full((tH, W), bias_ref[c], dtype=jnp.float32)
        for m in range(Cmid):
            acc = acc + d[m] * pww_ref[m, c]
        z_ref[0:1, c:c + 1, :, :] = acc.reshape(1, 1, tH, W).astype(z_ref.dtype)
        stats_ref[0:1, 0:1, c:c + 1, :] = (
            jnp.sum(acc, axis=0, keepdims=True).reshape(1, 1, 1, W))
        stats_ref[0:1, 0:1, Cout + c:Cout + c + 1, :] = (
            jnp.sum(acc * acc, axis=0, keepdims=True).reshape(1, 1, 1, W))


# =============================================================================
# Pass B: per-channel scale/shift + ReLU on the lane-dense folded (N, Cout, H*W)
# view. scale/shift are SMEM scalars; the output aliases the z buffer.
# =============================================================================
def _bn_relu_kernel(scale_ref, shift_ref, z_ref, o_ref):
    # scale_ref / shift_ref: (Cout,) SMEM;  z_ref / o_ref: (1, Cout, tS) VMEM.
    Cout = z_ref.shape[1]
    for c in range(Cout):
        v = z_ref[0, c:c + 1, :].astype(jnp.float32)
        o_ref[0, c:c + 1, :] = jnp.maximum(v * scale_ref[c] + shift_ref[c], 0.0)


def _choose_tile_h(H, W, Cin, Cmid, Cout, budget_bytes=12 << 20):
    """Largest H-strip (multiple of 8, dividing H) whose live set fits the budget."""
    if H % 8 != 0:
        return H
    per_row = (9 * Cin + Cmid + 2 * (Cin + Cout) + 4) * W * 4
    best, t = 8, 8
    while t <= H:
        if H % t == 0 and per_row * t <= budget_bytes:
            best = t
        t += 8
    return best


def _choose_tile_s(S, Cout, budget_bytes=4 << 20):
    """Lane-dense spatial tile for the elementwise pass (multiple of 128 or full)."""
    if Cout * S * 4 <= budget_bytes or S % 128 != 0:
        return S
    best, t = 128, 128
    while t <= S:
        if S % t == 0 and Cout * t * 4 <= budget_bytes:
            best = t
        t += 128
    return best


# =============================================================================
# Wrapper
# =============================================================================
def conv_one_forward(x_nchw, dw_w, dw_b, pw_w, pw_b, gamma, beta,
                     eps=1e-5, z_dtype=jnp.float32, tile_h=None):
    """Pallas implementation of ConvOne.forward (training-mode/batch-stat BN).

    x_nchw : (N, Cin, H, W) float32
    dw_w   : (Cout, 1, 3, 3)    grouped-conv weight (PyTorch layout, groups=Cin)
    dw_b   : (Cout,)
    pw_w   : (Cout, Cout, 1, 1) 1x1 conv weight (PyTorch layout)
    pw_b   : (Cout,)
    gamma, beta : (Cout,) BatchNorm affine params
    z_dtype: storage dtype of the pre-BN intermediate (bf16 halves its HBM
             traffic on v6e/v7x; f32 keeps exact parity with the reference).
    returns: (N, Cout, H, W) float32
    """
    N, Cin, H, W = x_nchw.shape
    Cout = dw_w.shape[0]
    Cmid = pw_w.shape[1]
    assert Cout % Cin == 0 and Cmid == Cout

    x = x_nchw.astype(jnp.float32)
    dww = dw_w.reshape(Cout, 9).astype(jnp.float32)                      # (Cmid, 9)
    pww = jnp.transpose(pw_w[:, :, 0, 0], (1, 0)).astype(jnp.float32)    # (Cmid, Cout)
    # Fold both conv biases (elementwise => exact f32, no matmul precision issue).
    bias = (pw_b.astype(jnp.float32)
            + jnp.sum(dw_b.astype(jnp.float32)[:, None] * pww, axis=0))  # (Cout,)

    # ---------------- Pass A tiling (H-strips with an in-kernel halo) --------
    if H % 8 == 0:
        tH = tile_h if tile_h is not None else _choose_tile_h(H, W, Cin, Cmid, Cout)
        assert tH % 8 == 0 and H % tH == 0
        hR = 8
        rb = tH // 8
        Hb = H // 8
        top_map = lambda n, h: (n, 0, jnp.maximum(h * rb - 1, 0), 0)
        bot_map = lambda n, h: (n, 0, jnp.minimum((h + 1) * rb, Hb - 1), 0)
    else:
        # Fallback: one strip per image (no halo blocks needed; they are zeroed).
        tH, hR = H, H
        top_map = lambda n, h: (n, 0, 0, 0)
        bot_map = lambda n, h: (n, 0, 0, 0)
    nH = H // tH

    # Computed VMEM budget (pipelined blocks + in-kernel live planes), capped at
    # 44 MiB so it leaves headroom even on v7x's 64 MiB VMEM.
    vmem_a = int(min(44 << 20, max(
        8 << 20,
        2 * 4 * W * (Cin * tH + 2 * Cin * hR + Cout * tH)
        + 4 * W * tH * (9 * Cin + Cmid + 4)
        + 2 * 4 * W * 2 * Cout
        + (2 << 20))))

    z, stats = pl.pallas_call(
        _fused_dw_pw_stats_kernel,
        out_shape=(jax.ShapeDtypeStruct((N, Cout, H, W), z_dtype),
                   jax.ShapeDtypeStruct((N, nH, 2 * Cout, W), jnp.float32)),
        grid=(N, nH),
        in_specs=[
            pl.BlockSpec((1, Cin, tH, W), lambda n, h: (n, 0, h, 0)),
            pl.BlockSpec((1, Cin, hR, W), top_map),
            pl.BlockSpec((1, Cin, hR, W), bot_map),
            pl.BlockSpec(memory_space=pltpu.MemorySpace.SMEM),
            pl.BlockSpec(memory_space=pltpu.MemorySpace.SMEM),
            pl.BlockSpec(memory_space=pltpu.MemorySpace.SMEM),
        ],
        out_specs=(
            pl.BlockSpec((1, Cout, tH, W), lambda n, h: (n, 0, h, 0)),
            pl.BlockSpec((1, 1, 2 * Cout, W), lambda n, h: (n, h, 0, 0)),
        ),
        compiler_params=pltpu.CompilerParams(
            dimension_semantics=("parallel", "parallel"),
            vmem_limit_bytes=vmem_a),
    )(x, x, x, dww, pww, bias)

    # Finalize BN statistics from the tiny per-strip partials (plain XLA).
    # TODO(synk): for very large N*H*W switch to centered per-strip partials
    # (Welford) instead of E[z^2] - E[z]^2.
    R = N * H * W
    ssum = jnp.sum(stats[:, :, :Cout, :], axis=(0, 1, 3))
    ssq = jnp.sum(stats[:, :, Cout:, :], axis=(0, 1, 3))
    mean = ssum / R
    var = jnp.maximum(ssq / R - mean * mean, 0.0)        # biased, like PyTorch BN
    inv = jax.lax.rsqrt(var + eps)
    scale = (gamma.astype(jnp.float32) * inv)            # (Cout,)
    shift = (beta.astype(jnp.float32) - mean * scale)    # (Cout,)

    # ---------------- Pass B: normalize + ReLU on the folded H*W view --------
    S = H * W
    tS = _choose_tile_s(S, Cout)
    nS = S // tS
    z2 = z.reshape(N, Cout, S)                            # free contiguous reshape
    vmem_b = int(min(44 << 20, max(4 << 20, 4 * Cout * tS * 4 * 2 + (1 << 20))))
    alias = {2: 0} if z_dtype == jnp.float32 else {}      # reuse z's HBM buffer

    out2 = pl.pallas_call(
        _bn_relu_kernel,
        out_shape=jax.ShapeDtypeStruct((N, Cout, S), jnp.float32),
        grid=(N, nS),
        in_specs=[
            pl.BlockSpec(memory_space=pltpu.MemorySpace.SMEM),
            pl.BlockSpec(memory_space=pltpu.MemorySpace.SMEM),
            pl.BlockSpec((1, Cout, tS), lambda n, s: (n, 0, s)),
        ],
        out_specs=pl.BlockSpec((1, Cout, tS), lambda n, s: (n, 0, s)),
        input_output_aliases=alias,
        compiler_params=pltpu.CompilerParams(
            dimension_semantics=("parallel", "parallel"),
            vmem_limit_bytes=vmem_b),
    )(scale, shift, z2)

    return out2.reshape(N, Cout, H, W)    # NCHW throughout; no transposes


# ----------------------------------------------------------------------------
# Pure-JAX reference (same math, via lax.conv) for a correctness check
# ----------------------------------------------------------------------------
def conv_one_reference(x, dw_w, dw_b, pw_w, pw_b, gamma, beta, groups):
    dn = ("NCHW", "OIHW", "NCHW")
    y = jax.lax.conv_general_dilated(
        x, dw_w, (1, 1), ((1, 1), (1, 1)), dimension_numbers=dn,
        feature_group_count=groups, precision=jax.lax.Precision.HIGHEST)
    y = y + dw_b.reshape(1, -1, 1, 1)
    z = jax.lax.conv_general_dilated(
        y, pw_w, (1, 1), "VALID", dimension_numbers=dn,
        precision=jax.lax.Precision.HIGHEST)
    z = z + pw_b.reshape(1, -1, 1, 1)
    mean = z.mean(axis=(0, 2, 3), keepdims=True)
    var = jnp.square(z - mean).mean(axis=(0, 2, 3), keepdims=True)
    zn = (z - mean) * jax.lax.rsqrt(var + 1e-5)
    return jnp.maximum(zn * gamma.reshape(1, -1, 1, 1) + beta.reshape(1, -1, 1, 1), 0.0)


if __name__ == "__main__":
    # Small shapes consistent with the module: batch=2, in_channels=4,
    # out_channels=8 (multiple of in_channels since groups=in_channels), 16x16.
    N, Cin, Cout, H, W = 2, 4, 8, 16, 16

    key = jax.random.PRNGKey(0)
    kx, k1, k2, k3, k4 = jax.random.split(key, 5)

    x = jax.random.normal(kx, (N, Cin, H, W), dtype=jnp.float32)

    # Deterministic parameter init (kaiming-uniform-ish bounds, like nn.Conv2d).
    bd = 1.0 / jnp.sqrt(9.0)                      # fan_in of grouped conv = 1*3*3
    dw_w = jax.random.uniform(k1, (Cout, 1, 3, 3), jnp.float32, -bd, bd)
    dw_b = jax.random.uniform(k2, (Cout,), jnp.float32, -bd, bd)
    bp = 1.0 / jnp.sqrt(float(Cout))              # fan_in of 1x1 conv = Cout
    pw_w = jax.random.uniform(k3, (Cout, Cout, 1, 1), jnp.float32, -bp, bp)
    pw_b = jax.random.uniform(k4, (Cout,), jnp.float32, -bp, bp)
    gamma = jnp.ones((Cout,), jnp.float32)        # nn.BatchNorm2d defaults
    beta = jnp.zeros((Cout,), jnp.float32)
    # TODO(synk): BatchNorm running_mean/running_var buffer updates (training-time
    # side effect) and Dropout RNG elsewhere in DLUNet are not reproduced.
    # TODO(synk): only the ConvOne building block of DLUNet is implemented here;
    # composing the full DLUNet graph (ReASPP3, attention, up/pooling, RRCNN)
    # from these kernels is out of scope for this script.

    ref = conv_one_reference(x, dw_w, dw_b, pw_w, pw_b, gamma, beta, groups=Cin)
    ref = jax.block_until_ready(ref)

    # Multi-strip path: tile_h=8 -> 2 H-strips per image, exercises the halo reads.
    fwd_strips = jax.jit(lambda *a: conv_one_forward(*a, tile_h=8))
    out = jax.block_until_ready(fwd_strips(x, dw_w, dw_b, pw_w, pw_b, gamma, beta))
    assert out.shape == (N, Cout, H, W), out.shape
    assert jnp.allclose(out, ref, atol=2e-3, rtol=2e-3), (
        float(jnp.max(jnp.abs(out - ref))))

    # Default (auto-chosen) tiling.
    fwd_auto = jax.jit(lambda *a: conv_one_forward(*a))
    out2 = jax.block_until_ready(fwd_auto(x, dw_w, dw_b, pw_w, pw_b, gamma, beta))
    assert jnp.allclose(out2, ref, atol=2e-3, rtol=2e-3), (
        float(jnp.max(jnp.abs(out2 - ref))))

    print("KERNEL_OK")
</pallas_src>

<mosaic_0001>
module attributes {stable_mosaic.version = 11 : i64} {
  func.func @_bn_relu_kernel(%arg0: i32, %arg1: i32, %arg2: memref<8xf32, #tpu.memory_space<smem>>, %arg3: memref<8xf32, #tpu.memory_space<smem>>, %arg4: memref<1x8x256xf32, #tpu.memory_space<vmem>>, %arg5: memref<1x8x256xf32, #tpu.memory_space<vmem>>) attributes {dimension_semantics = [#tpu.dimension_semantics<parallel>, #tpu.dimension_semantics<parallel>], iteration_bounds = array<i64: 2, 1>, scalar_prefetch = 0 : i64, scratch_operands = 0 : i64, tpu.core_type = #tpu.core_type<tc>, window_params = [{transform_indices = @transform_0, window_bounds = array<i64: 8>}, {transform_indices = @transform_1, window_bounds = array<i64: 8>}, {transform_indices = @transform_2, window_bounds = array<i64: 1, 8, 256>}, {transform_indices = @transform_3, window_bounds = array<i64: 1, 8, 256>}]} {
    %c0 = arith.constant 0 : index
    %c0_0 = arith.constant 0 : index
    %c0_1 = arith.constant 0 : index
    %0 = vector.load %arg4[%c0, %c0_0, %c0_1] : memref<1x8x256xf32, #tpu.memory_space<vmem>>, vector<1x1x256xf32>
    %1 = vector.shape_cast %0 : vector<1x1x256xf32> to vector<1x256xf32>
    %c0_2 = arith.constant 0 : index
    %2 = memref.load %arg2[%c0_2] : memref<8xf32, #tpu.memory_space<smem>>
    %3 = vector.broadcast %2 : f32 to vector<1x256xf32>
    %4 = arith.mulf %1, %3 : vector<1x256xf32>
    %c0_3 = arith.constant 0 : index
    %5 = memref.load %arg3[%c0_3] : memref<8xf32, #tpu.memory_space<smem>>
    %6 = vector.broadcast %5 : f32 to vector<1x256xf32>
    %7 = arith.addf %4, %6 : vector<1x256xf32>
    %cst = arith.constant 0.000000e+00 : f32
    %8 = vector.broadcast %cst : f32 to vector<1x256xf32>
    %9 = arith.maximumf %7, %8 : vector<1x256xf32>
    %c0_4 = arith.constant 0 : index
    %c0_5 = arith.constant 0 : index
    %c0_6 = arith.constant 0 : index
    %10 = vector.load %arg5[%c0_4, %c0_5, %c0_6] : memref<1x8x256xf32, #tpu.memory_space<vmem>>, vector<1x1x256xf32>
    %11 = vector.shape_cast %10 : vector<1x1x256xf32> to vector<1x256xf32>
    %12 = vector.shape_cast %9 : vector<1x256xf32> to vector<1x1x256xf32>
    tpu.vector_store %arg5[%c0_4, %c0_5, %c0_6], %12 {strides = array<i32>} : memref<1x8x256xf32, #tpu.memory_space<vmem>>, vector<1x1x256xf32>,
    %c0_7 = arith.constant 0 : index
    %c1 = arith.constant 1 : index
    %c0_8 = arith.constant 0 : index
    %13 = vector.load %arg4[%c0_7, %c1, %c0_8] : memref<1x8x256xf32, #tpu.memory_space<vmem>>, vector<1x1x256xf32>
    %14 = vector.shape_cast %13 : vector<1x1x256xf32> to vector<1x256xf32>
    %c1_9 = arith.constant 1 : index
    %15 = memref.load %arg2[%c1_9] : memref<8xf32, #tpu.memory_space<smem>>
    %16 = vector.broadcast %15 : f32 to vector<1x256xf32>
    %17 = arith.mulf %14, %16 : vector<1x256xf32>
    %c1_10 = arith.constant 1 : index
    %18 = memref.load %arg3[%c1_10] : memref<8xf32, #tpu.memory_space<smem>>
    %19 = vector.broadcast %18 : f32 to vector<1x256xf32>
    %20 = arith.addf %17, %19 : vector<1x256xf32>
    %cst_11 = arith.constant 0.000000e+00 : f32
    %21 = vector.broadcast %cst_11 : f32 to vector<1x256xf32>
    %22 = arith.maximumf %20, %21 : vector<1x256xf32>
    %c0_12 = arith.constant 0 : index
    %c1_13 = arith.constant 1 : index
    %c0_14 = arith.constant 0 : index
    %23 = vector.load %arg5[%c0_12, %c1_13, %c0_14] : memref<1x8x256xf32, #tpu.memory_space<vmem>>, vector<1x1x256xf32>
    %24 = vector.shape_cast %23 : vector<1x1x256xf32> to vector<1x256xf32>
    %25 = vector.shape_cast %22 : vector<1x256xf32> to vector<1x1x256xf32>
    tpu.vector_store %arg5[%c0_12, %c1_13, %c0_14], %25 {strides = array<i32>} : memref<1x8x256xf32, #tpu.memory_space<vmem>>, vector<1x1x256xf32>,
    %c0_15 = arith.constant 0 : index
    %c2 = arith.constant 2 : index
    %c0_16 = arith.constant 0 : index
    %26 = vector.load %arg4[%c0_15, %c2, %c0_16] : memref<1x8x256xf32, #tpu.memory_space<vmem>>, vector<1x1x256xf32>
    %27 = vector.shape_cast %26 : vector<1x1x256xf32> to vector<1x256xf32>
    %c2_17 = arith.constant 2 : index
    %28 = memref.load %arg2[%c2_17] : memref<8xf32, #tpu.memory_space<smem>>
    %29 = vector.broadcast %28 : f32 to vector<1x256xf32>
    %30 = arith.mulf %27, %29 : vector<1x256xf32>
    %c2_18 = arith.constant 2 : index
    %31 = memref.load %arg3[%c2_18] : memref<8xf32, #tpu.memory_space<smem>>
    %32 = vector.broadcast %31 : f32 to vector<1x256xf32>
    %33 = arith.addf %30, %32 : vector<1x256xf32>
    %cst_19 = arith.constant 0.000000e+00 : f32
    %34 = vector.broadcast %cst_19 : f32 to vector<1x256xf32>
    %35 = arith.maximumf %33, %34 : vector<1x256xf32>
    %c0_20 = arith.constant 0 : index
    %c2_21 = arith.constant 2 : index
    %c0_22 = arith.constant 0 : index
    %36 = vector.load %arg5[%c0_20, %c2_21, %c0_22] : memref<1x8x256xf32, #tpu.memory_space<vmem>>, vector<1x1x256xf32>
    %37 = vector.shape_cast %36 : vector<1x1x256xf32> to vector<1x256xf32>
    %38 = vector.shape_cast %35 : vector<1x256xf32> to vector<1x1x256xf32>
    tpu.vector_store %arg5[%c0_20, %c2_21, %c0_22], %38 {strides = array<i32>} : memref<1x8x256xf32, #tpu.memory_space<vmem>>, vector<1x1x256xf32>,
    %c0_23 = arith.constant 0 : index
    %c3 = arith.constant 3 : index
    %c0_24 = arith.constant 0 : index
    %39 = vector.load %arg4[%c0_23, %c3, %c0_24] : memref<1x8x256xf32, #tpu.memory_space<vmem>>, vector<1x1x256xf32>
    %40 = vector.shape_cast %39 : vector<1x1x256xf32> to vector<1x256xf32>
    %c3_25 = arith.constant 3 : index
    %41 = memref.load %arg2[%c3_25] : memref<8xf32, #tpu.memory_space<smem>>
    %42 = vector.broadcast %41 : f32 to vector<1x256xf32>
    %43 = arith.mulf %40, %42 : vector<1x256xf32>
    %c3_26 = arith.constant 3 : index
    %44 = memref.load %arg3[%c3_26] : memref<8xf32, #tpu.memory_space<smem>>
    %45 = vector.broadcast %44 : f32 to vector<1x256xf32>
    %46 = arith.addf %43, %45 : vector<1x256xf32>
    %cst_27 = arith.constant 0.000000e+00 : f32
    %47 = vector.broadcast %cst_27 : f32 to vector<1x256xf32>
    %48 = arith.maximumf %46, %47 : vector<1x256xf32>
    %c0_28 = arith.constant 0 : index
    %c3_29 = arith.constant 3 : index
    %c0_30 = arith.constant 0 : index
    %49 = vector.load %arg5[%c0_28, %c3_29, %c0_30] : memref<1x8x256xf32, #tpu.memory_space<vmem>>, vector<1x1x256xf32>
    %50 = vector.shape_cast %49 : vector<1x1x256xf32> to vector<1x256xf32>
    %51 = vector.shape_cast %48 : vector<1x256xf32> to vector<1x1x256xf32>
    tpu.vector_store %arg5[%c0_28, %c3_29, %c0_30], %51 {strides = array<i32>} : memref<1x8x256xf32, #tpu.memory_space<vmem>>, vector<1x1x256xf32>,
    %c0_31 = arith.constant 0 : index
    %c4 = arith.constant 4 : index
    %c0_32 = arith.constant 0 : index
    %52 = vector.load %arg4[%c0_31, %c4, %c0_32] : memref<1x8x256xf32, #tpu.memory_space<vmem>>, vector<1x1x256xf32>
    %53 = vector.shape_cast %52 : vector<1x1x256xf32> to vector<1x256xf32>
    %c4_33 = arith.constant 4 : index
    %54 = memref.load %arg2[%c4_33] : memref<8xf32, #tpu.memory_space<smem>>
    %55 = vector.broadcast %54 : f32 to vector<1x256xf32>
    %56 = arith.mulf %53, %55 : vector<1x256xf32>
    %c4_34 = arith.constant 4 : index
    %57 = memref.load %arg3[%c4_34] : memref<8xf32, #tpu.memory_space<smem>>
    %58 = vector.broadcast %57 : f32 to vector<1x256xf32>
    %59 = arith.addf %56, %58 : vector<1x256xf32>
    %cst_35 = arith.constant 0.000000e+00 : f32
    %60 = vector.broadcast %cst_35 : f32 to vector<1x256xf32>
    %61 = arith.maximumf %59, %60 : vector<1x256xf32>
    %c0_36 = arith.constant 0 : index
    %c4_37 = arith.constant 4 : index
    %c0_38 = arith.constant 0 : index
    %62 = vector.load %arg5[%c0_36, %c4_37, %c0_38] : memref<1x8x256xf32, #tpu.memory_space<vmem>>, vector<1x1x256xf32>
    %63 = vector.shape_cast %62 : vector<1x1x256xf32> to vector<1x256xf32>
    %64 = vector.shape_cast %61 : vector<1x256xf32> to vector<1x1x256xf32>
    tpu.vector_store %arg5[%c0_36, %c4_37, %c0_38], %64 {strides = array<i32>} : memref<1x8x256xf32, #tpu.memory_space<vmem>>, vector<1x1x256xf32>,
    %c0_39 = arith.constant 0 : index
    %c5 = arith.constant 5 : index
    %c0_40 = arith.constant 0 : index
    %65 = vector.load %arg4[%c0_39, %c5, %c0_40] : memref<1x8x256xf32, #tpu.memory_space<vmem>>, vector<1x1x256xf32>
    %66 = vector.shape_cast %65 : vector<1x1x256xf32> to vector<1x256xf32>
    %c5_41 = arith.constant 5 : index
    %67 = memref.load %arg2[%c5_41] : memref<8xf32, #tpu.memory_space<smem>>
    %68 = vector.broadcast %67 : f32 to vector<1x256xf32>
    %69 = arith.mulf %66, %68 : vector<1x256xf32>
    %c5_42 = arith.constant 5 : index
    %70 = memref.load %arg3[%c5_42] : memref<8xf32, #tpu.memory_space<smem>>
    %71 = vector.broadcast %70 : f32 to vector<1x256xf32>
    %72 = arith.addf %69, %71 : vector<1x256xf32>
    %cst_43 = arith.constant 0.000000e+00 : f32
    %73 = vector.broadcast %cst_43 : f32 to vector<1x256xf32>
    %74 = arith.maximumf %72, %73 : vector<1x256xf32>
    %c0_44 = arith.constant 0 : index
    %c5_45 = arith.constant 5 : index
    %c0_46 = arith.constant 0 : index
    %75 = vector.load %arg5[%c0_44, %c5_45, %c0_46] : memref<1x8x256xf32, #tpu.memory_space<vmem>>, vector<1x1x256xf32>
    %76 = vector.shape_cast %75 : vector<1x1x256xf32> to vector<1x256xf32>
    %77 = vector.shape_cast %74 : vector<1x256xf32> to vector<1x1x256xf32>
    tpu.vector_store %arg5[%c0_44, %c5_45, %c0_46], %77 {strides = array<i32>} : memref<1x8x256xf32, #tpu.memory_space<vmem>>, vector<1x1x256xf32>,
    %c0_47 = arith.constant 0 : index
    %c6 = arith.constant 6 : index
    %c0_48 = arith.constant 0 : index
    %78 = vector.load %arg4[%c0_47, %c6, %c0_48] : memref<1x8x256xf32, #tpu.memory_space<vmem>>, vector<1x1x256xf32>
    %79 = vector.shape_cast %78 : vector<1x1x256xf32> to vector<1x256xf32>
    %c6_49 = arith.constant 6 : index
    %80 = memref.load %arg2[%c6_49] : memref<8xf32, #tpu.memory_space<smem>>
    %81 = vector.broadcast %80 : f32 to vector<1x256xf32>
    %82 = arith.mulf %79, %81 : vector<1x256xf32>
    %c6_50 = arith.constant 6 : index
    %83 = memref.load %arg3[%c6_50] : memref<8xf32, #tpu.memory_space<smem>>
    %84 = vector.broadcast %83 : f32 to vector<1x256xf32>
    %85 = arith.addf %82, %84 : vector<1x256xf32>
    %cst_51 = arith.constant 0.000000e+00 : f32
    %86 = vector.broadcast %cst_51 : f32 to vector<1x256xf32>
    %87 = arith.maximumf %85, %86 : vector<1x256xf32>
    %c0_52 = arith.constant 0 : index
    %c6_53 = arith.constant 6 : index
    %c0_54 = arith.constant 0 : index
    %88 = vector.load %arg5[%c0_52, %c6_53, %c0_54] : memref<1x8x256xf32, #tpu.memory_space<vmem>>, vector<1x1x256xf32>
    %89 = vector.shape_cast %88 : vector<1x1x256xf32> to vector<1x256xf32>
    %90 = vector.shape_cast %87 : vector<1x256xf32> to vector<1x1x256xf32>
    tpu.vector_store %arg5[%c0_52, %c6_53, %c0_54], %90 {strides = array<i32>} : memref<1x8x256xf32, #tpu.memory_space<vmem>>, vector<1x1x256xf32>,
    %c0_55 = arith.constant 0 : index
    %c7 = arith.constant 7 : index
    %c0_56 = arith.constant 0 : index
    %91 = vector.load %arg4[%c0_55, %c7, %c0_56] : memref<1x8x256xf32, #tpu.memory_space<vmem>>, vector<1x1x256xf32>
    %92 = vector.shape_cast %91 : vector<1x1x256xf32> to vector<1x256xf32>
    %c7_57 = arith.constant 7 : index
    %93 = memref.load %arg2[%c7_57] : memref<8xf32, #tpu.memory_space<smem>>
    %94 = vector.broadcast %93 : f32 to vector<1x256xf32>
    %95 = arith.mulf %92, %94 : vector<1x256xf32>
    %c7_58 = arith.constant 7 : index
    %96 = memref.load %arg3[%c7_58] : memref<8xf32, #tpu.memory_space<smem>>
    %97 = vector.broadcast %96 : f32 to vector<1x256xf32>
    %98 = arith.addf %95, %97 : vector<1x256xf32>
    %cst_59 = arith.constant 0.000000e+00 : f32
    %99 = vector.broadcast %cst_59 : f32 to vector<1x256xf32>
    %100 = arith.maximumf %98, %99 : vector<1x256xf32>
    %c0_60 = arith.constant 0 : index
    %c7_61 = arith.constant 7 : index
    %c0_62 = arith.constant 0 : index
    %101 = vector.load %arg5[%c0_60, %c7_61, %c0_62] : memref<1x8x256xf32, #tpu.memory_space<vmem>>, vector<1x1x256xf32>
    %102 = vector.shape_cast %101 : vector<1x1x256xf32> to vector<1x256xf32>
    %103 = vector.shape_cast %100 : vector<1x256xf32> to vector<1x1x256xf32>
    tpu.vector_store %arg5[%c0_60, %c7_61, %c0_62], %103 {strides = array<i32>} : memref<1x8x256xf32, #tpu.memory_space<vmem>>, vector<1x1x256xf32>,
    return
  }
  func.func @transform_0(%arg0: i32, %arg1: i32) -> i32 {
    %c0_i32 = arith.constant 0 : i32
    %c0_i32_0 = arith.constant 0 : i32
    return %c0_i32 : i32
  }
  func.func @transform_1(%arg0: i32, %arg1: i32) -> i32 {
    %c0_i32 = arith.constant 0 : i32
    %c0_i32_0 = arith.constant 0 : i32
    return %c0_i32 : i32
  }
  func.func @transform_2(%arg0: i32, %arg1: i32) -> (i32, i32, i32) {
    %c0_i32 = arith.constant 0 : i32
    %c0_i32_0 = arith.constant 0 : i32
    return %arg0, %c0_i32, %arg1 : i32, i32, i32
  }
  func.func @transform_3(%arg0: i32, %arg1: i32) -> (i32, i32, i32) {
    %c0_i32 = arith.constant 0 : i32
    %c0_i32_0 = arith.constant 0 : i32
    return %arg0, %c0_i32, %arg1 : i32, i32, i32
  }
}

module attributes {stable_mosaic.version = 11 : i64} {
  func.func @_fused_dw_pw_stats_kernel(%arg0: i32, %arg1: i32, %arg2: memref<1x4x8x16xf32, #tpu.memory_space<vmem>>, %arg3: memref<1x4x8x16xf32, #tpu.memory_space<vmem>>, %arg4: memref<1x4x8x16xf32, #tpu.memory_space<vmem>>, %arg5: memref<8x9xf32, #tpu.memory_space<smem>>, %arg6: memref<8x8xf32, #tpu.memory_space<smem>>, %arg7: memref<8xf32, #tpu.memory_space<smem>>, %arg8: memref<1x8x8x16xf32, #tpu.memory_space<vmem>>, %arg9: memref<1x1x16x16xf32, #tpu.memory_space<vmem>>) attributes {dimension_semantics = [#tpu.dimension_semantics<parallel>, #tpu.dimension_semantics<parallel>], iteration_bounds = array<i64: 2, 2>, scalar_prefetch = 0 : i64, scratch_operands = 0 : i64, tpu.core_type = #tpu.core_type<tc>, window_params = [{transform_indices = @transform_0, window_bounds = array<i64: 1, 4, 8, 16>}, {transform_indices = @transform_1, window_bounds = array<i64: 1, 4, 8, 16>}, {transform_indices = @transform_2, window_bounds = array<i64: 1, 4, 8, 16>}, {transform_indices = @transform_3, window_bounds = array<i64: 8, 9>}, {transform_indices = @transform_4, window_bounds = array<i64: 8, 8>}, {transform_indices = @transform_5, window_bounds = array<i64: 8>}, {transform_indices = @transform_6, window_bounds = array<i64: 1, 8, 8, 16>}, {transform_indices = @transform_7, window_bounds = array<i64: 1, 1, 16, 16>}]} {
    %c0_i32 = arith.constant 0 : i32
    %0 = arith.cmpi sgt, %arg1, %c0_i32 : i32
    %cst = arith.constant 1.000000e+00 : f32
    %cst_0 = arith.constant 0.000000e+00 : f32
    %1 = arith.select %0, %cst, %cst_0 : f32
    %c1_i32 = arith.constant 1 : i32
    %2 = arith.cmpi slt, %arg1, %c1_i32 : i32
    %cst_1 = arith.constant 1.000000e+00 : f32
    %cst_2 = arith.constant 0.000000e+00 : f32
    %3 = arith.select %2, %cst_1, %cst_2 : f32
    %cst_3 = arith.constant 0.000000e+00 : f32
    %4 = vector.broadcast %cst_3 : f32 to vector<8x1xf32>
    %c0 = arith.constant 0 : index
    %c0_4 = arith.constant 0 : index
    %c0_5 = arith.constant 0 : index
    %c0_6 = arith.constant 0 : index
    %5 = vector.load %arg2[%c0, %c0_4, %c0_5, %c0_6] : memref<1x4x8x16xf32, #tpu.memory_space<vmem>>, vector<1x1x8x16xf32>
    %6 = vector.shape_cast %5 : vector<1x1x8x16xf32> to vector<8x16xf32>
    %c0_7 = arith.constant 0 : index
    %c0_8 = arith.constant 0 : index
    %c7 = arith.constant 7 : index
    %c0_9 = arith.constant 0 : index
    %7 = vector.load %arg3[%c0_7, %c0_8, %c7, %c0_9] : memref<1x4x8x16xf32, #tpu.memory_space<vmem>>, vector<1x1x1x16xf32>
    %8 = vector.shape_cast %7 : vector<1x1x1x16xf32> to vector<1x16xf32>
    %9 = vector.broadcast %1 : f32 to vector<1x16xf32>
    %10 = arith.mulf %8, %9 : vector<1x16xf32>
    %c0_10 = arith.constant 0 : index
    %c0_11 = arith.constant 0 : index
    %c0_12 = arith.constant 0 : index
    %c0_13 = arith.constant 0 : index
    %11 = vector.load %arg4[%c0_10, %c0_11, %c0_12, %c0_13] : memref<1x4x8x16xf32, #tpu.memory_space<vmem>>, vector<1x1x1x16xf32>
    %12 = vector.shape_cast %11 : vector<1x1x1x16xf32> to vector<1x16xf32>
    %13 = vector.broadcast %3 : f32 to vector<1x16xf32>
    %14 = arith.mulf %12, %13 : vector<1x16xf32>
    %15 = vector.extract_strided_slice %6 {offsets = [0, 0], sizes = [7, 16], strides = [1, 1]} : vector<8x16xf32> to vector<7x16xf32>
    %16 = tpu.concatenate %10, %15 in 0 : vector<1x16xf32>, vector<7x16xf32> -> vector<8x16xf32>
    %17 = vector.extract_strided_slice %6 {offsets = [1, 0], sizes = [7, 16], strides = [1, 1]} : vector<8x16xf32> to vector<7x16xf32>
    %18 = tpu.concatenate %17, %14 in 0 : vector<7x16xf32>, vector<1x16xf32> -> vector<8x16xf32>
    %19 = vector.extract_strided_slice %16 {offsets = [0, 0], sizes = [8, 15], strides = [1, 1]} : vector<8x16xf32> to vector<8x15xf32>
    %20 = tpu.concatenate %4, %19 in 1 : vector<8x1xf32>, vector<8x15xf32> -> vector<8x16xf32>
    %21 = vector.extract_strided_slice %16 {offsets = [0, 1], sizes = [8, 15], strides = [1, 1]} : vector<8x16xf32> to vector<8x15xf32>
    %22 = tpu.concatenate %21, %4 in 1 : vector<8x15xf32>, vector<8x1xf32> -> vector<8x16xf32>
    %23 = vector.extract_strided_slice %6 {offsets = [0, 0], sizes = [8, 15], strides = [1, 1]} : vector<8x16xf32> to vector<8x15xf32>
    %24 = tpu.concatenate %4, %23 in 1 : vector<8x1xf32>, vector<8x15xf32> -> vector<8x16xf32>
    %25 = vector.extract_strided_slice %6 {offsets = [0, 1], sizes = [8, 15], strides = [1, 1]} : vector<8x16xf32> to vector<8x15xf32>
    %26 = tpu.concatenate %25, %4 in 1 : vector<8x15xf32>, vector<8x1xf32> -> vector<8x16xf32>
    %27 = vector.extract_strided_slice %18 {offsets = [0, 0], sizes = [8, 15], strides = [1, 1]} : vector<8x16xf32> to vector<8x15xf32>
    %28 = tpu.concatenate %4, %27 in 1 : vector<8x1xf32>, vector<8x15xf32> -> vector<8x16xf32>
    %29 = vector.extract_strided_slice %18 {offsets = [0, 1], sizes = [8, 15], strides = [1, 1]} : vector<8x16xf32> to vector<8x15xf32>
    %30 = tpu.concatenate %29, %4 in 1 : vector<8x15xf32>, vector<8x1xf32> -> vector<8x16xf32>
    %c0_14 = arith.constant 0 : index
    %c1 = arith.constant 1 : index
    %c0_15 = arith.constant 0 : index
    %c0_16 = arith.constant 0 : index
    %31 = vector.load %arg2[%c0_14, %c1, %c0_15, %c0_16] : memref<1x4x8x16xf32, #tpu.memory_space<vmem>>, vector<1x1x8x16xf32>
    %32 = vector.shape_cast %31 : vector<1x1x8x16xf32> to vector<8x16xf32>
    %c0_17 = arith.constant 0 : index
    %c1_18 = arith.constant 1 : index
    %c7_19 = arith.constant 7 : index
    %c0_20 = arith.constant 0 : index
    %33 = vector.load %arg3[%c0_17, %c1_18, %c7_19, %c0_20] : memref<1x4x8x16xf32, #tpu.memory_space<vmem>>, vector<1x1x1x16xf32>
    %34 = vector.shape_cast %33 : vector<1x1x1x16xf32> to vector<1x16xf32>
    %35 = vector.broadcast %1 : f32 to vector<1x16xf32>
    %36 = arith.mulf %34, %35 : vector<1x16xf32>
    %c0_21 = arith.constant 0 : index
    %c1_22 = arith.constant 1 : index
    %c0_23 = arith.constant 0 : index
    %c0_24 = arith.constant 0 : index
    %37 = vector.load %arg4[%c0_21, %c1_22, %c0_23, %c0_24] : memref<1x4x8x16xf32, #tpu.memory_space<vmem>>, vector<1x1x1x16xf32>
    %38 = vector.shape_cast %37 : vector<1x1x1x16xf32> to vector<1x16xf32>
    %39 = vector.broadcast %3 : f32 to vector<1x16xf32>
    %40 = arith.mulf %38, %39 : vector<1x16xf32>
    %41 = vector.extract_strided_slice %32 {offsets = [0, 0], sizes = [7, 16], strides = [1, 1]} : vector<8x16xf32> to vector<7x16xf32>
    %42 = tpu.concatenate %36, %41 in 0 : vector<1x16xf32>, vector<7x16xf32> -> vector<8x16xf32>
    %43 = vector.extract_strided_slice %32 {offsets = [1, 0], sizes = [7, 16], strides = [1, 1]} : vector<8x16xf32> to vector<7x16xf32>
    %44 = tpu.concatenate %43, %40 in 0 : vector<7x16xf32>, vector<1x16xf32> -> vector<8x16xf32>
    %45 = vector.extract_strided_slice %42 {offsets = [0, 0], sizes = [8, 15], strides = [1, 1]} : vector<8x16xf32> to vector<8x15xf32>
    %46 = tpu.concatenate %4, %45 in 1 : vector<8x1xf32>, vector<8x15xf32> -> vector<8x16xf32>
    %47 = vector.extract_strided_slice %42 {offsets = [0, 1], sizes = [8, 15], strides = [1, 1]} : vector<8x16xf32> to vector<8x15xf32>
    %48 = tpu.concatenate %47, %4 in 1 : vector<8x15xf32>, vector<8x1xf32> -> vector<8x16xf32>
    %49 = vector.extract_strided_slice %32 {offsets = [0, 0], sizes = [8, 15], strides = [1, 1]} : vector<8x16xf32> to vector<8x15xf32>
    %50 = tpu.concatenate %4, %49 in 1 : vector<8x1xf32>, vector<8x15xf32> -> vector<8x16xf32>
    %51 = vector.extract_strided_slice %32 {offsets = [0, 1], sizes = [8, 15], strides = [1, 1]} : vector<8x16xf32> to vector<8x15xf32>
    %52 = tpu.concatenate %51, %4 in 1 : vector<8x15xf32>, vector<8x1xf32> -> vector<8x16xf32>
    %53 = vector.extract_strided_slice %44 {offsets = [0, 0], sizes = [8, 15], strides = [1, 1]} : vector<8x16xf32> to vector<8x15xf32>
    %54 = tpu.concatenate %4, %53 in 1 : vector<8x1xf32>, vector<8x15xf32> -> vector<8x16xf32>
    %55 = vector.extract_strided_slice %44 {offsets = [0, 1], sizes = [8, 15], strides = [1, 1]} : vector<8x16xf32> to vector<8x15xf32>
    %56 = tpu.concatenate %55, %4 in 1 : vector<8x15xf32>, vector<8x1xf32> -> vector<8x16xf32>
    %c0_25 = arith.constant 0 : index
    %c2 = arith.constant 2 : index
    %c0_26 = arith.constant 0 : index
    %c0_27 = arith.constant 0 : index
    %57 = vector.load %arg2[%c0_25, %c2, %c0_26, %c0_27] : memref<1x4x8x16xf32, #tpu.memory_space<vmem>>, vector<1x1x8x16xf32>
    %58 = vector.shape_cast %57 : vector<1x1x8x16xf32> to vector<8x16xf32>
    %c0_28 = arith.constant 0 : index
    %c2_29 = arith.constant 2 : index
    %c7_30 = arith.constant 7 : index
    %c0_31 = arith.constant 0 : index
    %59 = vector.load %arg3[%c0_28, %c2_29, %c7_30, %c0_31] : memref<1x4x8x16xf32, #tpu.memory_space<vmem>>, vector<1x1x1x16xf32>
    %60 = vector.shape_cast %59 : vector<1x1x1x16xf32> to vector<1x16xf32>
    %61 = vector.broadcast %1 : f32 to vector<1x16xf32>
    %62 = arith.mulf %60, %61 : vector<1x16xf32>
    %c0_32 = arith.constant 0 : index
    %c2_33 = arith.constant 2 : index
    %c0_34 = arith.constant 0 : index
    %c0_35 = arith.constant 0 : index
    %63 = vector.load %arg4[%c0_32, %c2_33, %c0_34, %c0_35] : memref<1x4x8x16xf32, #tpu.memory_space<vmem>>, vector<1x1x1x16xf32>
    %64 = vector.shape_cast %63 : vector<1x1x1x16xf32> to vector<1x16xf32>
    %65 = vector.broadcast %3 : f32 to vector<1x16xf32>
    %66 = arith.mulf %64, %65 : vector<1x16xf32>
    %67 = vector.extract_strided_slice %58 {offsets = [0, 0], sizes = [7, 16], strides = [1, 1]} : vector<8x16xf32> to vector<7x16xf32>
    %68 = tpu.concatenate %62, %67 in 0 : vector<1x16xf32>, vector<7x16xf32> -> vector<8x16xf32>
    %69 = vector.extract_strided_slice %58 {offsets = [1, 0], sizes = [7, 16], strides = [1, 1]} : vector<8x16xf32> to vector<7x16xf32>
    %70 = tpu.concatenate %69, %66 in 0 : vector<7x16xf32>, vector<1x16xf32> -> vector<8x16xf32>
    %71 = vector.extract_strided_slice %68 {offsets = [0, 0], sizes = [8, 15], strides = [1, 1]} : vector<8x16xf32> to vector<8x15xf32>
    %72 = tpu.concatenate %4, %71 in 1 : vector<8x1xf32>, vector<8x15xf32> -> vector<8x16xf32>
    %73 = vector.extract_strided_slice %68 {offsets = [0, 1], sizes = [8, 15], strides = [1, 1]} : vector<8x16xf32> to vector<8x15xf32>
    %74 = tpu.concatenate %73, %4 in 1 : vector<8x15xf32>, vector<8x1xf32> -> vector<8x16xf32>
    %75 = vector.extract_strided_slice %58 {offsets = [0, 0], sizes = [8, 15], strides = [1, 1]} : vector<8x16xf32> to vector<8x15xf32>
    %76 = tpu.concatenate %4, %75 in 1 : vector<8x1xf32>, vector<8x15xf32> -> vector<8x16xf32>
    %77 = vector.extract_strided_slice %58 {offsets = [0, 1], sizes = [8, 15], strides = [1, 1]} : vector<8x16xf32> to vector<8x15xf32>
    %78 = tpu.concatenate %77, %4 in 1 : vector<8x15xf32>, vector<8x1xf32> -> vector<8x16xf32>
    %79 = vector.extract_strided_slice %70 {offsets = [0, 0], sizes = [8, 15], strides = [1, 1]} : vector<8x16xf32> to vector<8x15xf32>
    %80 = tpu.concatenate %4, %79 in 1 : vector<8x1xf32>, vector<8x15xf32> -> vector<8x16xf32>
    %81 = vector.extract_strided_slice %70 {offsets = [0, 1], sizes = [8, 15], strides = [1, 1]} : vector<8x16xf32> to vector<8x15xf32>
    %82 = tpu.concatenate %81, %4 in 1 : vector<8x15xf32>, vector<8x1xf32> -> vector<8x16xf32>
    %c0_36 = arith.constant 0 : index
    %c3 = arith.constant 3 : index
    %c0_37 = arith.constant 0 : index
    %c0_38 = arith.constant 0 : index
    %83 = vector.load %arg2[%c0_36, %c3, %c0_37, %c0_38] : memref<1x4x8x16xf32, #tpu.memory_space<vmem>>, vector<1x1x8x16xf32>
    %84 = vector.shape_cast %83 : vector<1x1x8x16xf32> to vector<8x16xf32>
    %c0_39 = arith.constant 0 : index
    %c3_40 = arith.constant 3 : index
    %c7_41 = arith.constant 7 : index
    %c0_42 = arith.constant 0 : index
    %85 = vector.load %arg3[%c0_39, %c3_40, %c7_41, %c0_42] : memref<1x4x8x16xf32, #tpu.memory_space<vmem>>, vector<1x1x1x16xf32>
    %86 = vector.shape_cast %85 : vector<1x1x1x16xf32> to vector<1x16xf32>
    %87 = vector.broadcast %1 : f32 to vector<1x16xf32>
    %88 = arith.mulf %86, %87 : vector<1x16xf32>
    %c0_43 = arith.constant 0 : index
    %c3_44 = arith.constant 3 : index
    %c0_45 = arith.constant 0 : index
    %c0_46 = arith.constant 0 : index
    %89 = vector.load %arg4[%c0_43, %c3_44, %c0_45, %c0_46] : memref<1x4x8x16xf32, #tpu.memory_space<vmem>>, vector<1x1x1x16xf32>
    %90 = vector.shape_cast %89 : vector<1x1x1x16xf32> to vector<1x16xf32>
    %91 = vector.broadcast %3 : f32 to vector<1x16xf32>
    %92 = arith.mulf %90, %91 : vector<1x16xf32>
    %93 = vector.extract_strided_slice %84 {offsets = [0, 0], sizes = [7, 16], strides = [1, 1]} : vector<8x16xf32> to vector<7x16xf32>
    %94 = tpu.concatenate %88, %93 in 0 : vector<1x16xf32>, vector<7x16xf32> -> vector<8x16xf32>
    %95 = vector.extract_strided_slice %84 {offsets = [1, 0], sizes = [7, 16], strides = [1, 1]} : vector<8x16xf32> to vector<7x16xf32>
    %96 = tpu.concatenate %95, %92 in 0 : vector<7x16xf32>, vector<1x16xf32> -> vector<8x16xf32>
    %97 = vector.extract_strided_slice %94 {offsets = [0, 0], sizes = [8, 15], strides = [1, 1]} : vector<8x16xf32> to vector<8x15xf32>
    %98 = tpu.concatenate %4, %97 in 1 : vector<8x1xf32>, vector<8x15xf32> -> vector<8x16xf32>
    %99 = vector.extract_strided_slice %94 {offsets = [0, 1], sizes = [8, 15], strides = [1, 1]} : vector<8x16xf32> to vector<8x15xf32>
    %100 = tpu.concatenate %99, %4 in 1 : vector<8x15xf32>, vector<8x1xf32> -> vector<8x16xf32>
    %101 = vector.extract_strided_slice %84 {offsets = [0, 0], sizes = [8, 15], strides = [1, 1]} : vector<8x16xf32> to vector<8x15xf32>
    %102 = tpu.concatenate %4, %101 in 1 : vector<8x1xf32>, vector<8x15xf32> -> vector<8x16xf32>
    %103 = vector.extract_strided_slice %84 {offsets = [0, 1], sizes = [8, 15], strides = [1, 1]} : vector<8x16xf32> to vector<8x15xf32>
    %104 = tpu.concatenate %103, %4 in 1 : vector<8x15xf32>, vector<8x1xf32> -> vector<8x16xf32>
    %105 = vector.extract_strided_slice %96 {offsets = [0, 0], sizes = [8, 15], strides = [1, 1]} : vector<8x16xf32> to vector<8x15xf32>
    %106 = tpu.concatenate %4, %105 in 1 : vector<8x1xf32>, vector<8x15xf32> -> vector<8x16xf32>
    %107 = vector.extract_strided_slice %96 {offsets = [0, 1], sizes = [8, 15], strides = [1, 1]} : vector<8x16xf32> to vector<8x15xf32>
    %108 = tpu.concatenate %107, %4 in 1 : vector<8x15xf32>, vector<8x1xf32> -> vector<8x16xf32>
    %c0_47 = arith.constant 0 : index
    %c0_48 = arith.constant 0 : index
    %109 = memref.load %arg5[%c0_47, %c0_48] : memref<8x9xf32, #tpu.memory_space<smem>>
    %110 = vector.broadcast %109 : f32 to vector<8x16xf32>
    %111 = arith.mulf %20, %110 : vector<8x16xf32>
    %c0_49 = arith.constant 0 : index
    %c1_50 = arith.constant 1 : index
    %112 = memref.load %arg5[%c0_49, %c1_50] : memref<8x9xf32, #tpu.memory_space<smem>>
    %113 = vector.broadcast %112 : f32 to vector<8x16xf32>
    %114 = arith.mulf %16, %113 : vector<8x16xf32>
    %115 = arith.addf %111, %114 : vector<8x16xf32>
    %c0_51 = arith.constant 0 : index
    %c2_52 = arith.constant 2 : index
    %116 = memref.load %arg5[%c0_51, %c2_52] : memref<8x9xf32, #tpu.memory_space<smem>>
    %117 = vector.broadcast %116 : f32 to vector<8x16xf32>
    %118 = arith.mulf %22, %117 : vector<8x16xf32>
    %119 = arith.addf %115, %118 : vector<8x16xf32>
    %c0_53 = arith.constant 0 : index
    %c3_54 = arith.constant 3 : index
    %120 = memref.load %arg5[%c0_53, %c3_54] : memref<8x9xf32, #tpu.memory_space<smem>>
    %121 = vector.broadcast %120 : f32 to vector<8x16xf32>
    %122 = arith.mulf %24, %121 : vector<8x16xf32>
    %123 = arith.addf %119, %122 : vector<8x16xf32>
    %c0_55 = arith.constant 0 : index
    %c4 = arith.constant 4 : index
    %124 = memref.load %arg5[%c0_55, %c4] : memref<8x9xf32, #tpu.memory_space<smem>>
    %125 = vector.broadcast %124 : f32 to vector<8x16xf32>
    %126 = arith.mulf %6, %125 : vector<8x16xf32>
    %127 = arith.addf %123, %126 : vector<8x16xf32>
    %c0_56 = arith.constant 0 : index
    %c5 = arith.constant 5 : index
    %128 = memref.load %arg5[%c0_56, %c5] : memref<8x9xf32, #tpu.memory_space<smem>>
    %129 = vector.broadcast %128 : f32 to vector<8x16xf32>
    %130 = arith.mulf %26, %129 : vector<8x16xf32>
    %131 = arith.addf %127, %130 : vector<8x16xf32>
    %c0_57 = arith.constant 0 : index
    %c6 = arith.constant 6 : index
    %132 = memref.load %arg5[%c0_57, %c6] : memref<8x9xf32, #tpu.memory_space<smem>>
    %133 = vector.broadcast %132 : f32 to vector<8x16xf32>
    %134 = arith.mulf %28, %133 : vector<8x16xf32>
    %135 = arith.addf %131, %134 : vector<8x16xf32>
    %c0_58 = arith.constant 0 : index
    %c7_59 = arith.constant 7 : index
    %136 = memref.load %arg5[%c0_58, %c7_59] : memref<8x9xf32, #tpu.memory_space<smem>>
    %137 = vector.broadcast %136 : f32 to vector<8x16xf32>
    %138 = arith.mulf %18, %137 : vector<8x16xf32>
    %139 = arith.addf %135, %138 : vector<8x16xf32>
    %c0_60 = arith.constant 0 : index
    %c8 = arith.constant 8 : index
    %140 = memref.load %arg5[%c0_60, %c8] : memref<8x9xf32, #tpu.memory_space<smem>>
    %141 = vector.broadcast %140 : f32 to vector<8x16xf32>
    %142 = arith.mulf %30, %141 : vector<8x16xf32>
    %143 = arith.addf %139, %142 : vector<8x16xf32>
    %c1_61 = arith.constant 1 : index
    %c0_62 = arith.constant 0 : index
    %144 = memref.load %arg5[%c1_61, %c0_62] : memref<8x9xf32, #tpu.memory_space<smem>>
    %145 = vector.broadcast %144 : f32 to vector<8x16xf32>
    %146 = arith.mulf %20, %145 : vector<8x16xf32>
    %c1_63 = arith.constant 1 : index
    %c1_64 = arith.constant 1 : index
    %147 = memref.load %arg5[%c1_63, %c1_64] : memref<8x9xf32, #tpu.memory_space<smem>>
    %148 = vector.broadcast %147 : f32 to vector<8x16xf32>
    %149 = arith.mulf %16, %148 : vector<8x16xf32>
    %150 = arith.addf %146, %149 : vector<8x16xf32>
    %c1_65 = arith.constant 1 : index
    %c2_66 = arith.constant 2 : index
    %151 = memref.load %arg5[%c1_65, %c2_66] : memref<8x9xf32, #tpu.memory_space<smem>>
    %152 = vector.broadcast %151 : f32 to vector<8x16xf32>
    %153 = arith.mulf %22, %152 : vector<8x16xf32>
    %154 = arith.addf %150, %153 : vector<8x16xf32>
    %c1_67 = arith.constant 1 : index
    %c3_68 = arith.constant 3 : index
    %155 = memref.load %arg5[%c1_67, %c3_68] : memref<8x9xf32, #tpu.memory_space<smem>>
    %156 = vector.broadcast %155 : f32 to vector<8x16xf32>
    %157 = arith.mulf %24, %156 : vector<8x16xf32>
    %158 = arith.addf %154, %157 : vector<8x16xf32>
    %c1_69 = arith.constant 1 : index
    %c4_70 = arith.constant 4 : index
    %159 = memref.load %arg5[%c1_69, %c4_70] : memref<8x9xf32, #tpu.memory_space<smem>>
    %160 = vector.broadcast %159 : f32 to vector<8x16xf32>
    %161 = arith.mulf %6, %160 : vector<8x16xf32>
    %162 = arith.addf %158, %161 : vector<8x16xf32>
    %c1_71 = arith.constant 1 : index
    %c5_72 = arith.constant 5 : index
    %163 = memref.load %arg5[%c1_71, %c5_72] : memref<8x9xf32, #tpu.memory_space<smem>>
    %164 = vector.broadcast %163 : f32 to vector<8x16xf32>
    %165 = arith.mulf %26, %164 : vector<8x16xf32>
    %166 = arith.addf %162, %165 : vector<8x16xf32>
    %c1_73 = arith.constant 1 : index
    %c6_74 = arith.constant 6 : index
    %167 = memref.load %arg5[%c1_73, %c6_74] : memref<8x9xf32, #tpu.memory_space<smem>>
    %168 = vector.broadcast %167 : f32 to vector<8x16xf32>
    %169 = arith.mulf %28, %168 : vector<8x16xf32>
    %170 = arith.addf %166, %169 : vector<8x16xf32>
    %c1_75 = arith.constant 1 : index
    %c7_76 = arith.constant 7 : index
    %171 = memref.load %arg5[%c1_75, %c7_76] : memref<8x9xf32, #tpu.memory_space<smem>>
    %172 = vector.broadcast %171 : f32 to vector<8x16xf32>
    %173 = arith.mulf %18, %172 : vector<8x16xf32>
    %174 = arith.addf %170, %173 : vector<8x16xf32>
    %c1_77 = arith.constant 1 : index
    %c8_78 = arith.constant 8 : index
    %175 = memref.load %arg5[%c1_77, %c8_78] : memref<8x9xf32, #tpu.memory_space<smem>>
    %176 = vector.broadcast %175 : f32 to vector<8x16xf32>
    %177 = arith.mulf %30, %176 : vector<8x16xf32>
    %178 = arith.addf %174, %177 : vector<8x16xf32>
    %c2_79 = arith.constant 2 : index
    %c0_80 = arith.constant 0 : index
    %179 = memref.load %arg5[%c2_79, %c0_80] : memref<8x9xf32, #tpu.memory_space<smem>>
    %180 = vector.broadcast %179 : f32 to vector<8x16xf32>
    %181 = arith.mulf %46, %180 : vector<8x16xf32>
    %c2_81 = arith.constant 2 : index
    %c1_82 = arith.constant 1 : index
    %182 = memref.load %arg5[%c2_81, %c1_82] : memref<8x9xf32, #tpu.memory_space<smem>>
    %183 = vector.broadcast %182 : f32 to vector<8x16xf32>
    %184 = arith.mulf %42, %183 : vector<8x16xf32>
    %185 = arith.addf %181, %184 : vector<8x16xf32>
    %c2_83 = arith.constant 2 : index
    %c2_84 = arith.constant 2 : index
    %186 = memref.load %arg5[%c2_83, %c2_84] : memref<8x9xf32, #tpu.memory_space<smem>>
    %187 = vector.broadcast %186 : f32 to vector<8x16xf32>
    %188 = arith.mulf %48, %187 : vector<8x16xf32>
    %189 = arith.addf %185, %188 : vector<8x16xf32>
    %c2_85 = arith.constant 2 : index
    %c3_86 = arith.constant 3 : index
    %190 = memref.load %arg5[%c2_85, %c3_86] : memref<8x9xf32, #tpu.memory_space<smem>>
    %191 = vector.broadcast %190 : f32 to vector<8x16xf32>
    %192 = arith.mulf %50, %191 : vector<8x16xf32>
    %193 = arith.addf %189, %192 : vector<8x16xf32>
    %c2_87 = arith.constant 2 : index
    %c4_88 = arith.constant 4 : index
    %194 = memref.load %arg5[%c2_87, %c4_88] : memref<8x9xf32, #tpu.memory_space<smem>>
    %195 = vector.broadcast %194 : f32 to vector<8x16xf32>
    %196 = arith.mulf %32, %195 : vector<8x16xf32>
    %197 = arith.addf %193, %196 : vector<8x16xf32>
    %c2_89 = arith.constant 2 : index
    %c5_90 = arith.constant 5 : index
    %198 = memref.load %arg5[%c2_89, %c5_90] : memref<8x9xf32, #tpu.memory_space<smem>>
    %199 = vector.broadcast %198 : f32 to vector<8x16xf32>
    %200 = arith.mulf %52, %199 : vector<8x16xf32>
    %201 = arith.addf %197, %200 : vector<8x16xf32>
    %c2_91 = arith.constant 2 : index
    %c6_92 = arith.constant 6 : index
    %202 = memref.load %arg5[%c2_91, %c6_92] : memref<8x9xf32, #tpu.memory_space<smem>>
    %203 = vector.broadcast %202 : f32 to vector<8x16xf32>
    %204 = arith.mulf %54, %203 : vector<8x16xf32>
    %205 = arith.addf %201, %204 : vector<8x16xf32>
    %c2_93 = arith.constant 2 : index
    %c7_94 = arith.constant 7 : index
    %206 = memref.load %arg5[%c2_93, %c7_94] : memref<8x9xf32, #tpu.memory_space<smem>>
    %207 = vector.broadcast %206 : f32 to vector<8x16xf32>
    %208 = arith.mulf %44, %207 : vector<8x16xf32>
    %209 = arith.addf %205, %208 : vector<8x16xf32>
    %c2_95 = arith.constant 2 : index
    %c8_96 = arith.constant 8 : index
    %210 = memref.load %arg5[%c2_95, %c8_96] : memref<8x9xf32, #tpu.memory_space<smem>>
    %211 = vector.broadcast %210 : f32 to vector<8x16xf32>
    %212 = arith.mulf %56, %211 : vector<8x16xf32>
    %213 = arith.addf %209, %212 : vector<8x16xf32>
    %c3_97 = arith.constant 3 : index
    %c0_98 = arith.constant 0 : index
    %214 = memref.load %arg5[%c3_97, %c0_98] : memref<8x9xf32, #tpu.memory_space<smem>>
    %215 = vector.broadcast %214 : f32 to vector<8x16xf32>
    %216 = arith.mulf %46, %215 : vector<8x16xf32>
    %c3_99 = arith.constant 3 : index
    %c1_100 = arith.constant 1 : index
    %217 = memref.load %arg5[%c3_99, %c1_100] : memref<8x9xf32, #tpu.memory_space<smem>>
    %218 = vector.broadcast %217 : f32 to vector<8x16xf32>
    %219 = arith.mulf %42, %218 : vector<8x16xf32>
    %220 = arith.addf %216, %219 : vector<8x16xf32>
    %c3_101 = arith.constant 3 : index
    %c2_102 = arith.constant 2 : index
    %221 = memref.load %arg5[%c3_101, %c2_102] : memref<8x9xf32, #tpu.memory_space<smem>>
    %222 = vector.broadcast %221 : f32 to vector<8x16xf32>
    %223 = arith.mulf %48, %222 : vector<8x16xf32>
    %224 = arith.addf %220, %223 : vector<8x16xf32>
    %c3_103 = arith.constant 3 : index
    %c3_104 = arith.constant 3 : index
    %225 = memref.load %arg5[%c3_103, %c3_104] : memref<8x9xf32, #tpu.memory_space<smem>>
    %226 = vector.broadcast %225 : f32 to vector<8x16xf32>
    %227 = arith.mulf %50, %226 : vector<8x16xf32>
    %228 = arith.addf %224, %227 : vector<8x16xf32>
    %c3_105 = arith.constant 3 : index
    %c4_106 = arith.constant 4 : index
    %229 = memref.load %arg5[%c3_105, %c4_106] : memref<8x9xf32, #tpu.memory_space<smem>>
    %230 = vector.broadcast %229 : f32 to vector<8x16xf32>
    %231 = arith.mulf %32, %230 : vector<8x16xf32>
    %232 = arith.addf %228, %231 : vector<8x16xf32>
    %c3_107 = arith.constant 3 : index
    %c5_108 = arith.constant 5 : index
    %233 = memref.load %arg5[%c3_107, %c5_108] : memref<8x9xf32, #tpu.memory_space<smem>>
    %234 = vector.broadcast %233 : f32 to vector<8x16xf32>
    %235 = arith.mulf %52, %234 : vector<8x16xf32>
    %236 = arith.addf %232, %235 : vector<8x16xf32>
    %c3_109 = arith.constant 3 : index
    %c6_110 = arith.constant 6 : index
    %237 = memref.load %arg5[%c3_109, %c6_110] : memref<8x9xf32, #tpu.memory_space<smem>>
    %238 = vector.broadcast %237 : f32 to vector<8x16xf32>
    %239 = arith.mulf %54, %238 : vector<8x16xf32>
    %240 = arith.addf %236, %239 : vector<8x16xf32>
    %c3_111 = arith.constant 3 : index
    %c7_112 = arith.constant 7 : index
    %241 = memref.load %arg5[%c3_111, %c7_112] : memref<8x9xf32, #tpu.memory_space<smem>>
    %242 = vector.broadcast %241 : f32 to vector<8x16xf32>
    %243 = arith.mulf %44, %242 : vector<8x16xf32>
    %244 = arith.addf %240, %243 : vector<8x16xf32>
    %c3_113 = arith.constant 3 : index
    %c8_114 = arith.constant 8 : index
    %245 = memref.load %arg5[%c3_113, %c8_114] : memref<8x9xf32, #tpu.memory_space<smem>>
    %246 = vector.broadcast %245 : f32 to vector<8x16xf32>
    %247 = arith.mulf %56, %246 : vector<8x16xf32>
    %248 = arith.addf %244, %247 : vector<8x16xf32>
    %c4_115 = arith.constant 4 : index
    %c0_116 = arith.constant 0 : index
    %249 = memref.load %arg5[%c4_115, %c0_116] : memref<8x9xf32, #tpu.memory_space<smem>>
    %250 = vector.broadcast %249 : f32 to vector<8x16xf32>
    %251 = arith.mulf %72, %250 : vector<8x16xf32>
    %c4_117 = arith.constant 4 : index
    %c1_118 = arith.constant 1 : index
    %252 = memref.load %arg5[%c4_117, %c1_118] : memref<8x9xf32, #tpu.memory_space<smem>>
    %253 = vector.broadcast %252 : f32 to vector<8x16xf32>
    %254 = arith.mulf %68, %253 : vector<8x16xf32>
    %255 = arith.addf %251, %254 : vector<8x16xf32>
    %c4_119 = arith.constant 4 : index
    %c2_120 = arith.constant 2 : index
    %256 = memref.load %arg5[%c4_119, %c2_120] : memref<8x9xf32, #tpu.memory_space<smem>>
    %257 = vector.broadcast %256 : f32 to vector<8x16xf32>
    %258 = arith.mulf %74, %257 : vector<8x16xf32>
    %259 = arith.addf %255, %258 : vector<8x16xf32>
    %c4_121 = arith.constant 4 : index
    %c3_122 = arith.constant 3 : index
    %260 = memref.load %arg5[%c4_121, %c3_122] : memref<8x9xf32, #tpu.memory_space<smem>>
    %261 = vector.broadcast %260 : f32 to vector<8x16xf32>
    %262 = arith.mulf %76, %261 : vector<8x16xf32>
    %263 = arith.addf %259, %262 : vector<8x16xf32>
    %c4_123 = arith.constant 4 : index
    %c4_124 = arith.constant 4 : index
    %264 = memref.load %arg5[%c4_123, %c4_124] : memref<8x9xf32, #tpu.memory_space<smem>>
    %265 = vector.broadcast %264 : f32 to vector<8x16xf32>
    %266 = arith.mulf %58, %265 : vector<8x16xf32>
    %267 = arith.addf %263, %266 : vector<8x16xf32>
    %c4_125 = arith.constant 4 : index
    %c5_126 = arith.constant 5 : index
    %268 = memref.load %arg5[%c4_125, %c5_126] : memref<8x9xf32, #tpu.memory_space<smem>>
    %269 = vector.broadcast %268 : f32 to vector<8x16xf32>
    %270 = arith.mulf %78, %269 : vector<8x16xf32>
    %271 = arith.addf %267, %270 : vector<8x16xf32>
    %c4_127 = arith.constant 4 : index
    %c6_128 = arith.constant 6 : index
    %272 = memref.load %arg5[%c4_127, %c6_128] : memref<8x9xf32, #tpu.memory_space<smem>>
    %273 = vector.broadcast %272 : f32 to vector<8x16xf32>
    %274 = arith.mulf %80, %273 : vector<8x16xf32>
    %275 = arith.addf %271, %274 : vector<8x16xf32>
    %c4_129 = arith.constant 4 : index
    %c7_130 = arith.constant 7 : index
    %276 = memref.load %arg5[%c4_129, %c7_130] : memref<8x9xf32, #tpu.memory_space<smem>>
    %277 = vector.broadcast %276 : f32 to vector<8x16xf32>
    %278 = arith.mulf %70, %277 : vector<8x16xf32>
    %279 = arith.addf %275, %278 : vector<8x16xf32>
    %c4_131 = arith.constant 4 : index
    %c8_132 = arith.constant 8 : index
    %280 = memref.load %arg5[%c4_131, %c8_132] : memref<8x9xf32, #tpu.memory_space<smem>>
    %281 = vector.broadcast %280 : f32 to vector<8x16xf32>
    %282 = arith.mulf %82, %281 : vector<8x16xf32>
    %283 = arith.addf %279, %282 : vector<8x16xf32>
    %c5_133 = arith.constant 5 : index
    %c0_134 = arith.constant 0 : index
    %284 = memref.load %arg5[%c5_133, %c0_134] : memref<8x9xf32, #tpu.memory_space<smem>>
    %285 = vector.broadcast %284 : f32 to vector<8x16xf32>
    %286 = arith.mulf %72, %285 : vector<8x16xf32>
    %c5_135 = arith.constant 5 : index
    %c1_136 = arith.constant 1 : index
    %287 = memref.load %arg5[%c5_135, %c1_136] : memref<8x9xf32, #tpu.memory_space<smem>>
    %288 = vector.broadcast %287 : f32 to vector<8x16xf32>
    %289 = arith.mulf %68, %288 : vector<8x16xf32>
    %290 = arith.addf %286, %289 : vector<8x16xf32>
    %c5_137 = arith.constant 5 : index
    %c2_138 = arith.constant 2 : index
    %291 = memref.load %arg5[%c5_137, %c2_138] : memref<8x9xf32, #tpu.memory_space<smem>>
    %292 = vector.broadcast %291 : f32 to vector<8x16xf32>
    %293 = arith.mulf %74, %292 : vector<8x16xf32>
    %294 = arith.addf %290, %293 : vector<8x16xf32>
    %c5_139 = arith.constant 5 : index
    %c3_140 = arith.constant 3 : index
    %295 = memref.load %arg5[%c5_139, %c3_140] : memref<8x9xf32, #tpu.memory_space<smem>>
    %296 = vector.broadcast %295 : f32 to vector<8x16xf32>
    %297 = arith.mulf %76, %296 : vector<8x16xf32>
    %298 = arith.addf %294, %297 : vector<8x16xf32>
    %c5_141 = arith.constant 5 : index
    %c4_142 = arith.constant 4 : index
    %299 = memref.load %arg5[%c5_141, %c4_142] : memref<8x9xf32, #tpu.memory_space<smem>>
    %300 = vector.broadcast %299 : f32 to vector<8x16xf32>
    %301 = arith.mulf %58, %300 : vector<8x16xf32>
    %302 = arith.addf %298, %301 : vector<8x16xf32>
    %c5_143 = arith.constant 5 : index
    %c5_144 = arith.constant 5 : index
    %303 = memref.load %arg5[%c5_143, %c5_144] : memref<8x9xf32, #tpu.memory_space<smem>>
    %304 = vector.broadcast %303 : f32 to vector<8x16xf32>
    %305 = arith.mulf %78, %304 : vector<8x16xf32>
    %306 = arith.addf %302, %305 : vector<8x16xf32>
    %c5_145 = arith.constant 5 : index
    %c6_146 = arith.constant 6 : index
    %307 = memref.load %arg5[%c5_145, %c6_146] : memref<8x9xf32, #tpu.memory_space<smem>>
    %308 = vector.broadcast %307 : f32 to vector<8x16xf32>
    %309 = arith.mulf %80, %308 : vector<8x16xf32>
    %310 = arith.addf %306, %309 : vector<8x16xf32>
    %c5_147 = arith.constant 5 : index
    %c7_148 = arith.constant 7 : index
    %311 = memref.load %arg5[%c5_147, %c7_148] : memref<8x9xf32, #tpu.memory_space<smem>>
    %312 = vector.broadcast %311 : f32 to vector<8x16xf32>
    %313 = arith.mulf %70, %312 : vector<8x16xf32>
    %314 = arith.addf %310, %313 : vector<8x16xf32>
    %c5_149 = arith.constant 5 : index
    %c8_150 = arith.constant 8 : index
    %315 = memref.load %arg5[%c5_149, %c8_150] : memref<8x9xf32, #tpu.memory_space<smem>>
    %316 = vector.broadcast %315 : f32 to vector<8x16xf32>
    %317 = arith.mulf %82, %316 : vector<8x16xf32>
    %318 = arith.addf %314, %317 : vector<8x16xf32>
    %c6_151 = arith.constant 6 : index
    %c0_152 = arith.constant 0 : index
    %319 = memref.load %arg5[%c6_151, %c0_152] : memref<8x9xf32, #tpu.memory_space<smem>>
    %320 = vector.broadcast %319 : f32 to vector<8x16xf32>
    %321 = arith.mulf %98, %320 : vector<8x16xf32>
    %c6_153 = arith.constant 6 : index
    %c1_154 = arith.constant 1 : index
    %322 = memref.load %arg5[%c6_153, %c1_154] : memref<8x9xf32, #tpu.memory_space<smem>>
    %323 = vector.broadcast %322 : f32 to vector<8x16xf32>
    %324 = arith.mulf %94, %323 : vector<8x16xf32>
    %325 = arith.addf %321, %324 : vector<8x16xf32>
    %c6_155 = arith.constant 6 : index
    %c2_156 = arith.constant 2 : index
    %326 = memref.load %arg5[%c6_155, %c2_156] : memref<8x9xf32, #tpu.memory_space<smem>>
    %327 = vector.broadcast %326 : f32 to vector<8x16xf32>
    %328 = arith.mulf %100, %327 : vector<8x16xf32>
    %329 = arith.addf %325, %328 : vector<8x16xf32>
    %c6_157 = arith.constant 6 : index
    %c3_158 = arith.constant 3 : index
    %330 = memref.load %arg5[%c6_157, %c3_158] : memref<8x9xf32, #tpu.memory_space<smem>>
    %331 = vector.broadcast %330 : f32 to vector<8x16xf32>
    %332 = arith.mulf %102, %331 : vector<8x16xf32>
    %333 = arith.addf %329, %332 : vector<8x16xf32>
    %c6_159 = arith.constant 6 : index
    %c4_160 = arith.constant 4 : index
    %334 = memref.load %arg5[%c6_159, %c4_160] : memref<8x9xf32, #tpu.memory_space<smem>>
    %335 = vector.broadcast %334 : f32 to vector<8x16xf32>
    %336 = arith.mulf %84, %335 : vector<8x16xf32>
    %337 = arith.addf %333, %336 : vector<8x16xf32>
    %c6_161 = arith.constant 6 : index
    %c5_162 = arith.constant 5 : index
    %338 = memref.load %arg5[%c6_161, %c5_162] : memref<8x9xf32, #tpu.memory_space<smem>>
    %339 = vector.broadcast %338 : f32 to vector<8x16xf32>
    %340 = arith.mulf %104, %339 : vector<8x16xf32>
    %341 = arith.addf %337, %340 : vector<8x16xf32>
    %c6_163 = arith.constant 6 : index
    %c6_164 = arith.constant 6 : index
    %342 = memref.load %arg5[%c6_163, %c6_164] : memref<8x9xf32, #tpu.memory_space<smem>>
    %343 = vector.broadcast %342 : f32 to vector<8x16xf32>
    %344 = arith.mulf %106, %343 : vector<8x16xf32>
    %345 = arith.addf %341, %344 : vector<8x16xf32>
    %c6_165 = arith.constant 6 : index
    %c7_166 = arith.constant 7 : index
    %346 = memref.load %arg5[%c6_165, %c7_166] : memref<8x9xf32, #tpu.memory_space<smem>>
    %347 = vector.broadcast %346 : f32 to vector<8x16xf32>
    %348 = arith.mulf %96, %347 : vector<8x16xf32>
    %349 = arith.addf %345, %348 : vector<8x16xf32>
    %c6_167 = arith.constant 6 : index
    %c8_168 = arith.constant 8 : index
    %350 = memref.load %arg5[%c6_167, %c8_168] : memref<8x9xf32, #tpu.memory_space<smem>>
    %351 = vector.broadcast %350 : f32 to vector<8x16xf32>
    %352 = arith.mulf %108, %351 : vector<8x16xf32>
    %353 = arith.addf %349, %352 : vector<8x16xf32>
    %c7_169 = arith.constant 7 : index
    %c0_170 = arith.constant 0 : index
    %354 = memref.load %arg5[%c7_169, %c0_170] : memref<8x9xf32, #tpu.memory_space<smem>>
    %355 = vector.broadcast %354 : f32 to vector<8x16xf32>
    %356 = arith.mulf %98, %355 : vector<8x16xf32>
    %c7_171 = arith.constant 7 : index
    %c1_172 = arith.constant 1 : index
    %357 = memref.load %arg5[%c7_171, %c1_172] : memref<8x9xf32, #tpu.memory_space<smem>>
    %358 = vector.broadcast %357 : f32 to vector<8x16xf32>
    %359 = arith.mulf %94, %358 : vector<8x16xf32>
    %360 = arith.addf %356, %359 : vector<8x16xf32>
    %c7_173 = arith.constant 7 : index
    %c2_174 = arith.constant 2 : index
    %361 = memref.load %arg5[%c7_173, %c2_174] : memref<8x9xf32, #tpu.memory_space<smem>>
    %362 = vector.broadcast %361 : f32 to vector<8x16xf32>
    %363 = arith.mulf %100, %362 : vector<8x16xf32>
    %364 = arith.addf %360, %363 : vector<8x16xf32>
    %c7_175 = arith.constant 7 : index
    %c3_176 = arith.constant 3 : index
    %365 = memref.load %arg5[%c7_175, %c3_176] : memref<8x9xf32, #tpu.memory_space<smem>>
    %366 = vector.broadcast %365 : f32 to vector<8x16xf32>
    %367 = arith.mulf %102, %366 : vector<8x16xf32>
    %368 = arith.addf %364, %367 : vector<8x16xf32>
    %c7_177 = arith.constant 7 : index
    %c4_178 = arith.constant 4 : index
    %369 = memref.load %arg5[%c7_177, %c4_178] : memref<8x9xf32, #tpu.memory_space<smem>>
    %370 = vector.broadcast %369 : f32 to vector<8x16xf32>
    %371 = arith.mulf %84, %370 : vector<8x16xf32>
    %372 = arith.addf %368, %371 : vector<8x16xf32>
    %c7_179 = arith.constant 7 : index
    %c5_180 = arith.constant 5 : index
    %373 = memref.load %arg5[%c7_179, %c5_180] : memref<8x9xf32, #tpu.memory_space<smem>>
    %374 = vector.broadcast %373 : f32 to vector<8x16xf32>
    %375 = arith.mulf %104, %374 : vector<8x16xf32>
    %376 = arith.addf %372, %375 : vector<8x16xf32>
    %c7_181 = arith.constant 7 : index
    %c6_182 = arith.constant 6 : index
    %377 = memref.load %arg5[%c7_181, %c6_182] : memref<8x9xf32, #tpu.memory_space<smem>>
    %378 = vector.broadcast %377 : f32 to vector<8x16xf32>
    %379 = arith.mulf %106, %378 : vector<8x16xf32>
    %380 = arith.addf %376, %379 : vector<8x16xf32>
    %c7_183 = arith.constant 7 : index
    %c7_184 = arith.constant 7 : index
    %381 = memref.load %arg5[%c7_183, %c7_184] : memref<8x9xf32, #tpu.memory_space<smem>>
    %382 = vector.broadcast %381 : f32 to vector<8x16xf32>
    %383 = arith.mulf %96, %382 : vector<8x16xf32>
    %384 = arith.addf %380, %383 : vector<8x16xf32>
    %c7_185 = arith.constant 7 : index
    %c8_186 = arith.constant 8 : index
    %385 = memref.load %arg5[%c7_185, %c8_186] : memref<8x9xf32, #tpu.memory_space<smem>>
    %386 = vector.broadcast %385 : f32 to vector<8x16xf32>
    %387 = arith.mulf %108, %386 : vector<8x16xf32>
    %388 = arith.addf %384, %387 : vector<8x16xf32>
    %c0_187 = arith.constant 0 : index
    %389 = memref.load %arg7[%c0_187] : memref<8xf32, #tpu.memory_space<smem>>
    %390 = vector.broadcast %389 : f32 to vector<8x16xf32>
    %c0_188 = arith.constant 0 : index
    %c0_189 = arith.constant 0 : index
    %391 = memref.load %arg6[%c0_188, %c0_189] : memref<8x8xf32, #tpu.memory_space<smem>>
    %392 = vector.broadcast %391 : f32 to vector<8x16xf32>
    %393 = arith.mulf %143, %392 : vector<8x16xf32>
    %394 = arith.addf %390, %393 : vector<8x16xf32>
    %c1_190 = arith.constant 1 : index
    %c0_191 = arith.constant 0 : index
    %395 = memref.load %arg6[%c1_190, %c0_191] : memref<8x8xf32, #tpu.memory_space<smem>>
    %396 = vector.broadcast %395 : f32 to vector<8x16xf32>
    %397 = arith.mulf %178, %396 : vector<8x16xf32>
    %398 = arith.addf %394, %397 : vector<8x16xf32>
    %c2_192 = arith.constant 2 : index
    %c0_193 = arith.constant 0 : index
    %399 = memref.load %arg6[%c2_192, %c0_193] : memref<8x8xf32, #tpu.memory_space<smem>>
    %400 = vector.broadcast %399 : f32 to vector<8x16xf32>
    %401 = arith.mulf %213, %400 : vector<8x16xf32>
    %402 = arith.addf %398, %401 : vector<8x16xf32>
    %c3_194 = arith.constant 3 : index
    %c0_195 = arith.constant 0 : index
    %403 = memref.load %arg6[%c3_194, %c0_195] : memref<8x8xf32, #tpu.memory_space<smem>>
    %404 = vector.broadcast %403 : f32 to vector<8x16xf32>
    %405 = arith.mulf %248, %404 : vector<8x16xf32>
    %406 = arith.addf %402, %405 : vector<8x16xf32>
    %c4_196 = arith.constant 4 : index
    %c0_197 = arith.constant 0 : index
    %407 = memref.load %arg6[%c4_196, %c0_197] : memref<8x8xf32, #tpu.memory_space<smem>>
    %408 = vector.broadcast %407 : f32 to vector<8x16xf32>
    %409 = arith.mulf %283, %408 : vector<8x16xf32>
    %410 = arith.addf %406, %409 : vector<8x16xf32>
    %c5_198 = arith.constant 5 : index
    %c0_199 = arith.constant 0 : index
    %411 = memref.load %arg6[%c5_198, %c0_199] : memref<8x8xf32, #tpu.memory_space<smem>>
    %412 = vector.broadcast %411 : f32 to vector<8x16xf32>
    %413 = arith.mulf %318, %412 : vector<8x16xf32>
    %414 = arith.addf %410, %413 : vector<8x16xf32>
    %c6_200 = arith.constant 6 : index
    %c0_201 = arith.constant 0 : index
    %415 = memref.load %arg6[%c6_200, %c0_201] : memref<8x8xf32, #tpu.memory_space<smem>>
    %416 = vector.broadcast %415 : f32 to vector<8x16xf32>
    %417 = arith.mulf %353, %416 : vector<8x16xf32>
    %418 = arith.addf %414, %417 : vector<8x16xf32>
    %c7_202 = arith.constant 7 : index
    %c0_203 = arith.constant 0 : index
    %419 = memref.load %arg6[%c7_202, %c0_203] : memref<8x8xf32, #tpu.memory_space<smem>>
    %420 = vector.broadcast %419 : f32 to vector<8x16xf32>
    %421 = arith.mulf %388, %420 : vector<8x16xf32>
    %422 = arith.addf %418, %421 : vector<8x16xf32>
    %423 = vector.shape_cast %422 : vector<8x16xf32> to vector<1x1x8x16xf32>
    %c0_204 = arith.constant 0 : index
    %c0_205 = arith.constant 0 : index
    %c0_206 = arith.constant 0 : index
    %c0_207 = arith.constant 0 : index
    %424 = vector.load %arg8[%c0_204, %c0_205, %c0_206, %c0_207] : memref<1x8x8x16xf32, #tpu.memory_space<vmem>>, vector<1x1x8x16xf32>
    tpu.vector_store %arg8[%c0_204, %c0_205, %c0_206, %c0_207], %423 {strides = array<i32>} : memref<1x8x8x16xf32, #tpu.memory_space<vmem>>, vector<1x1x8x16xf32>,
    %cst_208 = arith.constant dense<0.000000e+00> : vector<16xf32>
    %425 = vector.multi_reduction <add>, %422, %cst_208 [0] : vector<8x16xf32> to vector<16xf32>
    %426 = vector.shape_cast %425 : vector<16xf32> to vector<1x16xf32>
    %427 = vector.shape_cast %426 : vector<1x16xf32> to vector<1x1x1x16xf32>
    %c0_209 = arith.constant 0 : index
    %c0_210 = arith.constant 0 : index
    %c0_211 = arith.constant 0 : index
    %c0_212 = arith.constant 0 : index
    %428 = vector.load %arg9[%c0_209, %c0_210, %c0_211, %c0_212] : memref<1x1x16x16xf32, #tpu.memory_space<vmem>>, vector<1x1x1x16xf32>
    tpu.vector_store %arg9[%c0_209, %c0_210, %c0_211, %c0_212], %427 {strides = array<i32>} : memref<1x1x16x16xf32, #tpu.memory_space<vmem>>, vector<1x1x1x16xf32>,
    %429 = arith.mulf %422, %422 : vector<8x16xf32>
    %cst_213 = arith.constant dense<0.000000e+00> : vector<16xf32>
    %430 = vector.multi_reduction <add>, %429, %cst_213 [0] : vector<8x16xf32> to vector<16xf32>
    %431 = vector.shape_cast %430 : vector<16xf32> to vector<1x16xf32>
    %432 = vector.shape_cast %431 : vector<1x16xf32> to vector<1x1x1x16xf32>
    %c0_214 = arith.constant 0 : index
    %c0_215 = arith.constant 0 : index
    %c8_216 = arith.constant 8 : index
    %c0_217 = arith.constant 0 : index
    %433 = vector.load %arg9[%c0_214, %c0_215, %c8_216, %c0_217] : memref<1x1x16x16xf32, #tpu.memory_space<vmem>>, vector<1x1x1x16xf32>
    tpu.vector_store %arg9[%c0_214, %c0_215, %c8_216, %c0_217], %432 {strides = array<i32>} : memref<1x1x16x16xf32, #tpu.memory_space<vmem>>, vector<1x1x1x16xf32>,
    %c1_218 = arith.constant 1 : index
    %434 = memref.load %arg7[%c1_218] : memref<8xf32, #tpu.memory_space<smem>>
    %435 = vector.broadcast %434 : f32 to vector<8x16xf32>
    %c0_219 = arith.constant 0 : index
    %c1_220 = arith.constant 1 : index
    %436 = memref.load %arg6[%c0_219, %c1_220] : memref<8x8xf32, #tpu.memory_space<smem>>
    %437 = vector.broadcast %436 : f32 to vector<8x16xf32>
    %438 = arith.mulf %143, %437 : vector<8x16xf32>
    %439 = arith.addf %435, %438 : vector<8x16xf32>
    %c1_221 = arith.constant 1 : index
    %c1_222 = arith.constant 1 : index
    %440 = memref.load %arg6[%c1_221, %c1_222] : memref<8x8xf32, #tpu.memory_space<smem>>
    %441 = vector.broadcast %440 : f32 to vector<8x16xf32>
    %442 = arith.mulf %178, %441 : vector<8x16xf32>
    %443 = arith.addf %439, %442 : vector<8x16xf32>
    %c2_223 = arith.constant 2 : index
    %c1_224 = arith.constant 1 : index
    %444 = memref.load %arg6[%c2_223, %c1_224] : memref<8x8xf32, #tpu.memory_space<smem>>
    %445 = vector.broadcast %444 : f32 to vector<8x16xf32>
    %446 = arith.mulf %213, %445 : vector<8x16xf32>
    %447 = arith.addf %443, %446 : vector<8x16xf32>
    %c3_225 = arith.constant 3 : index
    %c1_226 = arith.constant 1 : index
    %448 = memref.load %arg6[%c3_225, %c1_226] : memref<8x8xf32, #tpu.memory_space<smem>>
    %449 = vector.broadcast %448 : f32 to vector<8x16xf32>
    %450 = arith.mulf %248, %449 : vector<8x16xf32>
    %451 = arith.addf %447, %450 : vector<8x16xf32>
    %c4_227 = arith.constant 4 : index
    %c1_228 = arith.constant 1 : index
    %452 = memref.load %arg6[%c4_227, %c1_228] : memref<8x8xf32, #tpu.memory_space<smem>>
    %453 = vector.broadcast %452 : f32 to vector<8x16xf32>
    %454 = arith.mulf %283, %453 : vector<8x16xf32>
    %455 = arith.addf %451, %454 : vector<8x16xf32>
    %c5_229 = arith.constant 5 : index
    %c1_230 = arith.constant 1 : index
    %456 = memref.load %arg6[%c5_229, %c1_230] : memref<8x8xf32, #tpu.memory_space<smem>>
    %457 = vector.broadcast %456 : f32 to vector<8x16xf32>
    %458 = arith.mulf %318, %457 : vector<8x16xf32>
    %459 = arith.addf %455, %458 : vector<8x16xf32>
    %c6_231 = arith.constant 6 : index
    %c1_232 = arith.constant 1 : index
    %460 = memref.load %arg6[%c6_231, %c1_232] : memref<8x8xf32, #tpu.memory_space<smem>>
    %461 = vector.broadcast %460 : f32 to vector<8x16xf32>
    %462 = arith.mulf %353, %461 : vector<8x16xf32>
    %463 = arith.addf %459, %462 : vector<8x16xf32>
    %c7_233 = arith.constant 7 : index
    %c1_234 = arith.constant 1 : index
    %464 = memref.load %arg6[%c7_233, %c1_234] : memref<8x8xf32, #tpu.memory_space<smem>>
    %465 = vector.broadcast %464 : f32 to vector<8x16xf32>
    %466 = arith.mulf %388, %465 : vector<8x16xf32>
    %467 = arith.addf %463, %466 : vector<8x16xf32>
    %468 = vector.shape_cast %467 : vector<8x16xf32> to vector<1x1x8x16xf32>
    %c0_235 = arith.constant 0 : index
    %c1_236 = arith.constant 1 : index
    %c0_237 = arith.constant 0 : index
    %c0_238 = arith.constant 0 : index
    %469 = vector.load %arg8[%c0_235, %c1_236, %c0_237, %c0_238] : memref<1x8x8x16xf32, #tpu.memory_space<vmem>>, vector<1x1x8x16xf32>
    tpu.vector_store %arg8[%c0_235, %c1_236, %c0_237, %c0_238], %468 {strides = array<i32>} : memref<1x8x8x16xf32, #tpu.memory_space<vmem>>, vector<1x1x8x16xf32>,
    %cst_239 = arith.constant dense<0.000000e+00> : vector<16xf32>
    %470 = vector.multi_reduction <add>, %467, %cst_239 [0] : vector<8x16xf32> to vector<16xf32>
    %471 = vector.shape_cast %470 : vector<16xf32> to vector<1x16xf32>
    %472 = vector.shape_cast %471 : vector<1x16xf32> to vector<1x1x1x16xf32>
    %c0_240 = arith.constant 0 : index
    %c0_241 = arith.constant 0 : index
    %c1_242 = arith.constant 1 : index
    %c0_243 = arith.constant 0 : index
    %473 = vector.load %arg9[%c0_240, %c0_241, %c1_242, %c0_243] : memref<1x1x16x16xf32, #tpu.memory_space<vmem>>, vector<1x1x1x16xf32>
    tpu.vector_store %arg9[%c0_240, %c0_241, %c1_242, %c0_243], %472 {strides = array<i32>} : memref<1x1x16x16xf32, #tpu.memory_space<vmem>>, vector<1x1x1x16xf32>,
    %474 = arith.mulf %467, %467 : vector<8x16xf32>
    %cst_244 = arith.constant dense<0.000000e+00> : vector<16xf32>
    %475 = vector.multi_reduction <add>, %474, %cst_244 [0] : vector<8x16xf32> to vector<16xf32>
    %476 = vector.shape_cast %475 : vector<16xf32> to vector<1x16xf32>
    %477 = vector.shape_cast %476 : vector<1x16xf32> to vector<1x1x1x16xf32>
    %c0_245 = arith.constant 0 : index
    %c0_246 = arith.constant 0 : index
    %c9 = arith.constant 9 : index
    %c0_247 = arith.constant 0 : index
    %478 = vector.load %arg9[%c0_245, %c0_246, %c9, %c0_247] : memref<1x1x16x16xf32, #tpu.memory_space<vmem>>, vector<1x1x1x16xf32>
    tpu.vector_store %arg9[%c0_245, %c0_246, %c9, %c0_247], %477 {strides = array<i32>} : memref<1x1x16x16xf32, #tpu.memory_space<vmem>>, vector<1x1x1x16xf32>,
    %c2_248 = arith.constant 2 : index
    %479 = memref.load %arg7[%c2_248] : memref<8xf32, #tpu.memory_space<smem>>
    %480 = vector.broadcast %479 : f32 to vector<8x16xf32>
    %c0_249 = arith.constant 0 : index
    %c2_250 = arith.constant 2 : index
    %481 = memref.load %arg6[%c0_249, %c2_250] : memref<8x8xf32, #tpu.memory_space<smem>>
    %482 = vector.broadcast %481 : f32 to vector<8x16xf32>
    %483 = arith.mulf %143, %482 : vector<8x16xf32>
    %484 = arith.addf %480, %483 : vector<8x16xf32>
    %c1_251 = arith.constant 1 : index
    %c2_252 = arith.constant 2 : index
    %485 = memref.load %arg6[%c1_251, %c2_252] : memref<8x8xf32, #tpu.memory_space<smem>>
    %486 = vector.broadcast %485 : f32 to vector<8x16xf32>
    %487 = arith.mulf %178, %486 : vector<8x16xf32>
    %488 = arith.addf %484, %487 : vector<8x16xf32>
    %c2_253 = arith.constant 2 : index
    %c2_254 = arith.constant 2 : index
    %489 = memref.load %arg6[%c2_253, %c2_254] : memref<8x8xf32, #tpu.memory_space<smem>>
    %490 = vector.broadcast %489 : f32 to vector<8x16xf32>
    %491 = arith.mulf %213, %490 : vector<8x16xf32>
    %492 = arith.addf %488, %491 : vector<8x16xf32>
    %c3_255 = arith.constant 3 : index
    %c2_256 = arith.constant 2 : index
    %493 = memref.load %arg6[%c3_255, %c2_256] : memref<8x8xf32, #tpu.memory_space<smem>>
    %494 = vector.broadcast %493 : f32 to vector<8x16xf32>
    %495 = arith.mulf %248, %494 : vector<8x16xf32>
    %496 = arith.addf %492, %495 : vector<8x16xf32>
    %c4_257 = arith.constant 4 : index
    %c2_258 = arith.constant 2 : index
    %497 = memref.load %arg6[%c4_257, %c2_258] : memref<8x8xf32, #tpu.memory_space<smem>>
    %498 = vector.broadcast %497 : f32 to vector<8x16xf32>
    %499 = arith.mulf %283, %498 : vector<8x16xf32>
    %500 = arith.addf %496, %499 : vector<8x16xf32>
    %c5_259 = arith.constant 5 : index
    %c2_260 = arith.constant 2 : index
    %501 = memref.load %arg6[%c5_259, %c2_260] : memref<8x8xf32, #tpu.memory_space<smem>>
    %502 = vector.broadcast %501 : f32 to vector<8x16xf32>
    %503 = arith.mulf %318, %502 : vector<8x16xf32>
    %504 = arith.addf %500, %503 : vector<8x16xf32>
    %c6_261 = arith.constant 6 : index
    %c2_262 = arith.constant 2 : index
    %505 = memref.load %arg6[%c6_261, %c2_262] : memref<8x8xf32, #tpu.memory_space<smem>>
    %506 = vector.broadcast %505 : f32 to vector<8x16xf32>
    %507 = arith.mulf %353, %506 : vector<8x16xf32>
    %508 = arith.addf %504, %507 : vector<8x16xf32>
    %c7_263 = arith.constant 7 : index
    %c2_264 = arith.constant 2 : index
    %509 = memref.load %arg6[%c7_263, %c2_264] : memref<8x8xf32, #tpu.memory_space<smem>>
    %510 = vector.broadcast %509 : f32 to vector<8x16xf32>
    %511 = arith.mulf %388, %510 : vector<8x16xf32>
    %512 = arith.addf %508, %511 : vector<8x16xf32>
    %513 = vector.shape_cast %512 : vector<8x16xf32> to vector<1x1x8x16xf32>
    %c0_265 = arith.constant 0 : index
    %c2_266 = arith.constant 2 : index
    %c0_267 = arith.constant 0 : index
    %c0_268 = arith.constant 0 : index
    %514 = vector.load %arg8[%c0_265, %c2_266, %c0_267, %c0_268] : memref<1x8x8x16xf32, #tpu.memory_space<vmem>>, vector<1x1x8x16xf32>
    tpu.vector_store %arg8[%c0_265, %c2_266, %c0_267, %c0_268], %513 {strides = array<i32>} : memref<1x8x8x16xf32, #tpu.memory_space<vmem>>, vector<1x1x8x16xf32>,
    %cst_269 = arith.constant dense<0.000000e+00> : vector<16xf32>
    %515 = vector.multi_reduction <add>, %512, %cst_269 [0] : vector<8x16xf32> to vector<16xf32>
    %516 = vector.shape_cast %515 : vector<16xf32> to vector<1x16xf32>
    %517 = vector.shape_cast %516 : vector<1x16xf32> to vector<1x1x1x16xf32>
    %c0_270 = arith.constant 0 : index
    %c0_271 = arith.constant 0 : index
    %c2_272 = arith.constant 2 : index
    %c0_273 = arith.constant 0 : index
    %518 = vector.load %arg9[%c0_270, %c0_271, %c2_272, %c0_273] : memref<1x1x16x16xf32, #tpu.memory_space<vmem>>, vector<1x1x1x16xf32>
    tpu.vector_store %arg9[%c0_270, %c0_271, %c2_272, %c0_273], %517 {strides = array<i32>} : memref<1x1x16x16xf32, #tpu.memory_space<vmem>>, vector<1x1x1x16xf32>,
    %519 = arith.mulf %512, %512 : vector<8x16xf32>
    %cst_274 = arith.constant dense<0.000000e+00> : vector<16xf32>
    %520 = vector.multi_reduction <add>, %519, %cst_274 [0] : vector<8x16xf32> to vector<16xf32>
    %521 = vector.shape_cast %520 : vector<16xf32> to vector<1x16xf32>
    %522 = vector.shape_cast %521 : vector<1x16xf32> to vector<1x1x1x16xf32>
    %c0_275 = arith.constant 0 : index
    %c0_276 = arith.constant 0 : index
    %c10 = arith.constant 10 : index
    %c0_277 = arith.constant 0 : index
    %523 = vector.load %arg9[%c0_275, %c0_276, %c10, %c0_277] : memref<1x1x16x16xf32, #tpu.memory_space<vmem>>, vector<1x1x1x16xf32>
    tpu.vector_store %arg9[%c0_275, %c0_276, %c10, %c0_277], %522 {strides = array<i32>} : memref<1x1x16x16xf32, #tpu.memory_space<vmem>>, vector<1x1x1x16xf32>,
    %c3_278 = arith.constant 3 : index
    %524 = memref.load %arg7[%c3_278] : memref<8xf32, #tpu.memory_space<smem>>
    %525 = vector.broadcast %524 : f32 to vector<8x16xf32>
    %c0_279 = arith.constant 0 : index
    %c3_280 = arith.constant 3 : index
    %526 = memref.load %arg6[%c0_279, %c3_280] : memref<8x8xf32, #tpu.memory_space<smem>>
    %527 = vector.broadcast %526 : f32 to vector<8x16xf32>
    %528 = arith.mulf %143, %527 : vector<8x16xf32>
    %529 = arith.addf %525, %528 : vector<8x16xf32>
    %c1_281 = arith.constant 1 : index
    %c3_282 = arith.constant 3 : index
    %530 = memref.load %arg6[%c1_281, %c3_282] : memref<8x8xf32, #tpu.memory_space<smem>>
    %531 = vector.broadcast %530 : f32 to vector<8x16xf32>
    %532 = arith.mulf %178, %531 : vector<8x16xf32>
    %533 = arith.addf %529, %532 : vector<8x16xf32>
    %c2_283 = arith.constant 2 : index
    %c3_284 = arith.constant 3 : index
    %534 = memref.load %arg6[%c2_283, %c3_284] : memref<8x8xf32, #tpu.memory_space<smem>>
    %535 = vector.broadcast %534 : f32 to vector<8x16xf32>
    %536 = arith.mulf %213, %535 : vector<8x16xf32>
    %537 = arith.addf %533, %536 : vector<8x16xf32>
    %c3_285 = arith.constant 3 : index
    %c3_286 = arith.constant 3 : index
    %538 = memref.load %arg6[%c3_285, %c3_286] : memref<8x8xf32, #tpu.memory_space<smem>>
    %539 = vector.broadcast %538 : f32 to vector<8x16xf32>
    %540 = arith.mulf %248, %539 : vector<8x16xf32>
    %541 = arith.addf %537, %540 : vector<8x16xf32>
    %c4_287 = arith.constant 4 : index
    %c3_288 = arith.constant 3 : index
    %542 = memref.load %arg6[%c4_287, %c3_288] : memref<8x8xf32, #tpu.memory_space<smem>>
    %543 = vector.broadcast %542 : f32 to vector<8x16xf32>
    %544 = arith.mulf %283, %543 : vector<8x16xf32>
    %545 = arith.addf %541, %544 : vector<8x16xf32>
    %c5_289 = arith.constant 5 : index
    %c3_290 = arith.constant 3 : index
    %546 = memref.load %arg6[%c5_289, %c3_290] : memref<8x8xf32, #tpu.memory_space<smem>>
    %547 = vector.broadcast %546 : f32 to vector<8x16xf32>
    %548 = arith.mulf %318, %547 : vector<8x16xf32>
    %549 = arith.addf %545, %548 : vector<8x16xf32>
    %c6_291 = arith.constant 6 : index
    %c3_292 = arith.constant 3 : index
    %550 = memref.load %arg6[%c6_291, %c3_292] : memref<8x8xf32, #tpu.memory_space<smem>>
    %551 = vector.broadcast %550 : f32 to vector<8x16xf32>
    %552 = arith.mulf %353, %551 : vector<8x16xf32>
    %553 = arith.addf %549, %552 : vector<8x16xf32>
    %c7_293 = arith.constant 7 : index
    %c3_294 = arith.constant 3 : index
    %554 = memref.load %arg6[%c7_293, %c3_294] : memref<8x8xf32, #tpu.memory_space<smem>>
    %555 = vector.broadcast %554 : f32 to vector<8x16xf32>
    %556 = arith.mulf %388, %555 : vector<8x16xf32>
    %557 = arith.addf %553, %556 : vector<8x16xf32>
    %558 = vector.shape_cast %557 : vector<8x16xf32> to vector<1x1x8x16xf32>
    %c0_295 = arith.constant 0 : index
    %c3_296 = arith.constant 3 : index
    %c0_297 = arith.constant 0 : index
    %c0_298 = arith.constant 0 : index
    %559 = vector.load %arg8[%c0_295, %c3_296, %c0_297, %c0_298] : memref<1x8x8x16xf32, #tpu.memory_space<vmem>>, vector<1x1x8x16xf32>
    tpu.vector_store %arg8[%c0_295, %c3_296, %c0_297, %c0_298], %558 {strides = array<i32>} : memref<1x8x8x16xf32, #tpu.memory_space<vmem>>, vector<1x1x8x16xf32>,
    %cst_299 = arith.constant dense<0.000000e+00> : vector<16xf32>
    %560 = vector.multi_reduction <add>, %557, %cst_299 [0] : vector<8x16xf32> to vector<16xf32>
    %561 = vector.shape_cast %560 : vector<16xf32> to vector<1x16xf32>
    %562 = vector.shape_cast %561 : vector<1x16xf32> to vector<1x1x1x16xf32>
    %c0_300 = arith.constant 0 : index
    %c0_301 = arith.constant 0 : index
    %c3_302 = arith.constant 3 : index
    %c0_303 = arith.constant 0 : index
    %563 = vector.load %arg9[%c0_300, %c0_301, %c3_302, %c0_303] : memref<1x1x16x16xf32, #tpu.memory_space<vmem>>, vector<1x1x1x16xf32>
    tpu.vector_store %arg9[%c0_300, %c0_301, %c3_302, %c0_303], %562 {strides = array<i32>} : memref<1x1x16x16xf32, #tpu.memory_space<vmem>>, vector<1x1x1x16xf32>,
    %564 = arith.mulf %557, %557 : vector<8x16xf32>
    %cst_304 = arith.constant dense<0.000000e+00> : vector<16xf32>
    %565 = vector.multi_reduction <add>, %564, %cst_304 [0] : vector<8x16xf32> to vector<16xf32>
    %566 = vector.shape_cast %565 : vector<16xf32> to vector<1x16xf32>
    %567 = vector.shape_cast %566 : vector<1x16xf32> to vector<1x1x1x16xf32>
    %c0_305 = arith.constant 0 : index
    %c0_306 = arith.constant 0 : index
    %c11 = arith.constant 11 : index
    %c0_307 = arith.constant 0 : index
    %568 = vector.load %arg9[%c0_305, %c0_306, %c11, %c0_307] : memref<1x1x16x16xf32, #tpu.memory_space<vmem>>, vector<1x1x1x16xf32>
    tpu.vector_store %arg9[%c0_305, %c0_306, %c11, %c0_307], %567 {strides = array<i32>} : memref<1x1x16x16xf32, #tpu.memory_space<vmem>>, vector<1x1x1x16xf32>,
    %c4_308 = arith.constant 4 : index
    %569 = memref.load %arg7[%c4_308] : memref<8xf32, #tpu.memory_space<smem>>
    %570 = vector.broadcast %569 : f32 to vector<8x16xf32>
    %c0_309 = arith.constant 0 : index
    %c4_310 = arith.constant 4 : index
    %571 = memref.load %arg6[%c0_309, %c4_310] : memref<8x8xf32, #tpu.memory_space<smem>>
    %572 = vector.broadcast %571 : f32 to vector<8x16xf32>
    %573 = arith.mulf %143, %572 : vector<8x16xf32>
    %574 = arith.addf %570, %573 : vector<8x16xf32>
    %c1_311 = arith.constant 1 : index
    %c4_312 = arith.constant 4 : index
    %575 = memref.load %arg6[%c1_311, %c4_312] : memref<8x8xf32, #tpu.memory_space<smem>>
    %576 = vector.broadcast %575 : f32 to vector<8x16xf32>
    %577 = arith.mulf %178, %576 : vector<8x16xf32>
    %578 = arith.addf %574, %577 : vector<8x16xf32>
    %c2_313 = arith.constant 2 : index
    %c4_314 = arith.constant 4 : index
    %579 = memref.load %arg6[%c2_313, %c4_314] : memref<8x8xf32, #tpu.memory_space<smem>>
    %580 = vector.broadcast %579 : f32 to vector<8x16xf32>
    %581 = arith.mulf %213, %580 : vector<8x16xf32>
    %582 = arith.addf %578, %581 : vector<8x16xf32>
    %c3_315 = arith.constant 3 : index
    %c4_316 = arith.constant 4 : index
    %583 = memref.load %arg6[%c3_315, %c4_316] : memref<8x8xf32, #tpu.memory_space<smem>>
    %584 = vector.broadcast %583 : f32 to vector<8x16xf32>
    %585 = arith.mulf %248, %584 : vector<8x16xf32>
    %586 = arith.addf %582, %585 : vector<8x16xf32>
    %c4_317 = arith.constant 4 : index
    %c4_318 = arith.constant 4 : index
    %587 = memref.load %arg6[%c4_317, %c4_318] : memref<8x8xf32, #tpu.memory_space<smem>>
    %588 = vector.broadcast %587 : f32 to vector<8x16xf32>
    %589 = arith.mulf %283, %588 : vector<8x16xf32>
    %590 = arith.addf %586, %589 : vector<8x16xf32>
    %c5_319 = arith.constant 5 : index
    %c4_320 = arith.constant 4 : index
    %591 = memref.load %arg6[%c5_319, %c4_320] : memref<8x8xf32, #tpu.memory_space<smem>>
    %592 = vector.broadcast %591 : f32 to vector<8x16xf32>
    %593 = arith.mulf %318, %592 : vector<8x16xf32>
    %594 = arith.addf %590, %593 : vector<8x16xf32>
    %c6_321 = arith.constant 6 : index
    %c4_322 = arith.constant 4 : index
    %595 = memref.load %arg6[%c6_321, %c4_322] : memref<8x8xf32, #tpu.memory_space<smem>>
    %596 = vector.broadcast %595 : f32 to vector<8x16xf32>
    %597 = arith.mulf %353, %596 : vector<8x16xf32>
    %598 = arith.addf %594, %597 : vector<8x16xf32>
    %c7_323 = arith.constant 7 : index
    %c4_324 = arith.constant 4 : index
    %599 = memref.load %arg6[%c7_323, %c4_324] : memref<8x8xf32, #tpu.memory_space<smem>>
    %600 = vector.broadcast %599 : f32 to vector<8x16xf32>
    %601 = arith.mulf %388, %600 : vector<8x16xf32>
    %602 = arith.addf %598, %601 : vector<8x16xf32>
    %603 = vector.shape_cast %602 : vector<8x16xf32> to vector<1x1x8x16xf32>
    %c0_325 = arith.constant 0 : index
    %c4_326 = arith.constant 4 : index
    %c0_327 = arith.constant 0 : index
    %c0_328 = arith.constant 0 : index
    %604 = vector.load %arg8[%c0_325, %c4_326, %c0_327, %c0_328] : memref<1x8x8x16xf32, #tpu.memory_space<vmem>>, vector<1x1x8x16xf32>
    tpu.vector_store %arg8[%c0_325, %c4_326, %c0_327, %c0_328], %603 {strides = array<i32>} : memref<1x8x8x16xf32, #tpu.memory_space<vmem>>, vector<1x1x8x16xf32>,
    %cst_329 = arith.constant dense<0.000000e+00> : vector<16xf32>
    %605 = vector.multi_reduction <add>, %602, %cst_329 [0] : vector<8x16xf32> to vector<16xf32>
    %606 = vector.shape_cast %605 : vector<16xf32> to vector<1x16xf32>
    %607 = vector.shape_cast %606 : vector<1x16xf32> to vector<1x1x1x16xf32>
    %c0_330 = arith.constant 0 : index
    %c0_331 = arith.constant 0 : index
    %c4_332 = arith.constant 4 : index
    %c0_333 = arith.constant 0 : index
    %608 = vector.load %arg9[%c0_330, %c0_331, %c4_332, %c0_333] : memref<1x1x16x16xf32, #tpu.memory_space<vmem>>, vector<1x1x1x16xf32>
    tpu.vector_store %arg9[%c0_330, %c0_331, %c4_332, %c0_333], %607 {strides = array<i32>} : memref<1x1x16x16xf32, #tpu.memory_space<vmem>>, vector<1x1x1x16xf32>,
    %609 = arith.mulf %602, %602 : vector<8x16xf32>
    %cst_334 = arith.constant dense<0.000000e+00> : vector<16xf32>
    %610 = vector.multi_reduction <add>, %609, %cst_334 [0] : vector<8x16xf32> to vector<16xf32>
    %611 = vector.shape_cast %610 : vector<16xf32> to vector<1x16xf32>
    %612 = vector.shape_cast %611 : vector<1x16xf32> to vector<1x1x1x16xf32>
    %c0_335 = arith.constant 0 : index
    %c0_336 = arith.constant 0 : index
    %c12 = arith.constant 12 : index
    %c0_337 = arith.constant 0 : index
    %613 = vector.load %arg9[%c0_335, %c0_336, %c12, %c0_337] : memref<1x1x16x16xf32, #tpu.memory_space<vmem>>, vector<1x1x1x16xf32>
    tpu.vector_store %arg9[%c0_335, %c0_336, %c12, %c0_337], %612 {strides = array<i32>} : memref<1x1x16x16xf32, #tpu.memory_space<vmem>>, vector<1x1x1x16xf32>,
    %c5_338 = arith.constant 5 : index
    %614 = memref.load %arg7[%c5_338] : memref<8xf32, #tpu.memory_space<smem>>
    %615 = vector.broadcast %614 : f32 to vector<8x16xf32>
    %c0_339 = arith.constant 0 : index
    %c5_340 = arith.constant 5 : index
    %616 = memref.load %arg6[%c0_339, %c5_340] : memref<8x8xf32, #tpu.memory_space<smem>>
    %617 = vector.broadcast %616 : f32 to vector<8x16xf32>
    %618 = arith.mulf %143, %617 : vector<8x16xf32>
    %619 = arith.addf %615, %618 : vector<8x16xf32>
    %c1_341 = arith.constant 1 : index
    %c5_342 = arith.constant 5 : index
    %620 = memref.load %arg6[%c1_341, %c5_342] : memref<8x8xf32, #tpu.memory_space<smem>>
    %621 = vector.broadcast %620 : f32 to vector<8x16xf32>
    %622 = arith.mulf %178, %621 : vector<8x16xf32>
    %623 = arith.addf %619, %622 : vector<8x16xf32>
    %c2_343 = arith.constant 2 : index
    %c5_344 = arith.constant 5 : index
    %624 = memref.load %arg6[%c2_343, %c5_344] : memref<8x8xf32, #tpu.memory_space<smem>>
    %625 = vector.broadcast %624 : f32 to vector<8x16xf32>
    %626 = arith.mulf %213, %625 : vector<8x16xf32>
    %627 = arith.addf %623, %626 : vector<8x16xf32>
    %c3_345 = arith.constant 3 : index
    %c5_346 = arith.constant 5 : index
    %628 = memref.load %arg6[%c3_345, %c5_346] : memref<8x8xf32, #tpu.memory_space<smem>>
    %629 = vector.broadcast %628 : f32 to vector<8x16xf32>
    %630 = arith.mulf %248, %629 : vector<8x16xf32>
    %631 = arith.addf %627, %630 : vector<8x16xf32>
    %c4_347 = arith.constant 4 : index
    %c5_348 = arith.constant 5 : index
    %632 = memref.load %arg6[%c4_347, %c5_348] : memref<8x8xf32, #tpu.memory_space<smem>>
    %633 = vector.broadcast %632 : f32 to vector<8x16xf32>
    %634 = arith.mulf %283, %633 : vector<8x16xf32>
    %635 = arith.addf %631, %634 : vector<8x16xf32>
    %c5_349 = arith.constant 5 : index
    %c5_350 = arith.constant 5 : index
    %636 = memref.load %arg6[%c5_349, %c5_350] : memref<8x8xf32, #tpu.memory_space<smem>>
    %637 = vector.broadcast %636 : f32 to vector<8x16xf32>
    %638 = arith.mulf %318, %637 : vector<8x16xf32>
    %639 = arith.addf %635, %638 : vector<8x16xf32>
    %c6_351 = arith.constant 6 : index
    %c5_352 = arith.constant 5 : index
    %640 = memref.load %arg6[%c6_351, %c5_352] : memref<8x8xf32, #tpu.memory_space<smem>>
    %641 = vector.broadcast %640 : f32 to vector<8x16xf32>
    %642 = arith.mulf %353, %641 : vector<8x16xf32>
    %643 = arith.addf %639, %642 : vector<8x16xf32>
    %c7_353 = arith.constant 7 : index
    %c5_354 = arith.constant 5 : index
    %644 = memref.load %arg6[%c7_353, %c5_354] : memref<8x8xf32, #tpu.memory_space<smem>>
    %645 = vector.broadcast %644 : f32 to vector<8x16xf32>
    %646 = arith.mulf %388, %645 : vector<8x16xf32>
    %647 = arith.addf %643, %646 : vector<8x16xf32>
    %648 = vector.shape_cast %647 : vector<8x16xf32> to vector<1x1x8x16xf32>
    %c0_355 = arith.constant 0 : index
    %c5_356 = arith.constant 5 : index
    %c0_357 = arith.constant 0 : index
    %c0_358 = arith.constant 0 : index
    %649 = vector.load %arg8[%c0_355, %c5_356, %c0_357, %c0_358] : memref<1x8x8x16xf32, #tpu.memory_space<vmem>>, vector<1x1x8x16xf32>
    tpu.vector_store %arg8[%c0_355, %c5_356, %c0_357, %c0_358], %648 {strides = array<i32>} : memref<1x8x8x16xf32, #tpu.memory_space<vmem>>, vector<1x1x8x16xf32>,
    %cst_359 = arith.constant dense<0.000000e+00> : vector<16xf32>
    %650 = vector.multi_reduction <add>, %647, %cst_359 [0] : vector<8x16xf32> to vector<16xf32>
    %651 = vector.shape_cast %650 : vector<16xf32> to vector<1x16xf32>
    %652 = vector.shape_cast %651 : vector<1x16xf32> to vector<1x1x1x16xf32>
    %c0_360 = arith.constant 0 : index
    %c0_361 = arith.constant 0 : index
    %c5_362 = arith.constant 5 : index
    %c0_363 = arith.constant 0 : index
    %653 = vector.load %arg9[%c0_360, %c0_361, %c5_362, %c0_363] : memref<1x1x16x16xf32, #tpu.memory_space<vmem>>, vector<1x1x1x16xf32>
    tpu.vector_store %arg9[%c0_360, %c0_361, %c5_362, %c0_363], %652 {strides = array<i32>} : memref<1x1x16x16xf32, #tpu.memory_space<vmem>>, vector<1x1x1x16xf32>,
    %654 = arith.mulf %647, %647 : vector<8x16xf32>
    %cst_364 = arith.constant dense<0.000000e+00> : vector<16xf32>
    %655 = vector.multi_reduction <add>, %654, %cst_364 [0] : vector<8x16xf32> to vector<16xf32>
    %656 = vector.shape_cast %655 : vector<16xf32> to vector<1x16xf32>
    %657 = vector.shape_cast %656 : vector<1x16xf32> to vector<1x1x1x16xf32>
    %c0_365 = arith.constant 0 : index
    %c0_366 = arith.constant 0 : index
    %c13 = arith.constant 13 : index
    %c0_367 = arith.constant 0 : index
    %658 = vector.load %arg9[%c0_365, %c0_366, %c13, %c0_367] : memref<1x1x16x16xf32, #tpu.memory_space<vmem>>, vector<1x1x1x16xf32>
    tpu.vector_store %arg9[%c0_365, %c0_366, %c13, %c0_367], %657 {strides = array<i32>} : memref<1x1x16x16xf32, #tpu.memory_space<vmem>>, vector<1x1x1x16xf32>,
    %c6_368 = arith.constant 6 : index
    %659 = memref.load %arg7[%c6_368] : memref<8xf32, #tpu.memory_space<smem>>
    %660 = vector.broadcast %659 : f32 to vector<8x16xf32>
    %c0_369 = arith.constant 0 : index
    %c6_370 = arith.constant 6 : index
    %661 = memref.load %arg6[%c0_369, %c6_370] : memref<8x8xf32, #tpu.memory_space<smem>>
    %662 = vector.broadcast %661 : f32 to vector<8x16xf32>
    %663 = arith.mulf %143, %662 : vector<8x16xf32>
    %664 = arith.addf %660, %663 : vector<8x16xf32>
    %c1_371 = arith.constant 1 : index
    %c6_372 = arith.constant 6 : index
    %665 = memref.load %arg6[%c1_371, %c6_372] : memref<8x8xf32, #tpu.memory_space<smem>>
    %666 = vector.broadcast %665 : f32 to vector<8x16xf32>
    %667 = arith.mulf %178, %666 : vector<8x16xf32>
    %668 = arith.addf %664, %667 : vector<8x16xf32>
    %c2_373 = arith.constant 2 : index
    %c6_374 = arith.constant 6 : index
    %669 = memref.load %arg6[%c2_373, %c6_374] : memref<8x8xf32, #tpu.memory_space<smem>>
    %670 = vector.broadcast %669 : f32 to vector<8x16xf32>
    %671 = arith.mulf %213, %670 : vector<8x16xf32>
    %672 = arith.addf %668, %671 : vector<8x16xf32>
    %c3_375 = arith.constant 3 : index
    %c6_376 = arith.constant 6 : index
    %673 = memref.load %arg6[%c3_375, %c6_376] : memref<8x8xf32, #tpu.memory_space<smem>>
    %674 = vector.broadcast %673 : f32 to vector<8x16xf32>
    %675 = arith.mulf %248, %674 : vector<8x16xf32>
    %676 = arith.addf %672, %675 : vector<8x16xf32>
    %c4_377 = arith.constant 4 : index
    %c6_378 = arith.constant 6 : index
    %677 = memref.load %arg6[%c4_377, %c6_378] : memref<8x8xf32, #tpu.memory_space<smem>>
    %678 = vector.broadcast %677 : f32 to vector<8x16xf32>
    %679 = arith.mulf %283, %678 : vector<8x16xf32>
    %680 = arith.addf %676, %679 : vector<8x16xf32>
    %c5_379 = arith.constant 5 : index
    %c6_380 = arith.constant 6 : index
    %681 = memref.load %arg6[%c5_379, %c6_380] : memref<8x8xf32, #tpu.memory_space<smem>>
    %682 = vector.broadcast %681 : f32 to vector<8x16xf32>
    %683 = arith.mulf %318, %682 : vector<8x16xf32>
    %684 = arith.addf %680, %683 : vector<8x16xf32>
    %c6_381 = arith.constant 6 : index
    %c6_382 = arith.constant 6 : index
    %685 = memref.load %arg6[%c6_381, %c6_382] : memref<8x8xf32, #tpu.memory_space<smem>>
    %686 = vector.broadcast %685 : f32 to vector<8x16xf32>
    %687 = arith.mulf %353, %686 : vector<8x16xf32>
    %688 = arith.addf %684, %687 : vector<8x16xf32>
    %c7_383 = arith.constant 7 : index
    %c6_384 = arith.constant 6 : index
    %689 = memref.load %arg6[%c7_383, %c6_384] : memref<8x8xf32, #tpu.memory_space<smem>>
    %690 = vector.broadcast %689 : f32 to vector<8x16xf32>
    %691 = arith.mulf %388, %690 : vector<8x16xf32>
    %692 = arith.addf %688, %691 : vector<8x16xf32>
    %693 = vector.shape_cast %692 : vector<8x16xf32> to vector<1x1x8x16xf32>
    %c0_385 = arith.constant 0 : index
    %c6_386 = arith.constant 6 : index
    %c0_387 = arith.constant 0 : index
    %c0_388 = arith.constant 0 : index
    %694 = vector.load %arg8[%c0_385, %c6_386, %c0_387, %c0_388] : memref<1x8x8x16xf32, #tpu.memory_space<vmem>>, vector<1x1x8x16xf32>
    tpu.vector_store %arg8[%c0_385, %c6_386, %c0_387, %c0_388], %693 {strides = array<i32>} : memref<1x8x8x16xf32, #tpu.memory_space<vmem>>, vector<1x1x8x16xf32>,
    %cst_389 = arith.constant dense<0.000000e+00> : vector<16xf32>
    %695 = vector.multi_reduction <add>, %692, %cst_389 [0] : vector<8x16xf32> to vector<16xf32>
    %696 = vector.shape_cast %695 : vector<16xf32> to vector<1x16xf32>
    %697 = vector.shape_cast %696 : vector<1x16xf32> to vector<1x1x1x16xf32>
    %c0_390 = arith.constant 0 : index
    %c0_391 = arith.constant 0 : index
    %c6_392 = arith.constant 6 : index
    %c0_393 = arith.constant 0 : index
    %698 = vector.load %arg9[%c0_390, %c0_391, %c6_392, %c0_393] : memref<1x1x16x16xf32, #tpu.memory_space<vmem>>, vector<1x1x1x16xf32>
    tpu.vector_store %arg9[%c0_390, %c0_391, %c6_392, %c0_393], %697 {strides = array<i32>} : memref<1x1x16x16xf32, #tpu.memory_space<vmem>>, vector<1x1x1x16xf32>,
    %699 = arith.mulf %692, %692 : vector<8x16xf32>
    %cst_394 = arith.constant dense<0.000000e+00> : vector<16xf32>
    %700 = vector.multi_reduction <add>, %699, %cst_394 [0] : vector<8x16xf32> to vector<16xf32>
    %701 = vector.shape_cast %700 : vector<16xf32> to vector<1x16xf32>
    %702 = vector.shape_cast %701 : vector<1x16xf32> to vector<1x1x1x16xf32>
    %c0_395 = arith.constant 0 : index
    %c0_396 = arith.constant 0 : index
    %c14 = arith.constant 14 : index
    %c0_397 = arith.constant 0 : index
    %703 = vector.load %arg9[%c0_395, %c0_396, %c14, %c0_397] : memref<1x1x16x16xf32, #tpu.memory_space<vmem>>, vector<1x1x1x16xf32>
    tpu.vector_store %arg9[%c0_395, %c0_396, %c14, %c0_397], %702 {strides = array<i32>} : memref<1x1x16x16xf32, #tpu.memory_space<vmem>>, vector<1x1x1x16xf32>,
    %c7_398 = arith.constant 7 : index
    %704 = memref.load %arg7[%c7_398] : memref<8xf32, #tpu.memory_space<smem>>
    %705 = vector.broadcast %704 : f32 to vector<8x16xf32>
    %c0_399 = arith.constant 0 : index
    %c7_400 = arith.constant 7 : index
    %706 = memref.load %arg6[%c0_399, %c7_400] : memref<8x8xf32, #tpu.memory_space<smem>>
    %707 = vector.broadcast %706 : f32 to vector<8x16xf32>
    %708 = arith.mulf %143, %707 : vector<8x16xf32>
    %709 = arith.addf %705, %708 : vector<8x16xf32>
    %c1_401 = arith.constant 1 : index
    %c7_402 = arith.constant 7 : index
    %710 = memref.load %arg6[%c1_401, %c7_402] : memref<8x8xf32, #tpu.memory_space<smem>>
    %711 = vector.broadcast %710 : f32 to vector<8x16xf32>
    %712 = arith.mulf %178, %711 : vector<8x16xf32>
    %713 = arith.addf %709, %712 : vector<8x16xf32>
    %c2_403 = arith.constant 2 : index
    %c7_404 = arith.constant 7 : index
    %714 = memref.load %arg6[%c2_403, %c7_404] : memref<8x8xf32, #tpu.memory_space<smem>>
    %715 = vector.broadcast %714 : f32 to vector<8x16xf32>
    %716 = arith.mulf %213, %715 : vector<8x16xf32>
    %717 = arith.addf %713, %716 : vector<8x16xf32>
    %c3_405 = arith.constant 3 : index
    %c7_406 = arith.constant 7 : index
    %718 = memref.load %arg6[%c3_405, %c7_406] : memref<8x8xf32, #tpu.memory_space<smem>>
    %719 = vector.broadcast %718 : f32 to vector<8x16xf32>
    %720 = arith.mulf %248, %719 : vector<8x16xf32>
    %721 = arith.addf %717, %720 : vector<8x16xf32>
    %c4_407 = arith.constant 4 : index
    %c7_408 = arith.constant 7 : index
    %722 = memref.load %arg6[%c4_407, %c7_408] : memref<8x8xf32, #tpu.memory_space<smem>>
    %723 = vector.broadcast %722 : f32 to vector<8x16xf32>
    %724 = arith.mulf %283, %723 : vector<8x16xf32>
    %725 = arith.addf %721, %724 : vector<8x16xf32>
    %c5_409 = arith.constant 5 : index
    %c7_410 = arith.constant 7 : index
    %726 = memref.load %arg6[%c5_409, %c7_410] : memref<8x8xf32, #tpu.memory_space<smem>>
    %727 = vector.broadcast %726 : f32 to vector<8x16xf32>
    %728 = arith.mulf %318, %727 : vector<8x16xf32>
    %729 = arith.addf %725, %728 : vector<8x16xf32>
    %c6_411 = arith.constant 6 : index
    %c7_412 = arith.constant 7 : index
    %730 = memref.load %arg6[%c6_411, %c7_412] : memref<8x8xf32, #tpu.memory_space<smem>>
    %731 = vector.broadcast %730 : f32 to vector<8x16xf32>
    %732 = arith.mulf %353, %731 : vector<8x16xf32>
    %733 = arith.addf %729, %732 : vector<8x16xf32>
    %c7_413 = arith.constant 7 : index
    %c7_414 = arith.constant 7 : index
    %734 = memref.load %arg6[%c7_413, %c7_414] : memref<8x8xf32, #tpu.memory_space<smem>>
    %735 = vector.broadcast %734 : f32 to vector<8x16xf32>
    %736 = arith.mulf %388, %735 : vector<8x16xf32>
    %737 = arith.addf %733, %736 : vector<8x16xf32>
    %738 = vector.shape_cast %737 : vector<8x16xf32> to vector<1x1x8x16xf32>
    %c0_415 = arith.constant 0 : index
    %c7_416 = arith.constant 7 : index
    %c0_417 = arith.constant 0 : index
    %c0_418 = arith.constant 0 : index
    %739 = vector.load %arg8[%c0_415, %c7_416, %c0_417, %c0_418] : memref<1x8x8x16xf32, #tpu.memory_space<vmem>>, vector<1x1x8x16xf32>
    tpu.vector_store %arg8[%c0_415, %c7_416, %c0_417, %c0_418], %738 {strides = array<i32>} : memref<1x8x8x16xf32, #tpu.memory_space<vmem>>, vector<1x1x8x16xf32>,
    %cst_419 = arith.constant dense<0.000000e+00> : vector<16xf32>
    %740 = vector.multi_reduction <add>, %737, %cst_419 [0] : vector<8x16xf32> to vector<16xf32>
    %741 = vector.shape_cast %740 : vector<16xf32> to vector<1x16xf32>
    %742 = vector.shape_cast %741 : vector<1x16xf32> to vector<1x1x1x16xf32>
    %c0_420 = arith.constant 0 : index
    %c0_421 = arith.constant 0 : index
    %c7_422 = arith.constant 7 : index
    %c0_423 = arith.constant 0 : index
    %743 = vector.load %arg9[%c0_420, %c0_421, %c7_422, %c0_423] : memref<1x1x16x16xf32, #tpu.memory_space<vmem>>, vector<1x1x1x16xf32>
    tpu.vector_store %arg9[%c0_420, %c0_421, %c7_422, %c0_423], %742 {strides = array<i32>} : memref<1x1x16x16xf32, #tpu.memory_space<vmem>>, vector<1x1x1x16xf32>,
    %744 = arith.mulf %737, %737 : vector<8x16xf32>
    %cst_424 = arith.constant dense<0.000000e+00> : vector<16xf32>
    %745 = vector.multi_reduction <add>, %744, %cst_424 [0] : vector<8x16xf32> to vector<16xf32>
    %746 = vector.shape_cast %745 : vector<16xf32> to vector<1x16xf32>
    %747 = vector.shape_cast %746 : vector<1x16xf32> to vector<1x1x1x16xf32>
    %c0_425 = arith.constant 0 : index
    %c0_426 = arith.constant 0 : index
    %c15 = arith.constant 15 : index
    %c0_427 = arith.constant 0 : index
    %748 = vector.load %arg9[%c0_425, %c0_426, %c15, %c0_427] : memref<1x1x16x16xf32, #tpu.memory_space<vmem>>, vector<1x1x1x16xf32>
    tpu.vector_store %arg9[%c0_425, %c0_426, %c15, %c0_427], %747 {strides = array<i32>} : memref<1x1x16x16xf32, #tpu.memory_space<vmem>>, vector<1x1x1x16xf32>,
    return
  }
  func.func @transform_0(%arg0: i32, %arg1: i32) -> (i32, i32, i32, i32) {
    %c0_i32 = arith.constant 0 : i32
    %c0_i32_0 = arith.constant 0 : i32
    %c0_i32_1 = arith.constant 0 : i32
    return %arg0, %c0_i32, %arg1, %c0_i32_0 : i32, i32, i32, i32
  }
  func.func @transform_1(%arg0: i32, %arg1: i32) -> (i32, i32, i32, i32) {
    %c1_i32 = arith.constant 1 : i32
    %0 = arith.muli %arg1, %c1_i32 : i32
    %c1_i32_0 = arith.constant 1 : i32
    %1 = arith.subi %0, %c1_i32_0 : i32
    %c0_i32 = arith.constant 0 : i32
    %2 = arith.maxsi %1, %c0_i32 : i32
    %c0_i32_1 = arith.constant 0 : i32
    %c0_i32_2 = arith.constant 0 : i32
    %c0_i32_3 = arith.constant 0 : i32
    return %arg0, %c0_i32_1, %2, %c0_i32_2 : i32, i32, i32, i32
  }
  func.func @transform_2(%arg0: i32, %arg1: i32) -> (i32, i32, i32, i32) {
    %c1_i32 = arith.constant 1 : i32
    %0 = arith.addi %arg1, %c1_i32 : i32
    %c1_i32_0 = arith.constant 1 : i32
    %1 = arith.muli %0, %c1_i32_0 : i32
    %c1_i32_1 = arith.constant 1 : i32
    %2 = arith.minsi %1, %c1_i32_1 : i32
    %c0_i32 = arith.constant 0 : i32
    %c0_i32_2 = arith.constant 0 : i32
    %c0_i32_3 = arith.constant 0 : i32
    return %arg0, %c0_i32, %2, %c0_i32_2 : i32, i32, i32, i32
  }
  func.func @transform_3(%arg0: i32, %arg1: i32) -> (i32, i32) {
    %c0_i32 = arith.constant 0 : i32
    %c0_i32_0 = arith.constant 0 : i32
    %c0_i32_1 = arith.constant 0 : i32
    return %c0_i32, %c0_i32_0 : i32, i32
  }
  func.func @transform_4(%arg0: i32, %arg1: i32) -> (i32, i32) {
    %c0_i32 = arith.constant 0 : i32
    %c0_i32_0 = arith.constant 0 : i32
    %c0_i32_1 = arith.constant 0 : i32
    return %c0_i32, %c0_i32_0 : i32, i32
  }
  func.func @transform_5(%arg0: i32, %arg1: i32) -> i32 {
    %c0_i32 = arith.constant 0 : i32
    %c0_i32_0 = arith.constant 0 : i32
    return %c0_i32 : i32
  }
  func.func @transform_6(%arg0: i32, %arg1: i32) -> (i32, i32, i32, i32) {
    %c0_i32 = arith.constant 0 : i32
    %c0_i32_0 = arith.constant 0 : i32
    %c0_i32_1 = arith.constant 0 : i32
    return %arg0, %c0_i32, %arg1, %c0_i32_0 : i32, i32, i32, i32
  }
  func.func @transform_7(%arg0: i32, %arg1: i32) -> (i32, i32, i32, i32) {
    %c0_i32 = arith.constant 0 : i32
    %c0_i32_0 = arith.constant 0 : i32
    %c0_i32_1 = arith.constant 0 : i32
    return %arg0, %arg1, %c0_i32, %c0_i32_0 : i32, i32, i32, i32
  }
}

</mosaic_0001>

<bundles_post_ra>
// kernel: _lambda_.3
= control target key start
LH: loop header
LB: loop body
LE: loop exit
PB: predicated region body
PF: predicated region fallthrough
CT: control target
= control target key end

     0   :  { %8 = vsyncpa [#allocation3], 0  ;;  %s734_s0 = inlined_call_operand.vmem [shape: f32[8], index: 0, kind: input, shape index: {}]   ;;  %s735_s1 = inlined_call_operand.vmem [shape: f32[8], index: 1, kind: input, shape index: {}]   ;;  %s736_s2 = inlined_call_operand.vmem [shape: f32[2,8,256], index: 2, kind: input, shape index: {}, may-alias: {2,3}]   ;;  %s737_s3 = inlined_call_operand.vmem [shape: f32[2,8,256], index: 3, kind: output, shape index: {}, may-alias: {2,3}]  }
   0x1   :  { %9 = vsyncpa [#allocation5], 0  ;;  %s618_s12 = smov 0   ;;  %s620_s13 = smov 0  }
   0x2   :  { %s622_s14 = smov 0  }
   0x3 LB: > { %s444_s15 = sadd.s32 4294967295, %s594_s14   ;;  %s27_s16 = sadd.s32 1, %s590_s13  ;;  %s594_s14 = sphi %s622_s14, %s15_s14   ;;  %s590_s13 = sphi %s620_s13, %s749_s13   ;;  %s586_s12 = sphi %s618_s12, %s748_s12  }
   0x4   : > { %p29_p0 = scmp.ge.s32.totalorder %s27_s16, 2  ;;  %p446_p1 = scmp.ge.s32.totalorder %s594_s14, 1 }
   0x5   : > { %p130_p2 = scmp.lt.s32.totalorder %s594_s14, 3  ;;  %p643_p4 = scmp.eq.s32.totalorder %s444_s15, 0 }
   0x6   : > { %s751_s16 = smov (%p29_p0, %s27_s16), 0  ;;  %s143_s21 = sshll.u32 %s734_s0, 4  ;;  %s144_s21 = int_to_ptr.vmem [resolvable:$true] %s143_s21 }
   0x7   : > { %p639_p3 = pnand %p446_p1, %p130_p2  ;;  %s154_s24 = sshll.u32 %s735_s1, 4  ;;  %s155_s24 = int_to_ptr.vmem [resolvable:$true] %s154_s24 }
   0x8   : > { %s742_s18 = scalar_select %p643_p4, 1, 0 }
   0x9   : > { %s741_s17 = scalar_select %p639_p3, 1, 0 }
   0xa   : > { %p497_p5 = pneg %p639_p3  ;;  %s534_s26 = scalar_lea.vmem %s144_s21, 16 }
   0xb   : > { %p535_p7 = scmp.ne.s32.totalorder %s144_s21, %s534_s26  ;;  %p542_p11 = scmp.lt.s32.totalorder %s144_s21, %s144_s21 }
   0xc   : > { %p657_p6 = pnand %p643_p4, %p497_p5  ;;  %p543_p12 = scmp.lt.s32.totalorder %s534_s26, %s534_s26 }
   0xe   : > { %p536_p8 = pneg %p657_p6  ;;  %p544_p13 = por %p543_p12, %p542_p11 }
  0x10   : > { %p537_p9 = pnand %p536_p8, %p535_p7 }
  0x12   : > { %p538_p10 = pneg %p537_p9 }
  0x14   : > { %p545_p0 = pnand %p544_p13, %p538_p10 }
  0x16   : > { %548 = shalt.err (!%p545_p0)
}
  0x17   : > { %s596_s27 = smov [#allocation2]   ;;  %s549_s28 = scalar_lea.vmem %s155_s24, 16 }
  0x18   : > { %500 = dma.vmem_to_smem (!%p657_p6), %s144_s21, 16, %s596_s27, [#allocation3]  }
  0x19   : > { %p550_p1 = scmp.ne.s32.totalorder %s155_s24, %s549_s28  ;;  %p557_p4 = scmp.lt.s32.totalorder %s155_s24, %s155_s24 }
  0x1a   : > { %p558_p3 = scmp.lt.s32.totalorder %s549_s28, %s549_s28 }
  0x1b   : > { %p552_p2 = pnand %p550_p1, %p536_p8 }
  0x1c   : > { %p559_p7 = por %p558_p3, %p557_p4 }
  0x1d   : > { %p553_p5 = pneg %p552_p2 }
  0x1f   : > { %p560_p9 = pnand %p559_p7, %p553_p5 }
  0x21   : > { %563 = shalt.err (!%p560_p9)
}
  0x22   : > { %s597_s29 = smov [#allocation4]   ;;  %p744_p10 = scmp.ne.s32.totalorder %s741_s17, 0 }
  0x23   : > { %503 = dma.vmem_to_smem (!%p657_p6), %s155_s24, 16, %s597_s29, [#allocation5]  }
  0x24   : > { %180 = sbr.rel (%p744_p10) target bundleno = 160 (0xa0), region = 32  ;;  %p745_p11 = scmp.ne.s32.totalorder (!%p744_p10), %s742_s18, 0 }
  0x2b   : > { %577 = dma.done.wait (%p745_p11), [#allocation3], 16  }
  0x2c   : > { %579 = vsyncadd (%p745_p11), [#allocation3], 4294967280 }
  0x2d   : > { %581 = dma.done.wait (%p745_p11), [#allocation5], 16  }
  0x2e   : > { %583 = vsyncadd (%p745_p11), [#allocation5], 4294967280 }
  0x2f   : > { %190 = sfence }
  0x30   : > { %p218_p3 = scmp.lt.s32.totalorder %s586_s12, 1  ;;  %s238_s30 = sld [smem:[#allocation2]]  ;;  %v245_v2 = vlaneseq }
  0x31   : > { %s241_s4 = sld [smem:[#allocation4]]  ;;  %s459_s15 = sld [smem:[#allocation4 + $0x1]] }
  0x32   : > { %s753_s12 = smov (!%p218_p3, %s586_s12), 1  ;;  %vm690_vm0 = vcmp.lt.s32.totalorder %v245_v2, 256  ;;  %s462_s17 = sld [smem:[#allocation2 + $0x2]] }
  0x33   : > { %s487_s5 = sshll.u32 %s753_s12, 4  ;;  %s458_s12 = sld [smem:[#allocation2 + $0x1]] }
  0x34   : > { %s682_s8 = scalar_lea.vmem %s736_s2, %s487_s5  ;;  %s688_s11 = scalar_lea.vmem %s737_s3, %s487_s5 }
  0x35   : > { %v237_v0 = vld [vmem:[%s682_s8] ss:$8 sm:$0x3]  ;;  %s463_s18 = sld [smem:[#allocation4 + $0x2]]  ;;  %s466_s19 = sld [smem:[#allocation2 + $0x3]] }
  0x36   : > { %v239_v1 = vstv %s238_s30  ;;  %s467_s20 = sld [smem:[#allocation4 + $0x3]]  ;;  %s470_s21 = sld [smem:[#allocation2 + $0x4]] }
  0x37   : > { %v240_v3 = vmul.f32 %v239_v1, %v237_v0  ;;  %v242_v4 = vstv %s241_s4  ;;  %v257_v10 = vstv %s459_s15  ;;  %s471_s22 = sld [smem:[#allocation4 + $0x4]]  ;;  %s474_s23 = sld [smem:[#allocation2 + $0x5]] }
  0x38   : > { %v266_v14 = vstv %s462_s17  ;;  %s475_s24 = sld [smem:[#allocation4 + $0x5]]  ;;  %s478_s25 = sld [smem:[#allocation2 + $0x6]] }
  0x39   : > { %v243_v5 = vadd.f32 %v242_v4, %v240_v3  ;;  %v254_v8 = vstv %s458_s12  ;;  %s479_s26 = sld [smem:[#allocation4 + $0x6]]  ;;  %s482_s27 = sld [smem:[#allocation2 + $0x7]] }
  0x3a   : > { %s483_s28 = sld [smem:[#allocation4 + $0x7]] }
  0x3b   : > { %v244_v7 = vmax.f32 %v243_v5, 0.0  ;;  %v269_v16 = vstv %s463_s18  ;;  %v278_v20 = vstv %s466_s19 }
  0x3c   : > { %v281_v22 = vstv %s467_s20  ;;  %v290_v26 = vstv %s470_s21 }
  0x3d   : > { %249 = vst.msk [vmem:[%s688_s11] ss:$8 sm:$0x3] %vm690_vm0, %v244_v7  ;;  %v293_v28 = vstv %s471_s22  ;;  %v302_v32 = vstv %s474_s23 }
  0x3e   : > { %v305_v34 = vstv %s475_s24  ;;  %v314_v38 = vstv %s478_s25 }
  0x3f   : > { %v317_v40 = vstv %s479_s26  ;;  %v326_v44 = vstv %s482_s27 }
  0x40   : > { %v329_v46 = vstv %s483_s28 }
  0x44   : > { %v457_v9 = vld [vmem:[%s682_s8 + $0x1] ss:$8 sm:$0x3] }
  0x45   : > { %v255_v11 = vmul.f32 %v457_v9, %v254_v8 }
  0x47   : > { %v258_v12 = vadd.f32 %v257_v10, %v255_v11 }
  0x49   : > { %v259_v13 = vmax.f32 %v258_v12, 0.0 }
  0x4b   : > { %460 = vst.msk [vmem:[%s688_s11 + $0x1] ss:$8 sm:$0x3] %vm690_vm0, %v259_v13 }
  0x52   : > { %v461_v15 = vld [vmem:[%s682_s8 + $0x2] ss:$8 sm:$0x3] }
  0x53   : > { %v267_v17 = vmul.f32 %v461_v15, %v266_v14 }
  0x55   : > { %v270_v18 = vadd.f32 %v269_v16, %v267_v17 }
  0x57   : > { %v271_v19 = vmax.f32 %v270_v18, 0.0 }
  0x59   : > { %464 = vst.msk [vmem:[%s688_s11 + $0x2] ss:$8 sm:$0x3] %vm690_vm0, %v271_v19 }
  0x60   : > { %v465_v21 = vld [vmem:[%s682_s8 + $0x3] ss:$8 sm:$0x3] }
  0x61   : > { %v279_v23 = vmul.f32 %v465_v21, %v278_v20 }
  0x63   : > { %v282_v24 = vadd.f32 %v281_v22, %v279_v23 }
  0x65   : > { %v283_v25 = vmax.f32 %v282_v24, 0.0 }
  0x67   : > { %468 = vst.msk [vmem:[%s688_s11 + $0x3] ss:$8 sm:$0x3] %vm690_vm0, %v283_v25 }
  0x6e   : > { %v469_v27 = vld [vmem:[%s682_s8 + $0x4] ss:$8 sm:$0x3] }
  0x6f   : > { %v291_v29 = vmul.f32 %v469_v27, %v290_v26 }
  0x71   : > { %v294_v30 = vadd.f32 %v293_v28, %v291_v29 }
  0x73   : > { %v295_v31 = vmax.f32 %v294_v30, 0.0 }
  0x75   : > { %472 = vst.msk [vmem:[%s688_s11 + $0x4] ss:$8 sm:$0x3] %vm690_vm0, %v295_v31 }
  0x7c   : > { %v473_v33 = vld [vmem:[%s682_s8 + $0x5] ss:$8 sm:$0x3] }
  0x7d   : > { %v303_v35 = vmul.f32 %v473_v33, %v302_v32 }
  0x7f   : > { %v306_v36 = vadd.f32 %v305_v34, %v303_v35 }
  0x81   : > { %v307_v37 = vmax.f32 %v306_v36, 0.0 }
  0x83   : > { %476 = vst.msk [vmem:[%s688_s11 + $0x5] ss:$8 sm:$0x3] %vm690_vm0, %v307_v37 }
  0x8a   : > { %v477_v39 = vld [vmem:[%s682_s8 + $0x6] ss:$8 sm:$0x3] }
  0x8b   : > { %v315_v41 = vmul.f32 %v477_v39, %v314_v38 }
  0x8d   : > { %v318_v42 = vadd.f32 %v317_v40, %v315_v41 }
  0x8f   : > { %v319_v43 = vmax.f32 %v318_v42, 0.0 }
  0x91   : > { %480 = vst.msk [vmem:[%s688_s11 + $0x6] ss:$8 sm:$0x3] %vm690_vm0, %v319_v43 }
  0x98   : > { %v481_v45 = vld [vmem:[%s682_s8 + $0x7] ss:$8 sm:$0x3] }
  0x99   : > { %v327_v47 = vmul.f32 %v481_v45, %v326_v44 }
  0x9b   : > { %v330_v48 = vadd.f32 %v329_v46, %v327_v47 }
  0x9d   : > { %v331_v49 = vmax.f32 %v330_v48, 0.0 }
  0x9f   : > { %484 = vst.msk [vmem:[%s688_s11 + $0x7] ss:$8 sm:$0x3] %vm690_vm0, %v331_v49 }
  0xa0 PF: > { %s15_s14 = sadd.s32 1, %s594_s14   ;;  %s748_s12 = smov %s590_s13 }
  0xa1   : > { %p12_p4 = scmp.ge.s32.totalorder %s15_s14, 4   ;;  %s749_s13 = smov %s751_s16 }
  0xa3   :  { %14 = sbr.rel (!%p12_p4) target bundleno = 3 (0x3), region = 85 }
  0xaa   :  { %365 = vsyncpa [#allocation3], 1 }
  0xab   :  { %367 = vsyncpa [#allocation3 + $0x1], 1 }
  0xac   :  { %368 = vsyncpa [#allocation5], 1 }

// kernel: _lambda_.2
= control target key start
LH: loop header
LB: loop body
LE: loop exit
PB: predicated region body
PF: predicated region fallthrough
CT: control target
= control target key end

     0   :  { %s3816_s0 = inlined_call_operand.hbm [shape: f32[2,4,16,16], index: 0, kind: input, shape index: {}, may-alias: {0,1,2}]   ;;  %s3817_s1 = inlined_call_operand.hbm [shape: f32[2,4,16,16], index: 1, kind: input, shape index: {}, may-alias: {0,1,2}]   ;;  %s3818_s2 = inlined_call_operand.hbm [shape: f32[2,4,16,16], index: 2, kind: input, shape index: {}, may-alias: {0,1,2}]   ;;  %s3819_s3 = inlined_call_operand.vmem [shape: f32[8,9], index: 3, kind: input, shape index: {}]   ;;  %s3820_s4 = inlined_call_operand.vmem [shape: f32[8,8], index: 4, kind: input, shape index: {}]   ;;  %s3821_s5 = inlined_call_operand.vmem [shape: f32[8], index: 5, kind: input, shape index: {}]   ;;  %s3822_s6 = inlined_call_operand.vmem [shape: f32[2,8,16,16], index: 6, kind: output, shape index: {0}]   ;;  %s3823_s7 = inlined_call_operand.vmem [shape: f32[2,2,16,16], index: 7, kind: output, shape index: {1}]  }
   0x1   :  { %3949 = sst [smem:[#allocation125_spill]] %s3816_s0 }
   0x2   :  { %3950 = sst [smem:[#allocation126_spill]] %s3817_s1 }
   0x3   :  { %3951 = sst [smem:[#allocation127_spill]] %s3818_s2 }
   0x4   :  { %3952 = sst [smem:[#allocation128_spill]] %s3819_s3 }
   0x5   :  { %3953 = sst [smem:[#allocation129_spill]] %s3820_s4 }
   0x6   :  { %3954 = sst [smem:[#allocation130_spill]] %s3821_s5 }
   0x7   :  { %3955 = sst [smem:[#allocation131_spill]] %s3822_s6 }
   0x8   :  { %3956 = sst [smem:[#allocation132_spill]] %s3823_s7 }
   0x9   :  { %13 = vsyncpa [#allocation3], 0 }
   0xa   :  { %15 = vsyncpa [#allocation3 + $0x1], 0 }
   0xb   :  { %16 = vsyncpa [#allocation6], 0 }
   0xc   :  { %18 = vsyncpa [#allocation6 + $0x1], 0 }
   0xd   :  { %19 = vsyncpa [#allocation4], 0 }
   0xe   :  { %20 = vsyncpa [#allocation10], 0  ;;  %s2325_s24 = smov 0   ;;  %s2327_s25 = smov 0  }
   0xf   :  { %s2329_s26 = smov 0   ;;  %s2331_s27 = smov 0  }
  0x10   :  { %s2333_s28 = smov 0   ;;  %s2335_s29 = smov 0  }
  0x11   :  { %s2337_s30 = smov 0   ;;  %s2339_s8 = smov 0  }
  0x12   :  { %s2341_s9 = smov 0   ;;  %s2343_s10 = smov 0  }
  0x13   :  { %s2345_s11 = smov 0   ;;  %s2347_s12 = smov 0  }
  0x14   :  { %s2349_s13 = smov 0   ;;  %s2351_s14 = smov 0  }
  0x15 LB: > { %3957 = sst [smem:[#allocation18_spill]] %s2224_s25  ;;  %s2394_s15 = sadd.s32 4294967295, %s2272_s14   ;;  %s2272_s14 = sphi %s2351_s14, %s26_s14   ;;  %s2268_s13 = sphi %s2349_s13, %s4353_s13   ;;  %s2264_s12 = sphi %s2347_s12, %s4352_s12   ;;  %s2260_s11 = sphi %s2345_s11, %s4351_s11   ;;  %s2256_s10 = sphi %s2343_s10, %s4350_s10   ;;  %s2252_s9 = sphi %s2341_s9, %s4349_s9   ;;  %s2248_s8 = sphi %s2339_s8, %s4348_s8   ;;  %s2244_s30 = sphi %s2337_s30, %s4347_s30   ;;  %s2240_s29 = sphi %s2335_s29, %s4346_s29   ;;  %s2236_s28 = sphi %s2333_s28, %s4345_s28   ;;  %s2232_s27 = sphi %s2331_s27, %s4344_s27   ;;  %s2228_s26 = sphi %s2329_s26, %s4343_s26   ;;  %s2224_s25 = sphi %s2327_s25, %s4342_s25   ;;  %s2220_s24 = sphi %s2325_s24, %s4341_s24  }
  0x16   : > { %3958 = sst [smem:[#allocation19_spill]] %s2228_s26  ;;  %p128_p0 = scmp.ne.s32.totalorder %s2224_s25, %s2220_s24 }
  0x17   : > { %3959 = sst [smem:[#allocation20_spill]] %s2236_s28  ;;  %p3834_p1 = scmp.eq.s32.totalorder %s2394_s15, 0 }
  0x18   : > { %3960 = sst [smem:[#allocation21_spill]] %s2240_s29  ;;  %p1650_p3 = scmp.ge.s32.totalorder %s2272_s14, 1 }
  0x19   : > { %3961 = sst [smem:[#allocation22_spill]] %s2248_s8  ;;  %p258_p4 = scmp.lt.s32.totalorder %s2272_s14, 5 }
  0x1a   : > { %3962 = sst [smem:[#allocation23_spill]] %s2252_s9  ;;  %p2403_p5 = por %p128_p0, %p3834_p1 }
  0x1b   : > { %3963 = sst [smem:[#allocation24_spill]] %s2256_s10  ;;  %p2407_p6 = pnand %p1650_p3, %p258_p4 }
  0x1c   : > { %3964 = sst [smem:[#allocation25_spill]] %s2260_s11  ;;  %s3972_s4 = sld [smem:[#allocation129_spill]] }
  0x1d   : > { %3965 = sst [smem:[#allocation26_spill]] %s2264_s12  ;;  %p1856_p7 = pneg %p2407_p6 }
  0x1e   : > { %3966 = sst [smem:[#allocation27_spill]] %s2268_s13 }
  0x1f   : > { %3967 = sst [smem:[#allocation28_spill]] %s2272_s14  ;;  %p2418_p8 = pnand %p1856_p7, %p3834_p1 }
  0x20   : > { %s3968_s16 = scalar_select %p2403_p5, 1, 0 }
  0x21   : > { %s3970_s17 = scalar_select %p2407_p6, 1, 0 }
  0x22   : > { %3969 = sst [smem:[#allocation29_spill]] %s3968_s16  ;;  %s282_s20 = sshll.u32 %s3972_s4, 4  ;;  %s283_s20 = int_to_ptr.vmem [resolvable:$true] %s282_s20 }
  0x23   : > { %3971 = sst [smem:[#allocation30_spill]] %s3970_s17  ;;  %s2003_s22 = scalar_lea.vmem %s283_s20, 128 }
  0x24   : > { %p2004_p9 = scmp.ne.s32.totalorder %s283_s20, %s2003_s22  ;;  %p3838_p10 = pneg %p2418_p8 }
  0x25   : > { %p2011_p13 = scmp.lt.s32.totalorder %s283_s20, %s283_s20  ;;  %p2012_p0 = scmp.lt.s32.totalorder %s2003_s22, %s2003_s22 }
  0x26   : > { %p2006_p11 = pnand %p3838_p10, %p2004_p9 }
  0x27   : > { %p2013_p3 = por %p2012_p0, %p2011_p13 }
  0x28   : > { %p2007_p12 = pneg %p2006_p11 }
  0x2a   : > { %p2014_p4 = pnand %p2013_p3, %p2007_p12 }
  0x2c   : > { %2017 = shalt.err (!%p2014_p4)
}
  0x2d   : > { %s2274_s23 = smov [#allocation9]   ;;  %s35_s24 = sadd.s32 1, %s2264_s12 }
  0x2e   : > { %1862 = dma.vmem_to_smem (!%p2418_p8), %s283_s20, 128, %s2274_s23, [#allocation10]  }
  0x2f   : > { %s38_s18 = sadd.s32 1, %s2268_s13  ;;  %p36_p7 = scmp.ge.s32.totalorder %s35_s24, 2 }
  0x30   : > { %p3837_p9 = scmp.eq.s32.totalorder %s2272_s14, 0  ;;  %s81_s19 = sadd.s32 1, %s2240_s29 }
  0x31   : > { %s4355_s24 = smov (%p36_p7, %s35_s24), 0  ;;  %s4357_s18 = smov (!%p36_p7, %s38_s18), %s2268_s13 }
  0x32   : > { %3974 = sst [smem:[#allocation31_spill]] %s4355_s24  ;;  %s43_s22 = ssub.s32 %s2264_s12, %s4355_s24 }
  0x33   : > { %p40_p11 = scmp.ge.s32.totalorder %s4357_s18, 2  ;;  %p88_p12 = scmp.ne.s32.totalorder %s2240_s29, %s2236_s28 }
  0x34   : > { %p94_p13 = scmp.ne.s32.totalorder %s2236_s28, %s2232_s27  ;;  %p3836_p7 = scmp.lt.s32.totalorder %s2272_s14, 4 }
  0x35   : > { %s4359_s18 = smov (%p40_p11, %s4357_s18), 0  ;;  %p2453_p0 = por %p88_p12, %p3837_p9 }
  0x36   : > { %3975 = sst [smem:[#allocation32_spill]] %s4359_s18  ;;  %s2444_s20 = ssub.s32 %s2268_s13, %s4359_s18 }
  0x37   : > { %s2449_s23 = sor.u32 %s43_s22, %s2444_s20  ;;  %p2460_p4 = por %p94_p13, %p3834_p1 }
  0x38   : > { %p3833_p11 = scmp.eq.s32.totalorder %s2444_s20, 0  ;;  %s326_s27 = sand.u32 1, %s2272_s14  }
  0x39   : > { %s3977_s18 = scalar_select %p2460_p4, 1, 0 }
  0x3a   : > { %s328_s22 = sand.u32 1, %s2240_s29   ;;  %s3835_s11 = sshll.u32 %s2268_s13, 10 }
  0x3b   : > { %s2472_s6 = scalar_select %p3833_p11, %s2240_s29, %s81_s19  }
  0x3c   : > { %s1658_s7 = sshll.u32 %s328_s22, 5  ;;  %s3979_s1 = sld [smem:[#allocation126_spill]] }
  0x3d   : > { %3978 = sst [smem:[#allocation33_spill]] %s2472_s6  ;;  %s330_s10 = scalar_lea.vmem [#allocation5], %s1658_s7 }
  0x3e   : > { %s341_s16 = sshll.u32 %s330_s10, 4  ;;  %p2488_p12 = pnand %p3836_p7, %p2453_p0  ;;  %s2482_s16 = int_to_ptr.vmem [resolvable:$true] %s341_s16 }
  0x3f   : > { %s2492_s7 = scalar_lea.sflag [#allocation6], %s326_s27 }
  0x40   : > { %p2020_p11 = pneg %p2488_p12 }
  0x42   : > { %s2480_s2 = scalar_lea.hbm %s3979_s1, %s3835_s11  ;;  %s2023_s4 = scalar_lea.hbm %s3979_s1, 2048 }
  0x43   : > { %s2018_s10 = scalar_lea.hbm %s2480_s2, 512  ;;  %p2024_p0 = scmp.lt.u32.totalorder %s2480_s2, %s3979_s1 }
  0x44   : > { %p2019_p13 = scmp.ne.s32.totalorder %s2480_s2, %s2018_s10  ;;  %p2025_p7 = scmp.lt.u32.totalorder %s2023_s4, %s2018_s10 }
  0x45   : > { %p2027_p3 = scmp.lt.u32.totalorder %s2018_s10, %s2480_s2 }
  0x46   : > { %p2021_p1 = pnand %p2020_p11, %p2019_p13  ;;  %p2026_p9 = por %p2025_p7, %p2024_p0 }
  0x48   : > { %p2022_p2 = pneg %p2021_p1  ;;  %p2028_p10 = por %p2027_p3, %p2026_p9 }
  0x4a   : > { %p2029_p5 = pnand %p2028_p10, %p2022_p2 }
  0x4c   : > { %2032 = shalt.err (!%p2029_p5)
}
  0x4d   : > { %s2033_s27 = scalar_lea.vmem %s2482_s16, 512  ;;  %s2275_s28 = smov [#allocation5]  }
  0x4e   : > { %p2034_p1 = scmp.ne.s32.totalorder %s2482_s16, %s2033_s27  ;;  %s2038_s17 = sshll.u32 %s2275_s28, 4  ;;  %s2039_s17 = int_to_ptr.vmem [resolvable:$false] %s2038_s17 }
  0x4f   : > { %s2040_s11 = scalar_lea.vmem %s2039_s17, 1024  ;;  %p2041_p6 = scmp.lt.s32.totalorder %s2482_s16, %s2039_s17 }
  0x50   : > { %p2036_p13 = pnand %p2034_p1, %p2020_p11  ;;  %p2042_p7 = scmp.lt.s32.totalorder %s2040_s11, %s2033_s27 }
  0x52   : > { %p2037_p4 = pneg %p2036_p13  ;;  %p2043_p0 = por %p2042_p7, %p2041_p6 }
  0x54   : > { %p2044_p9 = pnand %p2043_p0, %p2037_p4 }
  0x56   : > { %2047 = shalt.err (!%p2044_p9)
}
  0x57   : > { %s3842_s10 = smov 256   ;;  %s2277_s4 = smov 128  }
  0x58   : > { %s2278_s22 = smov 8   ;;  %s3981_s3 = sld [smem:[#allocation128_spill]] }
  0x59   : > { %1872 = dma.hbm_to_vmem [thread:$0]  (!%p2488_p12), %s2480_s2, 512, %s2482_s16, %s2492_s7, %s3842_s10, %s2277_s4, %s2278_s22  }
  0x5a   : > { %s3982_s5 = sld [smem:[#allocation130_spill]]  ;;  %p3983_p5 = pneg %p2418_p8 }
  0x5e   : > { %s271_s27 = sshll.u32 %s3981_s3, 4  ;;  %s272_s27 = int_to_ptr.vmem [resolvable:$true] %s271_s27 }
  0x5f   : > { %s2048_s6 = scalar_lea.vmem %s272_s27, 128  ;;  %p2056_p3 = scmp.lt.s32.totalorder %s272_s27, %s272_s27 }
  0x60   : > { %s293_s1 = sshll.u32 %s3982_s5, 4  ;;  %p2049_p2 = scmp.ne.s32.totalorder %s272_s27, %s2048_s6  ;;  %s294_s1 = int_to_ptr.vmem [resolvable:$true] %s293_s1 }
  0x61   : > { %p2057_p4 = scmp.lt.s32.totalorder %s2048_s6, %s2048_s6 }
  0x62   : > { %p2051_p6 = pnand %p2049_p2, %p3983_p5 }
  0x63   : > { %p2058_p11 = por %p2057_p4, %p2056_p3 }
  0x64   : > { %p2052_p10 = pneg %p2051_p6 }
  0x66   : > { %p2059_p1 = pnand %p2058_p11, %p2052_p10 }
  0x68   : > { %2062 = shalt.err (!%p2059_p1)
}
  0x69   : > { %s2279_s2 = smov [#allocation8]   ;;  %s2063_s16 = scalar_lea.vmem %s294_s1, 16 }
  0x6a   : > { %1859 = dma.vmem_to_smem (!%p2418_p8), %s272_s27, 128, %s2279_s2, [#allocation4]  }
  0x6b   : > { %p2064_p12 = scmp.ne.s32.totalorder %s294_s1, %s2063_s16  ;;  %p3984_p13 = pmov %p3983_p5 }
  0x6c   : > { %p2071_p9 = scmp.lt.s32.totalorder %s294_s1, %s294_s1  ;;  %p2072_p2 = scmp.lt.s32.totalorder %s2063_s16, %s2063_s16 }
  0x6d   : > { %p2066_p7 = pnand %p2064_p12, %p3984_p13 }
  0x6e   : > { %p2073_p5 = por %p2072_p2, %p2071_p9 }
  0x6f   : > { %p2067_p0 = pneg %p2066_p7 }
  0x71   : > { %p2074_p6 = pnand %p2073_p5, %p2067_p0 }
  0x73   : > { %2077 = shalt.err (!%p2074_p6)
}
  0x74   : > { %s2280_s6 = smov [#allocation11]   ;;  %s47_s24 = sadd.s32 1, %s2252_s9 }
  0x75   : > { %1865 = dma.vmem_to_smem (!%p2418_p8), %s294_s1, 16, %s2280_s6, [#allocation10]  }
  0x76   : > { %p54_p10 = scmp.ne.s32.totalorder %s2252_s9, %s2248_s8  ;;  %p3985_p3 = scmp.eq.s32.totalorder %s2449_s23, 0 }
  0x77   : > { %p3987_p4 = scmp.eq.s32.totalorder %s2272_s14, 0  ;;  %p60_p1 = scmp.ne.s32.totalorder %s2248_s8, %s2244_s30 }
  0x78   : > { %s2545_s19 = scalar_select %p3985_p3, %s2252_s9, %s47_s24  }
  0x79   : > { %p56_p11 = por %p3987_p4, %p54_p10  ;;  %p3988_p12 = scmp.eq.s32.totalorder %s2394_s15, 3 }
  0x7a   : > { %3986 = sst [smem:[#allocation34_spill]] %s2545_s19  ;;  %s304_s28 = sand.u32 1, %s2252_s9  }
  0x7b   : > { %p2553_p13 = por %p3988_p12, %p54_p10  ;;  %p3991_p7 = scmp.eq.s32.totalorder %s2394_s15, 0 }
  0x7c   : > { %s1655_s1 = sshll.u32 %s304_s28, 5  ;;  %s3993_s17 = sshll.u32 %s2268_s13, 3 }
  0x7d   : > { %s3989_s21 = scalar_select %p2553_p13, 1, 0 }
  0x7e   : > { %p2560_p0 = por %p3991_p7, %p60_p1  ;;  %s313_s11 = sadd.s32 %s2264_s12, %s3993_s17 }
  0x7f   : > { %3990 = sst [smem:[#allocation35_spill]] %s3989_s21  ;;  %s1657_s23 = sshll.u32 %s313_s11, 7 }
  0x80   : > { %s3994_s0 = sld [smem:[#allocation125_spill]]  ;;  %s308_s30 = scalar_lea.vmem [#allocation2], %s1655_s1 }
  0x81   : > { %s316_s24 = sshll.u32 %s308_s30, 4  ;;  %p3995_p8 = scmp.lt.s32.totalorder %s2272_s14, 4  ;;  %s2572_s24 = int_to_ptr.vmem [resolvable:$true] %s316_s24 }
  0x82   : > { %s2580_s17 = scalar_lea.sflag [#allocation3], %s304_s28 }
  0x83   : > { %p2576_p9 = pnand %p3995_p8, %p56_p11 }
  0x85   : > { %p2080_p5 = pneg %p2576_p9 }
  0x86   : > { %s2570_s6 = scalar_lea.hbm %s3994_s0, %s1657_s23  ;;  %s2083_s2 = scalar_lea.hbm %s3994_s0, 2048 }
  0x87   : > { %s2078_s11 = scalar_lea.hbm %s2570_s6, 512  ;;  %p2084_p3 = scmp.lt.u32.totalorder %s2570_s6, %s3994_s0 }
  0x88   : > { %p2079_p2 = scmp.ne.s32.totalorder %s2570_s6, %s2078_s11  ;;  %p2085_p4 = scmp.lt.u32.totalorder %s2083_s2, %s2078_s11 }
  0x89   : > { %p2087_p1 = scmp.lt.u32.totalorder %s2078_s11, %s2570_s6 }
  0x8a   : > { %p2081_p6 = pnand %p2080_p5, %p2079_p2  ;;  %p2086_p11 = por %p2085_p4, %p2084_p3 }
  0x8c   : > { %p2082_p10 = pneg %p2081_p6  ;;  %p2088_p12 = por %p2087_p1, %p2086_p11 }
  0x8e   : > { %p2089_p7 = pnand %p2088_p12, %p2082_p10 }
  0x90   : > { %2092 = shalt.err (!%p2089_p7)
}
  0x91   : > { %s2093_s28 = scalar_lea.vmem %s2572_s24, 512  ;;  %s2281_s1 = smov [#allocation2]  }
  0x92   : > { %p2094_p8 = scmp.ne.s32.totalorder %s2572_s24, %s2093_s28  ;;  %s2098_s23 = sshll.u32 %s2281_s1, 4  ;;  %s2099_s23 = int_to_ptr.vmem [resolvable:$false] %s2098_s23 }
  0x93   : > { %s2100_s16 = scalar_lea.vmem %s2099_s23, 1024  ;;  %p2101_p13 = scmp.lt.s32.totalorder %s2572_s24, %s2099_s23 }
  0x94   : > { %p2096_p2 = pnand %p2094_p8, %p2080_p5  ;;  %p2102_p3 = scmp.lt.s32.totalorder %s2100_s16, %s2093_s28 }
  0x96   : > { %p2097_p6 = pneg %p2096_p2  ;;  %p2103_p4 = por %p2102_p3, %p2101_p13 }
  0x98   : > { %p2104_p11 = pnand %p2103_p4, %p2097_p6 }
  0x9a   : > { %2107 = shalt.err (!%p2104_p11)
}
  0x9b   : > { %s3997_s11 = smov 256   ;;  %s115_s2 = sadd.s32 1, %s2228_s26 }
  0x9c   : > { %1869 = dma.hbm_to_vmem [thread:$0]  (!%p2576_p9), %s2570_s6, 512, %s2572_s24, %s2580_s17, %s3997_s11, %s2277_s4, %s2278_s22  }
  0x9d   : > { %p122_p13 = scmp.ne.s32.totalorder %s2228_s26, %s2224_s25  ;;  %s353_s30 = sand.u32 1, %s2228_s26  }
  0x9e   : > { %p3998_p5 = scmp.eq.s32.totalorder %s2272_s14, 0  ;;  %s1662_s10 = sshll.u32 %s353_s30, 5 }
  0x9f   : > { %s3999_s28 = sshll.u32 %s2268_s13, 10  ;;  %s4000_s0 = sld [smem:[#allocation127_spill]] }
  0xa0   : > { %p124_p10 = por %p122_p13, %p3998_p5  ;;  %s2216_s1 = sadd.s32 128, %s3999_s28 }
  0xa1   : > { %s355_s5 = scalar_lea.vmem [#allocation7], %s1662_s10  ;;  %p4001_p9 = scmp.lt.s32.totalorder %s2272_s14, 4 }
  0xa2   : > { %s366_s12 = sshll.u32 %s355_s5, 4  ;;  %p4003_p12 = scmp.eq.s32.totalorder %s2444_s20, 0  ;;  %s2635_s12 = int_to_ptr.vmem [resolvable:$true] %s366_s12 }
  0xa3   : > { %p2626_p1 = pnand %p4001_p9, %p124_p10 }
  0xa4   : > { %s2633_s24 = scalar_select %p4003_p12, %s2228_s26, %s115_s2  }
  0xa5   : > { %s2622_s3 = scalar_lea.hbm %s4000_s0, %s2216_s1  ;;  %p2110_p8 = pneg %p2626_p1 }
  0xa6   : > { %4004 = sst [smem:[#allocation36_spill]] %s2633_s24  ;;  %s2108_s17 = scalar_lea.hbm %s2622_s3, 512 }
  0xa7   : > { %p2109_p7 = scmp.ne.s32.totalorder %s2622_s3, %s2108_s17  ;;  %s2113_s10 = scalar_lea.hbm %s4000_s0, 2048 }
  0xa8   : > { %p2114_p3 = scmp.lt.u32.totalorder %s2622_s3, %s4000_s0  ;;  %p2115_p4 = scmp.lt.u32.totalorder %s2113_s10, %s2108_s17 }
  0xa9   : > { %p2111_p2 = pnand %p2110_p8, %p2109_p7  ;;  %p2117_p13 = scmp.lt.u32.totalorder %s2108_s17, %s2622_s3 }
  0xaa   : > { %p2116_p11 = por %p2115_p4, %p2114_p3 }
  0xab   : > { %p2112_p6 = pneg %p2111_p2 }
  0xac   : > { %p2118_p5 = por %p2117_p13, %p2116_p11 }
  0xae   : > { %p2119_p10 = pnand %p2118_p5, %p2112_p6 }
  0xb0   : > { %2122 = shalt.err (!%p2119_p10)
}
  0xb1   : > { %s2123_s2 = scalar_lea.vmem %s2635_s12, 512  ;;  %s2282_s1 = smov [#allocation7]  }
  0xb2   : > { %p2124_p9 = scmp.ne.s32.totalorder %s2635_s12, %s2123_s2  ;;  %s2128_s23 = sshll.u32 %s2282_s1, 4  ;;  %s2129_s23 = int_to_ptr.vmem [resolvable:$false] %s2128_s23 }
  0xb3   : > { %s2130_s16 = scalar_lea.vmem %s2129_s23, 1024  ;;  %p2131_p2 = scmp.lt.s32.totalorder %s2635_s12, %s2129_s23 }
  0xb4   : > { %p2126_p12 = pnand %p2124_p9, %p2110_p8  ;;  %p2132_p3 = scmp.lt.s32.totalorder %s2130_s16, %s2123_s2 }
  0xb6   : > { %p2127_p7 = pneg %p2126_p12  ;;  %p2133_p4 = por %p2132_p3, %p2131_p2 }
  0xb8   : > { %p2134_p11 = pnand %p2133_p4, %p2127_p7 }
  0xba   : > { %2137 = shalt.err (!%p2134_p11)
}
  0xbb   : > { %1875 = dma.hbm_to_vmem [thread:$0]  (!%p2626_p1), %s2622_s3, 512, %s2635_s12, %s2492_s7, %s3997_s11, %s2277_s4, %s2278_s22  }
  0xbc   : > { %s4005_s17 = sld [smem:[#allocation30_spill]] }
  0xc2   : > { %p4006_p8 = scmp.ne.s32.totalorder %s4005_s17, 0 }
  0xc4   : > { %378 = sbr.rel (%p4006_p8) target bundleno = 496 (0x1f0), region = 44 }
  0xcb   : > { %s2669_s5 = sand.u32 1, %s2248_s8  }
  0xcc   : > { %4007 = sst [smem:[#allocation37_spill]] %s2669_s5  ;;  %s1666_s30 = sshll.u32 %s2669_s5, 5 }
  0xcd   : > { %s381_s10 = scalar_lea.sflag [#allocation3], %s2669_s5  ;;  %s2673_s28 = scalar_lea.vmem [#allocation2], %s1666_s30 }
  0xce   : > { %2195 = dma.done.wait (%p2560_p0), %s381_s10, 512  }
  0xcf   : > { %2197 = vsyncadd (%p2560_p0), %s381_s10, 4294966784  ;;  %s4008_s3 = sld [smem:[#allocation20_spill]]  ;;  %s389_s12 = sand.u32 1, %s2394_s15  }
  0xd0   : > { %s390_s22 = scalar_lea.sflag [#allocation6], %s389_s12  ;;  %p4009_p1 = scmp.ne.s32.totalorder %s3977_s18, 0 }
  0xd5   : > { %s391_s7 = sand.u32 1, %s4008_s3  }
  0xd6   : > { %s1667_s4 = sshll.u32 %s391_s7, 5 }
  0xd7   : > { %s2681_s11 = scalar_lea.vmem [#allocation5], %s1667_s4 }
  0xd8   : > { %2199 = dma.done.wait (%p4009_p1), %s390_s22, 512  }
  0xd9   : > { %2201 = vsyncadd (%p4009_p1), %s390_s22, 4294966784  ;;  %s4010_s6 = sld [smem:[#allocation29_spill]]  ;;  %s400_s20 = sand.u32 1, %s2224_s25  }
  0xda   : > { %s1668_s2 = sshll.u32 %s400_s20, 5 }
  0xdb   : > { %s2688_s27 = scalar_lea.vmem [#allocation7], %s1668_s2 }
  0xdf   : > { %p4011_p0 = scmp.ne.s32.totalorder %s4010_s6, 0 }
  0xe1   : > { %2203 = dma.done.wait (%p4011_p0), %s390_s22, 512  }
  0xe2   : > { %2205 = vsyncadd (%p4011_p0), %s390_s22, 4294966784  ;;  %p4012_p6 = scmp.eq.s32.totalorder %s2394_s15, 0 }
  0xe4   : > { %2207 = dma.done.wait (%p4012_p6), [#allocation4], 128   ;;  %p4013_p13 = pmov %p4012_p6 }
  0xe5   : > { %p4014_p5 = pmov %p4012_p6 }
  0xe6   : > { %2209 = vsyncadd (%p4013_p13), [#allocation4], 4294967168 }
  0xe7   : > { %2211 = dma.done.wait (%p4014_p5), [#allocation10], 144   ;;  %p4015_p10 = pmov %p4014_p5 }
  0xe9   : > { %2213 = vsyncadd (%p4015_p10), [#allocation10], 4294967152 }
  0xea   : > { %419 = sfence }
  0xeb   : > { %s4016_s18 = sld [smem:[#allocation24_spill]]  ;;  %v2703_v0 = vld [vmem:[%s2673_s28] sm:$0xff]  ;;  %s2283_s1 = smov 1   ;;  %v2709_v1 = vld [vmem:[%s2673_s28 + $0x8] sm:$0xff]  ;;  %v2715_v4 = vld [vmem:[%s2673_s28 + $0x10] sm:$0xff]  ;;  %vm493_vm0 = vcmask 1040384  }
  0xec   : > { %513 = vrot.lane.b32.xlu1 %v2703_v0, %s2283_s1  ;;  %v484_v2 = vld [vmem:[%s2681_s11 + $0x7] sm:$0x1]  ;;  %v1677_v3 = vld [vmem:[%s2681_s11 + $0xf] sm:$0x1]  ;;  %v1680_v5 = vld [vmem:[%s2681_s11 + $0x17] sm:$0x1] }
  0xed   : > { %v491_v6 = vrot.slane %v2703_v0, 7  ;;  %v539_v7 = vrot.slane %v2709_v1, 7  ;;  %s2284_s23 = smov 127   ;;  %v583_v12 = vrot.slane %v2715_v4, 7  ;;  %v487_v16 = vld [vmem:[%s2688_s27] sm:$0x1] }
  0xee   : > { %v495_v19 = vrot.slane %v2703_v0, 1  ;;  %vm500_vm1 = vcmask 1046528   ;;  %v2749_v21 = vld [vmem:[%s2673_s28 + $0x18] sm:$0xff]  ;;  %v1678_v26 = vld [vmem:[%s2688_s27 + $0x8] sm:$0x1]  ;;  %v542_v31 = vrot.slane %v2709_v1, 1 }
  0xef   : > { %v1683_v22 = vld [vmem:[%s2681_s11 + $0x1f] sm:$0x1]  ;;  %v627_v25 = vrot.slane %v2749_v21, 7  ;;  %v1681_v27 = vld [vmem:[%s2688_s27 + $0x10] sm:$0x1]  ;;  %v586_v33 = vrot.slane %v2715_v4, 1 }
  0xf0   : > { %517 = vrot.lane.b32.xlu1 %v2703_v0, %s2284_s23  ;;  %v1684_v35 = vld [vmem:[%s2688_s27 + $0x18] sm:$0x1]  ;;  %v630_v39 = vrot.slane %v2749_v21, 1  ;;  %s2806_s17 = sld [smem:[#allocation8 + $0x3]]  ;;  %s2810_s10 = sld [smem:[#allocation8 + $0x5]]  ;;  %vm506_vm2 = vcmask 7168  }
  0xf1   : > { %p479_p9 = scmp.gt.s32.totalorder %s4016_s18, 0  ;;  %p472_p12 = scmp.lt.s32.totalorder %s4016_s18, 1  ;;  %vm511_vm3 = vcmask 121856   ;;  %vm976_vm4 = vcmask 130048   ;;  %vm985_vm5 = vcmask 122880  }
  0xf2   : > { %s2808_s30 = sld [smem:[#allocation8 + $0x83]]  ;;  %s2812_s28 = sld [smem:[#allocation8 + $0x85]] }
  0xf3   : > { %s480_s15 = scalar_select %p479_p9, 1.0, 0.0 }
  0xf4   : > { %s482_s16 = scalar_select %p472_p12, 1.0, 0.0 }
  0xf5   : > { %v485_v8 = vstv %s480_s15  ;;  %s2814_s3 = sld [smem:[#allocation8]]  ;;  %s2816_s12 = sld [smem:[#allocation8 + $0x1]] }
  0xf6   : > { %v486_v9 = vmul.f32 %v485_v8, %v484_v2  ;;  %v534_v10 = vmul.f32 %v1677_v3, %v485_v8  ;;  %v578_v11 = vmul.f32 %v1680_v5, %v485_v8  ;;  %v488_v17 = vstv %s482_s16  ;;  %4017 = sst [smem:[#allocation38_spill]] %s2806_s17  ;;  %s2818_s7 = sld [smem:[#allocation8 + $0x80]] }
  0xf7   : > { %v489_v18 = vmul.f32 %v488_v17, %v487_v16  ;;  %v622_v24 = vmul.f32 %v1683_v22, %v485_v8  ;;  %v537_v29 = vmul.f32 %v1678_v26, %v488_v17  ;;  %v581_v30 = vmul.f32 %v1681_v27, %v488_v17  ;;  %4019 = sst [smem:[#allocation40_spill]] %s2810_s10  ;;  %s2820_s4 = sld [smem:[#allocation8 + $0x81]] }
  0xf8   : > { %v2726_v13 = vsel %vm493_vm0, %v486_v9, %v491_v6  ;;  %v2729_v14 = vsel %vm493_vm0, %v534_v10, %v539_v7  ;;  %v2736_v15 = vsel %vm493_vm0, %v578_v11, %v583_v12  ;;  %v625_v38 = vmul.f32 %v1684_v35, %v488_v17  ;;  %4018 = sst [smem:[#allocation39_spill]] %s2808_s30  ;;  %s2822_s22 = sld [smem:[#allocation8 + $0x100]] }
  0xf9   : > { %503 = vrot.lane.b32.xlu0 %v2726_v13, %s2283_s1  ;;  %549 = vrot.lane.b32.xlu1 %v2729_v14, %s2283_s1  ;;  %v498_v20 = vrot.slane %v489_v18, 1  ;;  %v2767_v28 = vsel %vm493_vm0, %v622_v24, %v627_v25  ;;  %v545_v32 = vrot.slane %v537_v29, 1  ;;  %v589_v34 = vrot.slane %v581_v30, 1  ;;  %4020 = sst [smem:[#allocation41_spill]] %s2812_s28  ;;  %s2824_s11 = sld [smem:[#allocation8 + $0x101]] }
  0xfa   : > { %v633_v40 = vrot.slane %v625_v38, 1  ;;  %s2826_s6 = sld [smem:[#allocation8 + $0x180]]  ;;  %s2828_s20 = sld [smem:[#allocation8 + $0x181]]  ;;  %v674_v43 = vstv %s2806_s17  ;;  %v709_v44 = vstv %s2808_s30  ;;  %v682_v46 = vstv %s2810_s10 }
  0xfb   : > { %v2757_v23 = vsel %vm500_vm1, %v495_v19, %v498_v20  ;;  %v2781_v36 = vsel %vm500_vm1, %v542_v31, %v545_v32  ;;  %v2784_v37 = vsel %vm500_vm1, %v586_v33, %v589_v34  ;;  %4021 = sst [smem:[#allocation42_spill]] %s2814_s3  ;;  %s2830_s2 = sld [smem:[#allocation8 + $0x2]]  ;;  %v666_v42 = vstv %s2816_s12 }
  0xfc   : > { %v2796_v41 = vsel %vm500_vm1, %v630_v39, %v633_v40  ;;  %4022 = sst [smem:[#allocation43_spill]] %s2818_s7  ;;  %s2832_s27 = sld [smem:[#allocation8 + $0x82]]  ;;  %v717_v47 = vstv %s2812_s28  ;;  %v663_v50 = vstv %s2814_s3  ;;  %v698_v51 = vstv %s2818_s7 }
  0xfd   : > { %508 = vrot.lane.b32.xlu0 %v2726_v13, %s2284_s23  ;;  %593 = vrot.lane.b32.xlu1 %v2736_v15, %s2283_s1  ;;  %s2836_s15 = sld [smem:[#allocation8 + $0x201]]  ;;  %s2842_s0 = sld [smem:[#allocation8 + $0x102]]  ;;  %v701_v45 = vstv %s2820_s4  ;;  %v2949_v52 = vmul.f32 %v666_v42, %v2726_v13 }
  0xfe   : > { %4023 = sst [smem:[#allocation44_spill]] %s2822_s22  ;;  %s2840_s16 = sld [smem:[#allocation8 + $0x281]]  ;;  %v2957_v54 = vmul.f32 %v701_v45, %v2726_v13  ;;  %v733_v55 = vstv %s2822_s22 }
  0xff   : > { %s2844_s13 = sld [smem:[#allocation8 + $0x182]]  ;;  %s2850_s8 = sld [smem:[#allocation8 + $0x103]]  ;;  %v736_v48 = vstv %s2824_s11 }
 0x100   : > { %4024 = sst [smem:[#allocation45_spill]] %s2826_s6  ;;  %s2846_s19 = sld [smem:[#allocation8 + $0x202]]  ;;  %v771_v49 = vstv %s2828_s20  ;;  %v768_v56 = vstv %s2826_s6  ;;  %v2967_v58 = vmul.f32 %v736_v48, %v2729_v14 }
 0x101   : > { %553 = vrot.lane.b32.xlu0 %v2729_v14, %s2284_s23  ;;  %597 = vrot.lane.b32.xlu1 %v2736_v15, %s2284_s23  ;;  %4025 = sst [smem:[#allocation46_spill]] %s2830_s2  ;;  %s2848_s9 = sld [smem:[#allocation8 + $0x282]]  ;;  %v2970_v59 = vmul.f32 %v771_v49, %v2729_v14  ;;  %v670_v60 = vstv %s2830_s2 }
 0x102   : > { %4026 = sst [smem:[#allocation47_spill]] %s2832_s27  ;;  %s2852_s29 = sld [smem:[#allocation8 + $0x183]]  ;;  %v705_v61 = vstv %s2832_s27 }
 0x103   : > { %4029 = sst [smem:[#allocation50_spill]] %s2842_s0  ;;  %s2854_s24 = sld [smem:[#allocation8 + $0x203]]  ;;  %v806_v53 = vstv %s2836_s15  ;;  %v740_v3 = vstv %s2842_s0 }
 0x104   : > { %s2856_s26 = sld [smem:[#allocation8 + $0x283]]  ;;  %s2858_s25 = sld [smem:[#allocation8 + $0x4]]  ;;  %v841_v57 = vstv %s2840_s16  ;;  %v2980_v63 = vmul.f32 %v806_v53, %v2736_v15 }
 0x105   : > { %557 = vrot.lane.b32.xlu0 %v2709_v1, %s2283_s1  ;;  %601 = vrot.lane.b32.xlu1 %v2715_v4, %s2283_s1  ;;  %4030 = sst [smem:[#allocation51_spill]] %s2844_s13  ;;  %s2860_s14 = sld [smem:[#allocation8 + $0x6]]  ;;  %v2989_v5 = vmul.f32 %v841_v57, %v2736_v15  ;;  %v775_v6 = vstv %s2844_s13 }
 0x106   : > { %4031 = sst [smem:[#allocation52_spill]] %s2846_s19  ;;  %s2862_s21 = sld [smem:[#allocation8 + $0x84]] }
 0x107   : > { %4032 = sst [smem:[#allocation53_spill]] %s2848_s9  ;;  %s2864_s18 = sld [smem:[#allocation8 + $0x86]] }
 0x108   : > { %4033 = sst [smem:[#allocation54_spill]] %s2850_s8  ;;  %s2866_s5 = sld [smem:[#allocation8 + $0x7]] }
 0x109   : > { %522 = vrot.lane.b32.xlu0 %v2757_v23, %s2283_s1  ;;  %526 = vrot.lane.b32.xlu1 %v2757_v23, %s2284_s23  ;;  %4034 = sst [smem:[#allocation55_spill]] %s2852_s29  ;;  %s2868_s19 = sld [smem:[#allocation8 + $0x8]] }
 0x10a   : > { %4035 = sst [smem:[#allocation56_spill]] %s2854_s24  ;;  %s2870_s9 = sld [smem:[#allocation8 + $0x87]] }
 0x10b   : > { %4036 = sst [smem:[#allocation57_spill]] %s2856_s26  ;;  %s2872_s8 = sld [smem:[#allocation8 + $0x88]] }
 0x10c   : > { %4037 = sst [smem:[#allocation58_spill]] %s2858_s25  ;;  %s2880_s25 = sld [smem:[#allocation11 + $0x1]] }
 0x10d   : > { %561 = vrot.lane.b32.xlu0 %v2709_v1, %s2284_s23  ;;  %641 = vrot.lane.b32.xlu1 %v2767_v28, %s2284_s23  ;;  %4038 = sst [smem:[#allocation59_spill]] %s2860_s14  ;;  %s2874_s29 = sld [smem:[#allocation11]] }
 0x10e   : > { %4039 = sst [smem:[#allocation60_spill]] %s2862_s21  ;;  %s2876_s24 = sld [smem:[#allocation9]] }
 0x10f   : > { %4040 = sst [smem:[#allocation61_spill]] %s2864_s18  ;;  %s2878_s26 = sld [smem:[#allocation9 + $0x80]] }
 0x110   : > { %4041 = sst [smem:[#allocation62_spill]] %s2866_s5  ;;  %s2882_s14 = sld [smem:[#allocation9 + $0x1]] }
 0x111   : > { %637 = vrot.lane.b32.xlu0 %v2767_v28, %s2283_s1  ;;  %645 = vrot.lane.b32.xlu1 %v2749_v21, %s2283_s1  ;;  %4042 = sst [smem:[#allocation63_spill]] %s2868_s19  ;;  %s2884_s21 = sld [smem:[#allocation9 + $0x81]] }
 0x112   : > { %4043 = sst [smem:[#allocation64_spill]] %s2870_s9  ;;  %s2886_s18 = sld [smem:[#allocation11 + $0x2]] }
 0x113   : > { %4044 = sst [smem:[#allocation65_spill]] %s2872_s8  ;;  %s2888_s5 = sld [smem:[#allocation9 + $0x2]] }
 0x114   : > { %4045 = sst [smem:[#allocation66_spill]] %s2874_s29  ;;  %s2890_s19 = sld [smem:[#allocation9 + $0x82]] }
 0x115   : > { %566 = vrot.lane.b32.xlu0 %v2781_v36, %s2283_s1  ;;  %610 = vrot.lane.b32.xlu1 %v2784_v37, %s2283_s1  ;;  %4046 = sst [smem:[#allocation67_spill]] %s2876_s24  ;;  %s2892_s9 = sld [smem:[#allocation11 + $0x3]] }
 0x116   : > { %4047 = sst [smem:[#allocation68_spill]] %s2878_s26  ;;  %s2894_s8 = sld [smem:[#allocation9 + $0x3]] }
 0x117   : > { %4048 = sst [smem:[#allocation69_spill]] %s2880_s25  ;;  %s2898_s26 = sld [smem:[#allocation11 + $0x4]] }
 0x118   : > { %4049 = sst [smem:[#allocation70_spill]] %s2882_s14  ;;  %s2896_s24 = sld [smem:[#allocation9 + $0x83]] }
 0x119   : > { %605 = vrot.lane.b32.xlu0 %v2715_v4, %s2284_s23  ;;  %614 = vrot.lane.b32.xlu1 %v2784_v37, %s2284_s23  ;;  %4050 = sst [smem:[#allocation71_spill]] %s2884_s21  ;;  %s2900_s25 = sld [smem:[#allocation9 + $0x4]] }
 0x11a   : > { %4051 = sst [smem:[#allocation72_spill]] %s2886_s18  ;;  %s2902_s14 = sld [smem:[#allocation9 + $0x84]] }
 0x11b   : > { %4052 = sst [smem:[#allocation73_spill]] %s2888_s5  ;;  %s2904_s18 = sld [smem:[#allocation11 + $0x5]] }
 0x11c   : > { %4053 = sst [smem:[#allocation74_spill]] %s2890_s19  ;;  %s2906_s5 = sld [smem:[#allocation9 + $0x5]] }
 0x11d   : > { %570 = vrot.lane.b32.xlu0 %v2781_v36, %s2284_s23  ;;  %658 = vrot.lane.b32.xlu1 %v2796_v41, %s2284_s23  ;;  %4054 = sst [smem:[#allocation75_spill]] %s2892_s9  ;;  %s2908_s19 = sld [smem:[#allocation9 + $0x85]] }
 0x11e   : > { %4055 = sst [smem:[#allocation76_spill]] %s2894_s8  ;;  %s2910_s9 = sld [smem:[#allocation11 + $0x6]] }
 0x11f   : > { %4056 = sst [smem:[#allocation77_spill]] %s2896_s24  ;;  %s2912_s8 = sld [smem:[#allocation9 + $0x6]] }
 0x120   : > { %4057 = sst [smem:[#allocation78_spill]] %s2898_s26  ;;  %s2914_s26 = sld [smem:[#allocation9 + $0x86]] }
 0x121   : > { %649 = vrot.lane.b32.xlu0 %v2749_v21, %s2284_s23  ;;  %s2838_s23 = sld [smem:[#allocation8 + $0x280]]  ;;  %4058 = sst [smem:[#allocation79_spill]] %s2900_s25 }
 0x122   : > { %4059 = sst [smem:[#allocation80_spill]] %s2902_s14  ;;  %s2916_s25 = sld [smem:[#allocation11 + $0x7]] }
 0x123   : > { %4060 = sst [smem:[#allocation81_spill]] %s2904_s18  ;;  %s2922_s24 = sld [smem:[#allocation8 + $0x104]] }
 0x124   : > { %4061 = sst [smem:[#allocation82_spill]] %s2906_s5  ;;  %s2918_s14 = sld [smem:[#allocation9 + $0x7]] }
 0x125   : > { %654 = vrot.lane.b32.xlu0 %v2796_v41, %s2283_s1  ;;  %s2834_s1 = sld [smem:[#allocation8 + $0x200]]  ;;  %4062 = sst [smem:[#allocation83_spill]] %s2908_s19 }
 0x126   : > { %4063 = sst [smem:[#allocation84_spill]] %s2910_s9  ;;  %s2920_s18 = sld [smem:[#allocation9 + $0x87]] }
 0x127   : > { %4028 = sst [smem:[#allocation49_spill]] %s2838_s23  ;;  %s2924_s19 = sld [smem:[#allocation8 + $0x105]]  ;;  %v838_v2 = vstv %s2838_s23 }
 0x128   : > { %4064 = sst [smem:[#allocation85_spill]] %s2912_s8  ;;  %s2927_s9 = sld [smem:[#allocation8 + $0x184]] }
 0x129   : > { %4065 = sst [smem:[#allocation86_spill]] %s2914_s26  ;;  %s2929_s8 = sld [smem:[#allocation8 + $0x185]]  ;;  %v748_v48 = vstv %s2922_s24 }
 0x12a   : > { %4066 = sst [smem:[#allocation87_spill]] %s2916_s25  ;;  %s2934_s25 = sld [smem:[#allocation8 + $0x302]]  ;;  %v3089_v53 = vmul.f32 %v2709_v1, %v748_v48 }
 0x12b   : > { %4027 = sst [smem:[#allocation48_spill]] %s2834_s1  ;;  %s2942_s12 = sld [smem:[#allocation8 + $0x300]]  ;;  %v803_v62 = vstv %s2834_s1 }
 0x12c   : > { %4067 = sst [smem:[#allocation88_spill]] %s2918_s14  ;;  %s2952_s4 = sld [smem:[#allocation8 + $0x380]] }
 0x12d   : > { %4068 = sst [smem:[#allocation89_spill]] %s2920_s18  ;;  %s2936_s18 = sld [smem:[#allocation8 + $0x382]] }
 0x12e   : > { %4069 = sst [smem:[#allocation90_spill]] %s2924_s19  ;;  %s2944_s19 = sld [smem:[#allocation8 + $0x301]] }
 0x12f   : > { %4070 = sst [smem:[#allocation91_spill]] %s2929_s8  ;;  %s2962_s11 = sld [smem:[#allocation8 + $0x303]] }
 0x130   : > { %4071 = sst [smem:[#allocation92_spill]] %s2934_s25  ;;  %s2954_s10 = sld [smem:[#allocation8 + $0x381]] }
 0x131   : > { %4073 = sst [smem:[#allocation94_spill]] %s2942_s12  ;;  %s4076_s20 = sld [smem:[#allocation58_spill]] }
 0x132   : > { %4074 = sst [smem:[#allocation95_spill]] %s2952_s4  ;;  %s2964_s28 = sld [smem:[#allocation8 + $0x383]] }
 0x133   : > { %4072 = sst [smem:[#allocation93_spill]] %s2936_s18  ;;  %s4078_s15 = sld [smem:[#allocation60_spill]] }
 0x134   : > { %s4079_s30 = sld [smem:[#allocation52_spill]]  ;;  %s4080_s17 = sld [smem:[#allocation53_spill]]  ;;  %v876_v35 = vstv %s2944_s19 }
 0x135   : > { %4075 = sst [smem:[#allocation96_spill]] %s2962_s11  ;;  %s4082_s16 = sld [smem:[#allocation54_spill]] }
 0x136   : > { %s2974_s22 = sld [smem:[#allocation8 + $0x106]]  ;;  %s4084_s7 = sld [smem:[#allocation62_spill]] }
 0x137   : > { %s2976_s6 = sld [smem:[#allocation8 + $0x186]]  ;;  %s4085_s3 = sld [smem:[#allocation55_spill]]  ;;  %v678_v7 = vstv %s4076_s20 }
 0x138   : > { %4077 = sst [smem:[#allocation58_spill]] %s2964_s28  ;;  %s4086_s28 = sld [smem:[#allocation56_spill]]  ;;  %v3015_v17 = vmul.f32 %v678_v7, %v2703_v0  ;;  %v783_v7 = vstv %s2927_s9 }
 0x139   : > { %s2984_s11 = sld [smem:[#allocation8 + $0x204]]  ;;  %s4088_s2 = sld [smem:[#allocation57_spill]]  ;;  %v713_v8 = vstv %s4078_s15 }
 0x13a   : > { %s2986_s4 = sld [smem:[#allocation8 + $0x205]]  ;;  %s4090_s27 = sld [smem:[#allocation64_spill]]  ;;  %v810_v9 = vstv %s4079_s30  ;;  %v845_v10 = vstv %s4080_s17  ;;  %v3019_v19 = vmul.f32 %v713_v8, %v2703_v0  ;;  %v3098_v8 = vmul.f32 %v2709_v1, %v783_v7 }
 0x13b   : > { %s4091_s1 = sld [smem:[#allocation59_spill]]  ;;  %s4093_s23 = sld [smem:[#allocation61_spill]]  ;;  %v744_v11 = vstv %s4082_s16  ;;  %v3115_v1 = vmul.f32 %v876_v35, %v2767_v28 }
 0x13c   : > { %4081 = sst [smem:[#allocation60_spill]] %s2974_s22  ;;  %s2996_s22 = sld [smem:[#allocation8 + $0x285]]  ;;  %v690_v12 = vstv %s4084_s7 }
 0x13d   : > { %4083 = sst [smem:[#allocation97_spill]] %s2976_s6  ;;  %s2994_s6 = sld [smem:[#allocation8 + $0x284]]  ;;  %v779_v13 = vstv %s4085_s3  ;;  %v3030_v26 = vmul.f32 %v690_v12, %v2757_v23  ;;  %v911_v12 = vstv %s2954_s10 }
 0x13e   : > { %s4094_s0 = sld [smem:[#allocation63_spill]]  ;;  %s3004_s12 = sld [smem:[#allocation8 + $0x286]]  ;;  %v814_v14 = vstv %s4086_s28  ;;  %v3125_v49 = vmul.f32 %v911_v12, %v2767_v28 }
 0x13f   : > { %4087 = sst [smem:[#allocation62_spill]] %s2984_s11  ;;  %s4095_s11 = sld [smem:[#allocation65_spill]]  ;;  %v849_v15 = vstv %s4088_s2 }
 0x140   : > { %4089 = sst [smem:[#allocation98_spill]] %s2986_s4  ;;  %s3002_s4 = sld [smem:[#allocation8 + $0x206]]  ;;  %v725_v16 = vstv %s4090_s27 }
 0x141   : > { %s3010_s13 = sld [smem:[#allocation8 + $0x107]]  ;;  %s3012_s30 = sld [smem:[#allocation8 + $0x108]]  ;;  %v686_v18 = vstv %s4091_s1  ;;  %v721_v20 = vstv %s4093_s23  ;;  %v3040_v30 = vmul.f32 %v725_v16, %v2757_v23  ;;  %v787_v16 = vstv %s2929_s8 }
 0x142   : > { %4092 = sst [smem:[#allocation64_spill]] %s2996_s22  ;;  %s3022_s28 = sld [smem:[#allocation8 + $0x187]] }
 0x143   : > { %s3024_s27 = sld [smem:[#allocation8 + $0x188]]  ;;  %s3042_s29 = sld [smem:[#allocation9 + $0x101]]  ;;  %v853_v42 = vstv %s2994_s6 }
 0x144   : > { %4097 = sst [smem:[#allocation100_spill]] %s3004_s12  ;;  %v694_v22 = vstv %s4094_s0  ;;  %s3032_s17 = sld [smem:[#allocation9 + $0x100]]  ;;  %v3147_v12 = vmul.f32 %v2715_v4, %v853_v42 }
 0x145   : > { %v729_v24 = vstv %s4095_s11  ;;  %s3034_s12 = sld [smem:[#allocation9 + $0x180]]  ;;  %s3050_s20 = sld [smem:[#allocation9 + $0x102]] }
 0x146   : > { %4096 = sst [smem:[#allocation99_spill]] %s3002_s4  ;;  %s3052_s15 = sld [smem:[#allocation9 + $0x182]] }
 0x147   : > { %4101 = sst [smem:[#allocation101_spill]] %s3012_s30  ;;  %s3044_s4 = sld [smem:[#allocation9 + $0x181]]  ;;  %v760_v25 = vstv %s3010_s13 }
 0x148   : > { %s3060_s21 = sld [smem:[#allocation9 + $0x183]]  ;;  %s3066_s7 = sld [smem:[#allocation9 + $0x104]]  ;;  %v795_v39 = vstv %s3022_s28 }
 0x149   : > { %4104 = sst [smem:[#allocation102_spill]] %s3024_s27  ;;  %s4124_s1 = sld [smem:[#allocation90_spill]]  ;;  %v3161_v23 = vmul.f32 %v795_v39, %v2781_v36 }
 0x14a   : > { %4108 = sst [smem:[#allocation103_spill]] %s3032_s17  ;;  %s3068_s16 = sld [smem:[#allocation9 + $0x184]] }
 0x14b   : > { %4110 = sst [smem:[#allocation104_spill]] %s3034_s12  ;;  %s3074_s23 = sld [smem:[#allocation9 + $0x105]] }
 0x14c   : > { %4114 = sst [smem:[#allocation105_spill]] %s3042_s29  ;;  %s3076_s30 = sld [smem:[#allocation9 + $0x185]] }
 0x14d   : > { %4116 = sst [smem:[#allocation106_spill]] %s3044_s4  ;;  %s3058_s4 = sld [smem:[#allocation9 + $0x103]] }
 0x14e   : > { %4118 = sst [smem:[#allocation107_spill]] %s3050_s20  ;;  %s3082_s24 = sld [smem:[#allocation9 + $0x106]] }
 0x14f   : > { %s3084_s17 = sld [smem:[#allocation9 + $0x186]]  ;;  %s4128_s22 = sld [smem:[#allocation62_spill]]  ;;  %v752_v40 = vstv %s4124_s1 }
 0x150   : > { %s3092_s5 = sld [smem:[#allocation9 + $0x107]]  ;;  %s3104_s14 = sld [smem:[#allocation8 + $0x208]] }
 0x151   : > { %s3094_s26 = sld [smem:[#allocation9 + $0x187]]  ;;  %s3112_s11 = sld [smem:[#allocation8 + $0x288]] }
 0x152   : > { %4125 = sst [smem:[#allocation108_spill]] %s3076_s30  ;;  %s3102_s2 = sld [smem:[#allocation8 + $0x207]] }
 0x153   : > { %s3110_s12 = sld [smem:[#allocation8 + $0x287]]  ;;  %s3120_s8 = sld [smem:[#allocation9 + $0x200]] }
 0x154   : > { %s3122_s25 = sld [smem:[#allocation9 + $0x280]]  ;;  %s4140_s18 = sld [smem:[#allocation64_spill]] }
 0x155   : > { %4127 = sst [smem:[#allocation109_spill]] %s3084_s17  ;;  %v818_v33 = vstv %s4128_s22  ;;  %s3130_s1 = sld [smem:[#allocation9 + $0x201]] }
 0x156   : > { %4130 = sst [smem:[#allocation62_spill]] %s3092_s5  ;;  %s3132_s9 = sld [smem:[#allocation9 + $0x281]]  ;;  %v3137_v7 = vmul.f32 %v2715_v4, %v818_v33  ;;  %v3157_v33 = vmul.f32 %v760_v25, %v2781_v36 }
 0x157   : > { %4132 = sst [smem:[#allocation110_spill]] %s3094_s26  ;;  %s3140_s29 = sld [smem:[#allocation9 + $0x202]] }
 0x158   : > { %4136 = sst [smem:[#allocation111_spill]] %s3112_s11  ;;  %s3152_s0 = sld [smem:[#allocation9 + $0x203]]  ;;  %v830_v38 = vstv %s3102_s2 }
 0x159   : > { %4138 = sst [smem:[#allocation112_spill]] %s3120_s8  ;;  %s3142_s8 = sld [smem:[#allocation9 + $0x282]]  ;;  %v865_v35 = vstv %s3110_s12  ;;  %v3199_v27 = vmul.f32 %v830_v38, %v2784_v37 }
 0x15a   : > { %4139 = sst [smem:[#allocation113_spill]] %s3122_s25  ;;  %s3154_s10 = sld [smem:[#allocation9 + $0x283]]  ;;  %v3203_v42 = vmul.f32 %v865_v35, %v2784_v37 }
 0x15b   : > { %4143 = sst [smem:[#allocation64_spill]] %s3130_s1  ;;  %s3164_s19 = sld [smem:[#allocation9 + $0x204]] }
 0x15c   : > { %4145 = sst [smem:[#allocation114_spill]] %s3132_s9  ;;  %s3166_s27 = sld [smem:[#allocation9 + $0x284]] }
 0x15d   : > { %4147 = sst [smem:[#allocation115_spill]] %s3140_s29  ;;  %s3172_s11 = sld [smem:[#allocation9 + $0x205]] }
 0x15e   : > { %v3144_v28 = vpop.permute.xlu1 %513  ;;  %4153 = sst [smem:[#allocation117_spill]] %s3152_s0  ;;  %s3174_s22 = sld [smem:[#allocation9 + $0x285]]  ;;  %v1121_v45 = vstv %s3152_s0 }
 0x15f   : > { %4149 = sst [smem:[#allocation116_spill]] %s3142_s8  ;;  %s3180_s25 = sld [smem:[#allocation9 + $0x206]] }
 0x160   : > { %4154 = sst [smem:[#allocation118_spill]] %s3154_s10  ;;  %s3182_s3 = sld [smem:[#allocation9 + $0x286]] }
 0x161   : > { %4155 = sst [smem:[#allocation119_spill]] %s3164_s19  ;;  %s3190_s20 = sld [smem:[#allocation9 + $0x207]] }
 0x162   : > { %4156 = sst [smem:[#allocation120_spill]] %s3166_s27  ;;  %s4161_s13 = sld [smem:[#allocation111_spill]]  ;;  %v3184_v25 = vpop.permute.xlu1 %517 }
 0x163   : > { %4157 = sst [smem:[#allocation121_spill]] %s3172_s11  ;;  %s3210_s26 = sld [smem:[#allocation8 + $0x304]] }
 0x164   : > { %4158 = sst [smem:[#allocation122_spill]] %s3174_s22  ;;  %s3208_s17 = sld [smem:[#allocation9 + $0x287]] }
 0x165   : > { %4159 = sst [smem:[#allocation123_spill]] %s3180_s25  ;;  %s3230_s30 = sld [smem:[#allocation8 + $0x384]] }
 0x166   : > { %4160 = sst [smem:[#allocation124_spill]] %s3182_s3  ;;  %s3257_s2 = sld [smem:[#allocation8 + $0x305]] }
 0x167   : > { %4164 = sst [smem:[#allocation111_spill]] %s3190_s20  ;;  %s3294_s6 = sld [smem:[#allocation8 + $0x386]] }
 0x168   : > { %s3282_s28 = sld [smem:[#allocation8 + $0x385]]  ;;  %s3306_s8 = sld [smem:[#allocation8 + $0x387]] }
 0x169   : > { %s4196_s9 = sld [smem:[#allocation93_spill]]  ;;  %s4197_s29 = sld [smem:[#allocation67_spill]] }
 0x16a   : > { %4167 = sst [smem:[#allocation42_spill]] %s3208_s17  ;;  %v1337_v35 = vstv %s3208_s17  ;;  %s4198_s1 = sld [smem:[#allocation68_spill]] }
 0x16b   : > { %v504_v38 = vpop.permute.xlu0 %503  ;;  %v550_v31 = vpop.permute.xlu1 %549  ;;  %s3304_s17 = sld [smem:[#allocation8 + $0x308]]  ;;  %s4199_s10 = sld [smem:[#allocation70_spill]] }
 0x16c   : > { %v507_v4 = vsel %vm506_vm2, 0.0, %v504_v38  ;;  %v552_v36 = vsel %vm506_vm2, 0.0, %v550_v31  ;;  %v516_v31 = vsel %vm506_vm2, 0.0, %v3144_v28  ;;  %s4200_s20 = sld [smem:[#allocation71_spill]]  ;;  %s4201_s3 = sld [smem:[#allocation73_spill]] }
 0x16d   : > { %v664_v29 = vmul.f32 %v663_v50, %v507_v4  ;;  %v699_v0 = vmul.f32 %v698_v51, %v507_v4  ;;  %v734_v50 = vmul.f32 %v733_v55, %v552_v36  ;;  %v769_v51 = vmul.f32 %v768_v56, %v552_v36  ;;  %4187 = sst [smem:[#allocation44_spill]] %s3294_s6  ;;  %s4205_s12 = sld [smem:[#allocation77_spill]] }
 0x16e   : > { %v675_v56 = vmul.f32 %v674_v43, %v516_v31  ;;  %v710_v36 = vmul.f32 %v709_v44, %v516_v31  ;;  %s4203_s25 = sld [smem:[#allocation76_spill]]  ;;  %s4207_s5 = sld [smem:[#allocation66_spill]] }
 0x16f   : > { %v509_v4 = vpop.permute.xlu0 %508  ;;  %v594_v38 = vpop.permute.xlu1 %593  ;;  %v668_v34 = vadd.f32 %v2949_v52, %v664_v29  ;;  %v703_v37 = vadd.f32 %v2957_v54, %v699_v0  ;;  %v888_v52 = vstv %s3210_s26  ;;  %v738_v54 = vadd.f32 %v2967_v58, %v734_v50  ;;  %s3265_s26 = sld [smem:[#allocation8 + $0x307]]  ;;  %s4208_s22 = sld [smem:[#allocation69_spill]] }
 0x170   : > { %v512_v32 = vsel %vm511_vm3, %v509_v4, 0.0  ;;  %v596_v48 = vsel %vm506_vm2, 0.0, %v594_v38  ;;  %s4210_s11 = sld [smem:[#allocation80_spill]]  ;;  %s4213_s27 = sld [smem:[#allocation75_spill]] }
 0x171   : > { %v671_v57 = vmul.f32 %v670_v60, %v512_v32  ;;  %v706_v28 = vmul.f32 %v705_v61, %v512_v32  ;;  %v804_v55 = vmul.f32 %v803_v62, %v596_v48  ;;  %v839_v39 = vmul.f32 %v838_v2, %v596_v48  ;;  %4190 = sst [smem:[#allocation45_spill]] %s3304_s17  ;;  %s4221_s19 = sld [smem:[#allocation78_spill]] }
 0x172   : > { %v773_v60 = vadd.f32 %v2970_v59, %v769_v51  ;;  %s4223_s0 = sld [smem:[#allocation85_spill]] }
 0x173   : > { %v672_v61 = vadd.f32 %v671_v57, %v668_v34  ;;  %v707_v62 = vadd.f32 %v706_v28, %v703_v37  ;;  %v554_v2 = vpop.permute.xlu0 %553  ;;  %v598_v0 = vpop.permute.xlu1 %597  ;;  %v808_v43 = vadd.f32 %v2980_v63, %v804_v55  ;;  %v843_v44 = vadd.f32 %v2989_v5, %v839_v39 }
 0x174   : > { %v556_v29 = vsel %vm511_vm3, %v554_v2, 0.0  ;;  %v600_v32 = vsel %vm511_vm3, %v598_v0, 0.0  ;;  %v520_v57 = vsel %vm511_vm3, %v3184_v25, 0.0  ;;  %v923_v39 = vstv %s3230_s30  ;;  %s3284_s30 = sld [smem:[#allocation8 + $0x306]] }
 0x175   : > { %v676_v58 = vadd.f32 %v675_v56, %v672_v61  ;;  %v711_v48 = vadd.f32 %v710_v36, %v707_v62  ;;  %v741_v59 = vmul.f32 %v740_v3, %v556_v29  ;;  %v776_v34 = vmul.f32 %v775_v6, %v556_v29 }
 0x176   : > { %v811_v63 = vmul.f32 %v810_v9, %v600_v32  ;;  %v846_v5 = vmul.f32 %v845_v10, %v600_v32  ;;  %v718_v56 = vmul.f32 %v717_v47, %v520_v57  ;;  %v3301_v36 = vmul.f32 %v2749_v21, %v888_v52 }
 0x177   : > { %v742_v37 = vadd.f32 %v741_v59, %v738_v54  ;;  %v777_v31 = vadd.f32 %v776_v34, %v773_v60  ;;  %v558_v50 = vpop.permute.xlu0 %557  ;;  %v602_v3 = vpop.permute.xlu1 %601  ;;  %v680_v6 = vadd.f32 %v3015_v17, %v676_v58  ;;  %v715_v25 = vadd.f32 %v3019_v19, %v711_v48 }
 0x178   : > { %v812_v51 = vadd.f32 %v811_v63, %v808_v43  ;;  %v847_v4 = vadd.f32 %v846_v5, %v843_v44  ;;  %v560_v9 = vsel %vm506_vm2, 0.0, %v558_v50  ;;  %v604_v10 = vsel %vm506_vm2, 0.0, %v602_v3 }
 0x179   : > { %v745_v38 = vmul.f32 %v744_v11, %v560_v9  ;;  %v780_v28 = vmul.f32 %v779_v13, %v560_v9  ;;  %v815_v55 = vmul.f32 %v814_v14, %v604_v10  ;;  %v850_v17 = vmul.f32 %v849_v15, %v604_v10 }
 0x17a   : > { %4186 = sst [smem:[#allocation43_spill]] %s3284_s30  ;;  %v683_v19 = vmul.f32 %v682_v46, %v520_v57  ;;  %v892_v54 = vstv %s3257_s2  ;;  %v3311_v52 = vmul.f32 %v2749_v21, %v923_v39  ;;  %v900_v62 = vstv %s3265_s26  ;;  %s4195_s26 = sld [smem:[#allocation92_spill]] }
 0x17b   : > { %v746_v11 = vadd.f32 %v745_v38, %v742_v37  ;;  %v781_v13 = vadd.f32 %v780_v28, %v777_v31  ;;  %v816_v14 = vadd.f32 %v815_v55, %v812_v51  ;;  %v851_v15 = vadd.f32 %v850_v17, %v847_v4  ;;  %v523_v60 = vpop.permute.xlu0 %522  ;;  %v527_v61 = vpop.permute.xlu1 %526  ;;  %s4288_s2 = sld [smem:[#allocation62_spill]] }
 0x17c   : > { %v525_v46 = vsel %vm506_vm2, 0.0, %v523_v60  ;;  %v529_v47 = vsel %vm511_vm3, %v527_v61, 0.0  ;;  %v684_v2 = vadd.f32 %v683_v19, %v680_v6  ;;  %v719_v0 = vadd.f32 %v718_v56, %v715_v25 }
 0x17d   : > { %v687_v43 = vmul.f32 %v686_v18, %v525_v46  ;;  %v722_v44 = vmul.f32 %v721_v20, %v525_v46  ;;  %v750_v29 = vadd.f32 %v3089_v53, %v746_v11  ;;  %v785_v32 = vadd.f32 %v3098_v8, %v781_v13 }
 0x17e   : > { %v3321_v58 = vadd.f32 %v3137_v7, %v816_v14  ;;  %v3324_v21 = vadd.f32 %v3147_v12, %v851_v15  ;;  %v695_v18 = vmul.f32 %v694_v22, %v529_v47  ;;  %v730_v20 = vmul.f32 %v729_v24, %v529_v47 }
 0x17f   : > { %v688_v48 = vadd.f32 %v687_v43, %v684_v2  ;;  %v723_v59 = vadd.f32 %v722_v44, %v719_v0  ;;  %v562_v53 = vpop.permute.xlu0 %561  ;;  %v642_v34 = vpop.permute.xlu1 %641  ;;  %v927_v57 = vstv %s3282_s28  ;;  %v896_v63 = vstv %s3284_s30  ;;  %s4202_s30 = sld [smem:[#allocation74_spill]]  ;;  %s4331_s28 = sld [smem:[#allocation37_spill]] }
 0x180   : > { %v564_v8 = vsel %vm511_vm3, %v562_v53, 0.0  ;;  %v644_v7 = vsel %vm511_vm3, %v642_v34, 0.0  ;;  %v931_v24 = vstv %s3294_s6  ;;  %v3342_v37 = vmul.f32 %v900_v62, %v2796_v41  ;;  %s4209_s6 = sld [smem:[#allocation79_spill]] }
 0x181   : > { %v692_v12 = vadd.f32 %v3030_v26, %v688_v48  ;;  %v727_v5 = vadd.f32 %v3040_v30, %v723_v59  ;;  %v753_v39 = vmul.f32 %v752_v40, %v564_v8  ;;  %v788_v22 = vmul.f32 %v787_v16, %v564_v8 }
 0x182   : > { %v904_v31 = vstv %s3304_s17  ;;  %v935_v50 = vstv %s3306_s8  ;;  %v4204_v30 = vstv %s4195_s26  ;;  %v4206_v6 = vstv %s4196_s9  ;;  %s4211_s17 = sld [smem:[#allocation72_spill]]  ;;  %s4215_s26 = sld [smem:[#allocation82_spill]] }
 0x183   : > { %v696_v3 = vadd.f32 %v695_v18, %v692_v12  ;;  %v731_v26 = vadd.f32 %v730_v20, %v727_v5  ;;  %v881_v40 = vmul.f32 %v4204_v30, %v644_v7  ;;  %v916_v16 = vmul.f32 %v4206_v6, %v644_v7  ;;  %v638_v25 = vpop.permute.xlu0 %637  ;;  %v646_v51 = vpop.permute.xlu1 %645  ;;  %s4217_s9 = sld [smem:[#allocation83_spill]] }
 0x184   : > { %v754_v4 = vadd.f32 %v753_v39, %v750_v29  ;;  %v789_v9 = vadd.f32 %v788_v22, %v785_v32  ;;  %v640_v10 = vsel %vm506_vm2, 0.0, %v638_v25  ;;  %v648_v38 = vsel %vm506_vm2, 0.0, %v646_v51  ;;  %s4276_s8 = sld [smem:[#allocation107_spill]] }
 0x185   : > { %v4212_v28 = vstv %s4197_s29  ;;  %v4214_v17 = vstv %s4198_s1  ;;  %v4216_v56 = vstv %s4199_s10  ;;  %v4218_v13 = vstv %s4200_s20  ;;  %s4227_s29 = sld [smem:[#allocation81_spill]]  ;;  %s4229_s1 = sld [smem:[#allocation86_spill]] }
 0x186   : > { %v946_v55 = vmul.f32 %v4212_v28, %v696_v3  ;;  %v950_v19 = vmul.f32 %v4214_v17, %v731_v26  ;;  %v1000_v11 = vmul.f32 %v4216_v56, %v696_v3  ;;  %v1004_v14 = vmul.f32 %v4218_v13, %v731_v26  ;;  %s4232_s20 = sld [smem:[#allocation88_spill]]  ;;  %s4257_s10 = sld [smem:[#allocation98_spill]] }
 0x187   : > { %v4219_v15 = vstv %s4201_s3  ;;  %v4220_v61 = vstv %s4202_s30  ;;  %v4222_v47 = vstv %s4203_s25  ;;  %v4224_v2 = vstv %s4205_s12  ;;  %s4231_s3 = sld [smem:[#allocation84_spill]]  ;;  %v567_v53 = vpop.permute.xlu0 %566  ;;  %v611_v34 = vpop.permute.xlu1 %610  ;;  %s4234_s25 = sld [smem:[#allocation89_spill]] }
 0x188   : > { %v1053_v60 = vmul.f32 %v4219_v15, %v696_v3  ;;  %v1057_v46 = vmul.f32 %v4220_v61, %v731_v26  ;;  %v1106_v62 = vmul.f32 %v4222_v47, %v696_v3  ;;  %v1110_v0 = vmul.f32 %v4224_v2, %v731_v26  ;;  %s4239_s30 = sld [smem:[#allocation95_spill]]  ;;  %s4258_s12 = sld [smem:[#allocation99_spill]] }
 0x189   : > { %v4225_v43 = vstv %s4207_s5  ;;  %v4226_v29 = vstv %s4208_s22  ;;  %v4228_v48 = vstv %s4209_s6  ;;  %v4230_v18 = vstv %s4210_s11  ;;  %s4238_s22 = sld [smem:[#allocation94_spill]]  ;;  %s4240_s6 = sld [smem:[#allocation96_spill]] }
 0x18a   : > { %v947_v44 = vadd.f32 %v946_v55, %v4225_v43  ;;  %v1001_v32 = vadd.f32 %v1000_v11, %v4226_v29  ;;  %v1159_v59 = vmul.f32 %v4228_v48, %v696_v3  ;;  %v1163_v20 = vmul.f32 %v4230_v18, %v731_v26  ;;  %s4245_s11 = sld [smem:[#allocation58_spill]]  ;;  %s4259_s5 = sld [smem:[#allocation100_spill]] }
 0x18b   : > { %v4233_v8 = vstv %s4211_s17  ;;  %v4235_v12 = vstv %s4213_s27  ;;  %v4236_v39 = vstv %s4215_s26  ;;  %v4237_v30 = vstv %s4217_s9  ;;  %s4243_s17 = sld [smem:[#allocation87_spill]]  ;;  %s4249_s27 = sld [smem:[#allocation60_spill]] }
 0x18c   : > { %v1054_v7 = vadd.f32 %v1053_v60, %v4233_v8  ;;  %v1107_v5 = vadd.f32 %v1106_v62, %v4235_v12  ;;  %v1212_v22 = vmul.f32 %v4236_v39, %v696_v3  ;;  %v1216_v6 = vmul.f32 %v4237_v30, %v731_v26  ;;  %v615_v12 = vpop.permute.xlu1 %614  ;;  %s4262_s26 = sld [smem:[#allocation101_spill]]  ;;  %s4263_s9 = sld [smem:[#allocation102_spill]] }
 0x18d   : > { %v3384_v25 = vadd.f32 %v950_v19, %v947_v44  ;;  %v3386_v51 = vadd.f32 %v1004_v14, %v1001_v32  ;;  %v4241_v28 = vstv %s4221_s19  ;;  %v4242_v17 = vstv %s4223_s0  ;;  %s4251_s0 = sld [smem:[#allocation97_spill]]  ;;  %s3416_s19 = sld [smem:[#allocation8 + $0x388]] }
 0x18e   : > { %v1160_v55 = vadd.f32 %v1159_v59, %v4241_v28  ;;  %v1265_v56 = vmul.f32 %v4242_v17, %v696_v3  ;;  %v3392_v11 = vadd.f32 %v1057_v46, %v1054_v7  ;;  %v3394_v13 = vadd.f32 %v1110_v0, %v1107_v5  ;;  %v606_v46 = vpop.permute.xlu0 %605 }
 0x18f   : > { %v4244_v15 = vstv %s4227_s29  ;;  %v4246_v61 = vstv %s4229_s1  ;;  %v4247_v19 = vstv %s4231_s3  ;;  %v4248_v14 = vstv %s4232_s20  ;;  %s4272_s29 = sld [smem:[#allocation104_spill]]  ;;  %s4273_s1 = sld [smem:[#allocation105_spill]] }
 0x190   : > { %v1213_v60 = vadd.f32 %v1212_v22, %v4244_v15  ;;  %v1269_v47 = vmul.f32 %v4246_v61, %v731_v26  ;;  %v3400_v62 = vadd.f32 %v1163_v20, %v1160_v55  ;;  %v1266_v2 = vadd.f32 %v1265_v56, %v4247_v19  ;;  %s4275_s3 = sld [smem:[#allocation106_spill]] }
 0x191   : > { %v1318_v43 = vmul.f32 %v4248_v14, %v696_v3  ;;  %v4250_v44 = vstv %s4234_s25  ;;  %v4252_v0 = vstv %s4238_s22  ;;  %v4253_v59 = vstv %s4239_s30  ;;  %s3520_s20 = sld [smem:[#allocation9 + $0x300]]  ;;  %s4304_s25 = sld [smem:[#allocation118_spill]] }
 0x192   : > { %v1322_v29 = vmul.f32 %v4250_v44, %v731_v26  ;;  %v3408_v32 = vadd.f32 %v1216_v6, %v1213_v60  ;;  %v874_v48 = vmul.f32 %v4252_v0, %v640_v10  ;;  %v909_v18 = vmul.f32 %v4253_v59, %v640_v10  ;;  %s3522_s22 = sld [smem:[#allocation9 + $0x380]]  ;;  %s4306_s30 = sld [smem:[#allocation119_spill]] }
 0x193   : > { %v4254_v8 = vstv %s4240_s6  ;;  %v3418_v20 = vadd.f32 %v1269_v47, %v1266_v2  ;;  %v4255_v5 = vstv %s4243_s17  ;;  %v4256_v3 = vstv %s4245_s11  ;;  %s3532_s6 = sld [smem:[#allocation9 + $0x301]]  ;;  %s4310_s17 = sld [smem:[#allocation120_spill]] }
 0x194   : > { %v885_v7 = vmul.f32 %v4254_v8, %v648_v38  ;;  %v1319_v39 = vadd.f32 %v1318_v43, %v4255_v5  ;;  %v920_v22 = vmul.f32 %v4256_v3, %v648_v38  ;;  %v569_v26 = vsel %vm506_vm2, 0.0, %v567_v53  ;;  %v571_v38 = vpop.permute.xlu0 %570  ;;  %s3534_s11 = sld [smem:[#allocation9 + $0x381]] }
 0x195   : > { %v878_v30 = vadd.f32 %v3115_v1, %v874_v48  ;;  %v913_v10 = vadd.f32 %v3125_v49, %v909_v18  ;;  %v4260_v6 = vstv %s4249_s27  ;;  %v4261_v55 = vstv %s4251_s0  ;;  %s4311_s27 = sld [smem:[#allocation121_spill]]  ;;  %s3542_s0 = sld [smem:[#allocation9 + $0x302]] }
 0x196   : > { %v757_v28 = vmul.f32 %v4260_v6, %v569_v26  ;;  %v792_v17 = vmul.f32 %v4261_v55, %v569_v26  ;;  %v3431_v56 = vadd.f32 %v1322_v29, %v1319_v39  ;;  %v608_v15 = vsel %vm511_vm3, %v606_v46, 0.0 }
 0x197   : > { %v613_v60 = vsel %vm506_vm2, 0.0, %v611_v34  ;;  %v617_v61 = vsel %vm511_vm3, %v615_v12, 0.0  ;;  %v882_v53 = vadd.f32 %v881_v40, %v878_v30  ;;  %v917_v47 = vadd.f32 %v916_v16, %v913_v10 }
 0x198   : > { %v758_v1 = vadd.f32 %v757_v28, %v754_v4  ;;  %v793_v49 = vadd.f32 %v792_v17, %v789_v9  ;;  %v4264_v19 = vstv %s4257_s10  ;;  %v4265_v14 = vstv %s4140_s18  ;;  %v650_v18 = vpop.permute.xlu0 %649  ;;  %s4271_s18 = sld [smem:[#allocation103_spill]]  ;;  %s3544_s10 = sld [smem:[#allocation9 + $0x382]] }
 0x199   : > { %v823_v2 = vmul.f32 %v4264_v19, %v608_v15  ;;  %v858_v43 = vmul.f32 %v4265_v14, %v608_v15  ;;  %v4266_v44 = vstv %s4258_s12  ;;  %v4267_v46 = vstv %s4259_s5  ;;  %s4314_s12 = sld [smem:[#allocation122_spill]]  ;;  %s3550_s5 = sld [smem:[#allocation9 + $0x303]] }
 0x19a   : > { %v827_v29 = vmul.f32 %v4266_v44, %v613_v60  ;;  %v862_v34 = vmul.f32 %v4267_v46, %v613_v60  ;;  %v886_v0 = vadd.f32 %v885_v7, %v882_v53  ;;  %v921_v48 = vadd.f32 %v920_v22, %v917_v47 }
 0x19b   : > { %v762_v40 = vadd.f32 %v3157_v33, %v758_v1  ;;  %v797_v16 = vadd.f32 %v3161_v23, %v793_v49  ;;  %v824_v4 = vadd.f32 %v823_v2, %v3321_v58  ;;  %v859_v9 = vadd.f32 %v858_v43, %v3324_v21 }
 0x19c   : > { %v573_v59 = vsel %vm511_vm3, %v571_v38, 0.0  ;;  %v3452_v8 = vmul.f32 %v935_v50, %v2796_v41  ;;  %v4268_v12 = vstv %s4262_s26  ;;  %v4269_v7 = vstv %s4263_s9  ;;  %v659_v50 = vpop.permute.xlu1 %658  ;;  %s3552_s26 = sld [smem:[#allocation9 + $0x383]]  ;;  %s4317_s9 = sld [smem:[#allocation123_spill]] }
 0x19d   : > { %v765_v5 = vmul.f32 %v4268_v12, %v573_v59  ;;  %v800_v39 = vmul.f32 %v4269_v7, %v573_v59  ;;  %v4270_v33 = vstv %s3104_s14  ;;  %v939_v58 = vstv %s3416_s19  ;;  %s4284_s14 = sld [smem:[#allocation108_spill]]  ;;  %s4332_s19 = sld [smem:[#allocation24_spill]] }
 0x19e   : > { %v835_v23 = vmul.f32 %v4270_v33, %v617_v61  ;;  %v828_v21 = vadd.f32 %v827_v29, %v824_v4  ;;  %v863_v3 = vadd.f32 %v862_v34, %v859_v9  ;;  %v4274_v22 = vstv %s4161_s13  ;;  %s4287_s13 = sld [smem:[#allocation109_spill]] }
 0x19f   : > { %v870_v26 = vmul.f32 %v4274_v22, %v617_v61  ;;  %v652_v41 = vsel %vm511_vm3, %v650_v18, 0.0  ;;  %v766_v30 = vadd.f32 %v765_v5, %v762_v40  ;;  %v801_v10 = vadd.f32 %v800_v39, %v797_v16 }
 0x1a0   : > { %v890_v6 = vadd.f32 %v3301_v36, %v886_v0  ;;  %v3466_v28 = vadd.f32 %v3311_v52, %v921_v48  ;;  %v832_v55 = vadd.f32 %v3199_v27, %v828_v21  ;;  %v867_v17 = vadd.f32 %v3203_v42, %v863_v3  ;;  %v655_v3 = vpop.permute.xlu0 %654 }
 0x1a1   : > { %v893_v15 = vmul.f32 %v892_v54, %v652_v41  ;;  %v3474_v60 = vmul.f32 %v927_v57, %v652_v41  ;;  %v4277_v38 = vstv %s4271_s18  ;;  %v4278_v53 = vstv %s4272_s29  ;;  %s4320_s18 = sld [smem:[#allocation124_spill]]  ;;  %s3558_s29 = sld [smem:[#allocation9 + $0x304]] }
 0x1a2   : > { %v954_v61 = vmul.f32 %v4277_v38, %v766_v30  ;;  %v958_v36 = vmul.f32 %v4278_v53, %v801_v10  ;;  %v4279_v47 = vstv %s4273_s1  ;;  %v3483_v52 = vsel %vm511_vm3, %v659_v50, 0.0  ;;  %s4321_s1 = sld [smem:[#allocation111_spill]] }
 0x1a3   : > { %v1008_v1 = vmul.f32 %v4279_v47, %v766_v30  ;;  %v4280_v49 = vstv %s4275_s3  ;;  %v4281_v42 = vstv %s4276_s8  ;;  %v4282_v54 = vstv %s3052_s15  ;;  %s4295_s15 = sld [smem:[#allocation113_spill]]  ;;  %s3560_s3 = sld [smem:[#allocation9 + $0x384]] }
 0x1a4   : > { %v1012_v27 = vmul.f32 %v4280_v49, %v801_v10  ;;  %v1061_v19 = vmul.f32 %v4281_v42, %v766_v30  ;;  %v1065_v2 = vmul.f32 %v4282_v54, %v801_v10  ;;  %v4283_v14 = vstv %s3058_s4  ;;  %s4291_s4 = sld [smem:[#allocation110_spill]]  ;;  %s3568_s8 = sld [smem:[#allocation9 + $0x305]] }
 0x1a5   : > { %v1114_v57 = vmul.f32 %v4283_v14, %v766_v30  ;;  %v955_v43 = vadd.f32 %v954_v61, %v3384_v25  ;;  %v1009_v44 = vadd.f32 %v1008_v1, %v3386_v51  ;;  %v4285_v29 = vstv %s3060_s21  ;;  %s4294_s21 = sld [smem:[#allocation112_spill]]  ;;  %s4361_s19 = smov (!%p472_p12, %s4332_s19), 1 }
 0x1a6   : > { %v1118_v46 = vmul.f32 %v4285_v29, %v801_v10  ;;  %v4286_v34 = vstv %s3066_s7  ;;  %v1062_v48 = vadd.f32 %v1061_v19, %v3392_v11  ;;  %v4289_v16 = vstv %s3068_s16  ;;  %s4298_s16 = sld [smem:[#allocation114_spill]]  ;;  %s4301_s7 = sld [smem:[#allocation115_spill]] }
 0x1a7   : > { %v1167_v0 = vmul.f32 %v4286_v34, %v766_v30  ;;  %v1115_v40 = vadd.f32 %v1114_v57, %v3394_v13  ;;  %v1171_v4 = vmul.f32 %v4289_v16, %v801_v10  ;;  %v4290_v9 = vstv %s3074_s23  ;;  %s4296_s23 = sld [smem:[#allocation64_spill]] }
 0x1a8   : > { %v1220_v59 = vmul.f32 %v4290_v9, %v766_v30  ;;  %v959_v18 = vadd.f32 %v958_v36, %v955_v43  ;;  %v1013_v12 = vadd.f32 %v1012_v27, %v1009_v44  ;;  %v4292_v51 = vstv %s3082_s24  ;;  %s4302_s24 = sld [smem:[#allocation116_spill]] }
 0x1a9   : > { %v1168_v25 = vadd.f32 %v1167_v0, %v3400_v62  ;;  %v1273_v5 = vmul.f32 %v4292_v51, %v766_v30  ;;  %v1066_v7 = vadd.f32 %v1065_v2, %v1062_v48  ;;  %v1119_v39 = vadd.f32 %v1118_v46, %v1115_v40 }
 0x1aa   : > { %v1221_v33 = vadd.f32 %v1220_v59, %v3408_v32  ;;  %v4293_v21 = vstv %s4284_s14  ;;  %v4297_v41 = vstv %s4287_s13  ;;  %v4299_v38 = vstv %s4288_s2  ;;  %s3570_s13 = sld [smem:[#allocation9 + $0x385]] }
 0x1ab   : > { %v1224_v11 = vmul.f32 %v4293_v21, %v801_v10  ;;  %v1172_v13 = vadd.f32 %v1171_v4, %v1168_v25  ;;  %v1274_v22 = vadd.f32 %v1273_v5, %v3418_v20  ;;  %v1277_v50 = vmul.f32 %v4297_v41, %v801_v10 }
 0x1ac   : > { %v1326_v62 = vmul.f32 %v4299_v38, %v766_v30  ;;  %v4300_v53 = vstv %s4291_s4  ;;  %v836_v47 = vadd.f32 %v835_v23, %v832_v55  ;;  %v871_v32 = vadd.f32 %v870_v26, %v867_v17 }
 0x1ad   : > { %v1225_v61 = vadd.f32 %v1224_v11, %v1221_v33  ;;  %v1330_v36 = vmul.f32 %v4300_v53, %v801_v10  ;;  %v1278_v1 = vadd.f32 %v1277_v50, %v1274_v22  ;;  %v894_v27 = vadd.f32 %v893_v15, %v890_v6 }
 0x1ae   : > { %v1327_v49 = vadd.f32 %v1326_v62, %v3431_v56  ;;  %v657_v42 = vsel %vm506_vm2, 0.0, %v655_v3  ;;  %v4305_v20 = vstv %s4294_s21  ;;  %v4307_v10 = vstv %s4295_s15  ;;  %s3574_s15 = sld [smem:[#allocation9 + $0x306]] }
 0x1af   : > { %v962_v30 = vmul.f32 %v4305_v20, %v836_v47  ;;  %v966_v19 = vmul.f32 %v4307_v10, %v871_v32  ;;  %v4308_v23 = vstv %s4296_s23  ;;  %v4309_v26 = vstv %s4298_s16  ;;  %s3576_s23 = sld [smem:[#allocation9 + $0x386]]  ;;  %s3584_s16 = sld [smem:[#allocation9 + $0x307]] }
 0x1b0   : > { %v1016_v55 = vmul.f32 %v4308_v23, %v836_v47  ;;  %v1020_v17 = vmul.f32 %v4309_v26, %v871_v32  ;;  %v1331_v56 = vadd.f32 %v1330_v36, %v1327_v49  ;;  %v4312_v6 = vstv %s4301_s7  ;;  %s3586_s7 = sld [smem:[#allocation9 + $0x387]] }
 0x1b1   : > { %v1069_v15 = vmul.f32 %v4312_v6, %v836_v47  ;;  %v4313_v54 = vstv %s4302_s24  ;;  %v1122_v14 = vmul.f32 %v1121_v45, %v836_v47  ;;  %v963_v57 = vadd.f32 %v962_v30, %v959_v18  ;;  %s4330_s24 = sld [smem:[#allocation25_spill]] }
 0x1b2   : > { %v1073_v2 = vmul.f32 %v4313_v54, %v871_v32  ;;  %v1017_v43 = vadd.f32 %v1016_v55, %v1013_v12  ;;  %v4315_v44 = vstv %s4304_s25  ;;  %v4316_v46 = vstv %s4306_s30 }
 0x1b3   : > { %v1126_v29 = vmul.f32 %v4315_v44, %v871_v32  ;;  %v1175_v34 = vmul.f32 %v4316_v46, %v836_v47  ;;  %v1070_v0 = vadd.f32 %v1069_v15, %v1066_v7  ;;  %v1123_v48 = vadd.f32 %v1122_v14, %v1119_v39 }
 0x1b4   : > { %v4318_v40 = vstv %s4310_s17  ;;  %v4319_v16 = vstv %s4311_s27  ;;  %v3562_v9 = vadd.f32 %v966_v19, %v963_v57  ;;  %v3564_v59 = vadd.f32 %v1020_v17, %v1017_v43 }
 0x1b5   : > { %v1179_v45 = vmul.f32 %v4318_v40, %v871_v32  ;;  %v1228_v4 = vmul.f32 %v4319_v16, %v836_v47  ;;  %v1176_v18 = vadd.f32 %v1175_v34, %v1172_v13  ;;  %v4322_v12 = vstv %s4314_s12  ;;  %s4334_s12 = sld [smem:[#allocation35_spill]] }
 0x1b6   : > { %v1232_v25 = vmul.f32 %v4322_v12, %v871_v32  ;;  %v1074_v51 = vadd.f32 %v1073_v2, %v1070_v0  ;;  %v1127_v5 = vadd.f32 %v1126_v29, %v1123_v48  ;;  %v4326_v39 = vstv %s4317_s9 }
 0x1b7   : > { %v1229_v7 = vadd.f32 %v1228_v4, %v1225_v61  ;;  %v1281_v33 = vmul.f32 %v4326_v39, %v836_v47  ;;  %v1180_v21 = vadd.f32 %v1179_v45, %v1176_v18  ;;  %v4328_v11 = vstv %s4320_s18  ;;  %p470_p7 = scmp.lt.s32.totalorder %s4330_s24, 1 }
 0x1b8   : > { %v1285_v3 = vmul.f32 %v4328_v11, %v871_v32  ;;  %v4329_v13 = vstv %s4321_s1  ;;  %v929_v41 = vadd.f32 %v3474_v60, %v3466_v28  ;;  %v897_v62 = vmul.f32 %v896_v63, %v657_v42 }
 0x1b9   : > { %v1334_v22 = vmul.f32 %v4329_v13, %v836_v47  ;;  %v1233_v50 = vadd.f32 %v1232_v25, %v1229_v7  ;;  %v1282_v38 = vadd.f32 %v1281_v33, %v1278_v1  ;;  %v932_v61 = vmul.f32 %v931_v24, %v657_v42  ;;  %s4363_s24 = smov (!%p470_p7, %s4330_s24), 1 }
 0x1ba   : > { %v1338_v36 = vmul.f32 %v1337_v35, %v871_v32  ;;  %v969_v28 = vstv %s3520_s20  ;;  %v905_v60 = vmul.f32 %v904_v31, %v3483_v52  ;;  %v898_v1 = vadd.f32 %v897_v62, %v894_v27  ;;  %s1672_s20 = sshll.u32 %s4331_s28, 6  ;;  %s1674_s30 = sshll.u32 %s4363_s24, 2 }
 0x1bb   : > { %v1335_v53 = vadd.f32 %v1334_v22, %v1331_v56  ;;  %v3598_v47 = vadd.f32 %v1285_v3, %v1282_v38  ;;  %v933_v49 = vadd.f32 %v932_v61, %v929_v41  ;;  %v940_v63 = vmul.f32 %v939_v58, %v3483_v52  ;;  %s3666_s25 = scalar_lea.vmem [#allocation12], %s1672_s20  ;;  %p4335_p2 = scmp.ne.s32.totalorder %s4334_s12, 0 }
 0x1bc   : > { %v973_v35 = vstv %s3522_s22  ;;  %v1023_v32 = vstv %s3532_s6  ;;  %v1027_v31 = vstv %s3534_s11  ;;  %v1076_v42 = vstv %s3542_s0  ;;  %s1673_s22 = sshll.u32 %s4361_s19, 1  ;;  %s4333_s0 = sld [smem:[#allocation132_spill]] }
 0x1bd   : > { %v3603_v24 = vadd.f32 %v1338_v36, %v1335_v53  ;;  %v1080_v20 = vstv %s3544_s10  ;;  %v902_v27 = vadd.f32 %v3342_v37, %v898_v1  ;;  %v937_v30 = vadd.f32 %v3452_v8, %v933_v49  ;;  %s476_s6 = sadd.s32 %s1674_s30, %s1673_s22 }
 0x1be   : > { %v1129_v10 = vstv %s3550_s5  ;;  %v1133_v58 = vstv %s3552_s26  ;;  %v1182_v52 = vstv %s3558_s29  ;;  %v1186_v19 = vstv %s3560_s3  ;;  %s1675_s17 = sshll.u32 %s476_s6, 3  ;;  %s4336_s5 = sld [smem:[#allocation25_spill]] (%p4335_p2) }
 0x1bf   : > { %v1235_v23 = vstv %s3568_s8  ;;  %v1239_v55 = vstv %s3570_s13  ;;  %v3619_v26 = vadd.f32 %v905_v60, %v902_v27  ;;  %v3621_v17 = vadd.f32 %v940_v63, %v937_v30  ;;  %s4337_s26 = sld [smem:[#allocation24_spill]] (%p4335_p2) }
 0x1c0   : > { %v1288_v56 = vstv %s3574_s15  ;;  %v1292_v6 = vstv %s3576_s23  ;;  %v1341_v37 = vstv %s3584_s16  ;;  %v1345_v15 = vstv %s3586_s7  ;;  %s4338_s8 = sld [smem:[#allocation131_spill]] (%p4335_p2) }
 0x1c1   : > { %v970_v8 = vmul.f32 %v969_v28, %v3619_v26  ;;  %v974_v54 = vmul.f32 %v973_v35, %v3621_v17  ;;  %v1024_v2 = vmul.f32 %v1023_v32, %v3619_v26  ;;  %v1028_v14 = vmul.f32 %v1027_v31, %v3621_v17 }
 0x1c2   : > { %v1077_v57 = vmul.f32 %v1076_v42, %v3619_v26  ;;  %v1081_v43 = vmul.f32 %v1080_v20, %v3621_v17  ;;  %v1130_v44 = vmul.f32 %v1129_v10, %v3619_v26  ;;  %v1134_v29 = vmul.f32 %v1133_v58, %v3621_v17  ;;  %s3689_s10 = scalar_lea.vmem %s4333_s0, %s1675_s17 }
 0x1c3   : > { %v971_v46 = vadd.f32 %v970_v8, %v3562_v9  ;;  %v1025_v34 = vadd.f32 %v1024_v2, %v3564_v59  ;;  %v1183_v0 = vmul.f32 %v1182_v52, %v3619_v26  ;;  %v3650_v48 = vmul.f32 %v1186_v19, %v3621_v17 }
 0x1c4   : > { %v1078_v40 = vadd.f32 %v1077_v57, %v1074_v51  ;;  %v1131_v45 = vadd.f32 %v1130_v44, %v1127_v5  ;;  %v1236_v16 = vmul.f32 %v1235_v23, %v3619_v26  ;;  %v3654_v4 = vmul.f32 %v1239_v55, %v3621_v17  ;;  %s1834_s9 = sshll.u32 (%p4335_p2), %s4336_s5, 4 }
 0x1c5   : > { %v975_v18 = vadd.f32 %v974_v54, %v971_v46  ;;  %v1029_v12 = vadd.f32 %v1028_v14, %v1025_v34  ;;  %v3656_v25 = vadd.f32 %v1183_v0, %v1180_v21  ;;  %v3659_v9 = vmul.f32 %v1288_v56, %v3619_v26  ;;  %s1384_s18 = sadd.s32 (%p4335_p2), %s4337_s26, %s1834_s9 }
 0x1c6   : > { %v1082_v59 = vadd.f32 %v1081_v43, %v1078_v40  ;;  %v1135_v7 = vadd.f32 %v1134_v29, %v1131_v45  ;;  %v3661_v39 = vadd.f32 %v1236_v16, %v1233_v50  ;;  %v3664_v51 = vmul.f32 %v1292_v6, %v3621_v17  ;;  %s1835_s29 = sshll.u32 (%p4335_p2), %s1384_s18, 3 }
 0x1c7   : > { %977 = vst.msk [vmem:[%s3666_s25] sm:$0xff] %vm976_vm4, %v975_v18  ;;  %v978_v5 = vsel %vm976_vm4, %v975_v18, 0.0  ;;  %v987_v33 = vmul.f32 %v975_v18, %v975_v18  ;;  %1772 = vst.msk [vmem:[%s3666_s25 + $0x8] sm:$0xff] %vm976_vm4, %v1029_v12  ;;  %v1032_v21 = vsel %vm976_vm4, %v1029_v12, 0.0  ;;  %v1040_v11 = vmul.f32 %v1029_v12, %v1029_v12  ;;  %s1386_s14 = scalar_lea.vmem (%p4335_p2), %s4338_s8, %s1835_s29 }
 0x1c8   : > { %v979_v3 = vrot.slane %v978_v5, 4  ;;  %v1033_v13 = vrot.slane %v1032_v21, 4  ;;  %1782 = vst.msk [vmem:[%s3666_s25 + $0x10] sm:$0xff] %vm976_vm4, %v1082_v59  ;;  %v1085_v22 = vsel %vm976_vm4, %v1082_v59, 0.0  ;;  %v1093_v41 = vmul.f32 %v1082_v59, %v1082_v59  ;;  %1792 = vst.msk [vmem:[%s3666_s25 + $0x18] sm:$0xff] %vm976_vm4, %v1135_v7 }
 0x1c9   : > { %v988_v50 = vsel %vm976_vm4, %v987_v33, 0.0  ;;  %v1041_v38 = vsel %vm976_vm4, %v1040_v11, 0.0  ;;  %v1086_v62 = vrot.slane %v1085_v22, 4  ;;  %v1138_v61 = vsel %vm976_vm4, %v1135_v7, 0.0 }
 0x1ca   : > { %v980_v53 = vadd.f32 %v979_v3, %v978_v5  ;;  %v989_v36 = vrot.slane %v988_v50, 4  ;;  %v1034_v28 = vadd.f32 %v1033_v13, %v1032_v21  ;;  %v1042_v60 = vrot.slane %v1041_v38, 4 }
 0x1cb   : > { %v1087_v1 = vadd.f32 %v1086_v62, %v1085_v22  ;;  %v1094_v49 = vsel %vm976_vm4, %v1093_v41, 0.0  ;;  %v1139_v63 = vrot.slane %v1138_v61, 4  ;;  %v1146_v35 = vmul.f32 %v1135_v7, %v1135_v7 }
 0x1cc   : > { %v981_v32 = vrot.slane %v980_v53, 2  ;;  %v990_v31 = vadd.f32 %v989_v36, %v988_v50  ;;  %v1035_v42 = vrot.slane %v1034_v28, 2  ;;  %v1043_v20 = vadd.f32 %v1042_v60, %v1041_v38 }
 0x1cd   : > { %v1088_v27 = vrot.slane %v1087_v1, 2  ;;  %v1095_v30 = vrot.slane %v1094_v49, 4  ;;  %v1140_v10 = vadd.f32 %v1139_v63, %v1138_v61  ;;  %v1147_v58 = vsel %vm976_vm4, %v1146_v35, 0.0 }
 0x1ce   : > { %v982_v52 = vadd.f32 %v981_v32, %v980_v53  ;;  %v991_v19 = vrot.slane %v990_v31, 2  ;;  %v1036_v23 = vadd.f32 %v1035_v42, %v1034_v28  ;;  %v1044_v55 = vrot.slane %v1043_v20, 2 }
 0x1cf   : > { %v1089_v56 = vadd.f32 %v1088_v27, %v1087_v1  ;;  %v1096_v6 = vadd.f32 %v1095_v30, %v1094_v49  ;;  %v1141_v8 = vrot.slane %v1140_v10, 2  ;;  %v1148_v54 = vrot.slane %v1147_v58, 4 }
 0x1d0   : > { %v983_v2 = vrot.slane %v982_v52, 1  ;;  %v992_v14 = vadd.f32 %v991_v19, %v990_v31  ;;  %v1037_v57 = vrot.slane %v1036_v23, 1  ;;  %v1045_v43 = vadd.f32 %v1044_v55, %v1043_v20 }
 0x1d1   : > { %v1090_v44 = vrot.slane %v1089_v56, 1  ;;  %v1097_v29 = vrot.slane %v1096_v6, 2  ;;  %v1142_v46 = vadd.f32 %v1141_v8, %v1140_v10  ;;  %v1149_v34 = vadd.f32 %v1148_v54, %v1147_v58 }
 0x1d2   : > { %v984_v0 = vadd.f32 %v983_v2, %v982_v52  ;;  %v993_v40 = vrot.slane %v992_v14, 1  ;;  %v1038_v45 = vadd.f32 %v1037_v57, %v1036_v23  ;;  %v1046_v16 = vrot.slane %v1045_v43, 1 }
 0x1d3   : > { %v1091_v18 = vadd.f32 %v1090_v44, %v1089_v56  ;;  %v1098_v12 = vadd.f32 %v1097_v29, %v1096_v6  ;;  %v1143_v59 = vrot.slane %v1142_v46, 1  ;;  %v1150_v7 = vrot.slane %v1149_v34, 2 }
 0x1d4   : > { %986 = vst.msk [vmem:[%s3689_s10] sm:$0x1] %vm985_vm5, %v984_v0  ;;  %v994_v5 = vadd.f32 %v993_v40, %v992_v14  ;;  %1039 = vst.msk [vmem:[%s3689_s10 + $0x1] sm:$0x1] %vm985_vm5, %v1038_v45  ;;  %v1047_v33 = vadd.f32 %v1046_v16, %v1045_v43  ;;  %v1188_v21 = vadd.f32 %v3650_v48, %v3656_v25 }
 0x1d5   : > { %v1241_v11 = vadd.f32 %v3654_v4, %v3661_v39  ;;  %1092 = vst.msk [vmem:[%s3689_s10 + $0x2] sm:$0x1] %vm985_vm5, %v1091_v18  ;;  %v1099_v3 = vrot.slane %v1098_v12, 1  ;;  %v1144_v13 = vadd.f32 %v1143_v59, %v1142_v46  ;;  %v1151_v22 = vadd.f32 %v1150_v7, %v1149_v34 }
 0x1d6   : > { %v1290_v41 = vadd.f32 %v3659_v9, %v3598_v47  ;;  %995 = vst.msk [vmem:[%s3689_s10 + $0x8] sm:$0x1] %vm985_vm5, %v994_v5  ;;  %1048 = vst.msk [vmem:[%s3689_s10 + $0x9] sm:$0x1] %vm985_vm5, %v1047_v33  ;;  %v1191_v48 = vsel %vm976_vm4, %v1188_v21, 0.0  ;;  %v1199_v25 = vmul.f32 %v1188_v21, %v1188_v21  ;;  %v1342_v36 = vmul.f32 %v1341_v37, %v3619_v26 }
 0x1d7   : > { %1802 = vst.msk [vmem:[%s3666_s25 + $0x20] sm:$0xff] %vm976_vm4, %v1188_v21  ;;  %1812 = vst.msk [vmem:[%s3666_s25 + $0x28] sm:$0xff] %vm976_vm4, %v1241_v11  ;;  %v1244_v4 = vsel %vm976_vm4, %v1241_v11, 0.0  ;;  %v1252_v39 = vmul.f32 %v1241_v11, %v1241_v11  ;;  %v1100_v50 = vadd.f32 %v1099_v3, %v1098_v12  ;;  %v1152_v47 = vrot.slane %v1151_v22, 1 }
 0x1d8   : > { %1145 = vst.msk [vmem:[%s3689_s10 + $0x3] sm:$0x1] %vm985_vm5, %v1144_v13  ;;  %v1192_v9 = vrot.slane %v1191_v48, 4  ;;  %v1245_v38 = vrot.slane %v1244_v4, 4  ;;  %v1200_v62 = vsel %vm976_vm4, %v1199_v25, 0.0  ;;  %v1294_v53 = vadd.f32 %v3664_v51, %v1290_v41 }
 0x1d9   : > { %v1253_v61 = vsel %vm976_vm4, %v1252_v39, 0.0  ;;  %1101 = vst.msk [vmem:[%s3689_s10 + $0xa] sm:$0x1] %vm985_vm5, %v1100_v50  ;;  %v1153_v28 = vadd.f32 %v1152_v47, %v1151_v22  ;;  %v1201_v1 = vrot.slane %v1200_v62, 4  ;;  %v1343_v31 = vadd.f32 %v1342_v36, %v3603_v24  ;;  %v1428_v50 = vld [vmem:[%s3666_s25] sm:$0xff] (%p4335_p2)  ;;  %v1430_v47 = vld [vmem:[%s3666_s25 + $0x8] sm:$0xff] (%p4335_p2) }
 0x1da   : > { %v1193_v60 = vadd.f32 %v1192_v9, %v1191_v48  ;;  %v1246_v49 = vadd.f32 %v1245_v38, %v1244_v4  ;;  %v1254_v63 = vrot.slane %v1253_v61, 4  ;;  %1822 = vst.msk [vmem:[%s3666_s25 + $0x30] sm:$0xff] %vm976_vm4, %v1294_v53  ;;  %v1297_v35 = vsel %vm976_vm4, %v1294_v53, 0.0  ;;  %v1432_v9 = vld [vmem:[%s3666_s25 + $0x10] sm:$0xff] (%p4335_p2)  ;;  %v1434_v38 = vld [vmem:[%s3666_s25 + $0x18] sm:$0xff] (%p4335_p2)  ;;  %1429 = vst [vmem:[%s1386_s14] sm:$0xff] (%p4335_p2), %v1428_v50 }
 0x1db   : > { %v1305_v32 = vmul.f32 %v1294_v53, %v1294_v53  ;;  %1154 = vst.msk [vmem:[%s3689_s10 + $0xb] sm:$0x1] %vm985_vm5, %v1153_v28  ;;  %v1202_v42 = vadd.f32 %v1201_v1, %v1200_v62  ;;  %v1298_v37 = vrot.slane %v1297_v35, 4  ;;  %v1346_v30 = vmul.f32 %v1345_v15, %v3621_v17  ;;  %1431 = vst [vmem:[%s1386_s14 + $0x10] sm:$0xff] (%p4335_p2), %v1430_v47 }
 0x1dc   : > { %v1194_v51 = vrot.slane %v1193_v60, 2  ;;  %v1247_v26 = vrot.slane %v1246_v49, 2  ;;  %v1255_v20 = vadd.f32 %v1254_v63, %v1253_v61  ;;  %1433 = vst [vmem:[%s1386_s14 + $0x20] sm:$0xff] (%p4335_p2), %v1432_v9  ;;  %1435 = vst [vmem:[%s1386_s14 + $0x30] sm:$0xff] (%p4335_p2), %v1434_v38 }
 0x1dd   : > { %v1306_v27 = vsel %vm976_vm4, %v1305_v32, 0.0  ;;  %v1203_v58 = vrot.slane %v1202_v42, 2  ;;  %v1299_v19 = vadd.f32 %v1298_v37, %v1297_v35  ;;  %v1347_v24 = vadd.f32 %v1346_v30, %v1343_v31 }
 0x1de   : > { %v1195_v10 = vadd.f32 %v1194_v51, %v1193_v60  ;;  %v1248_v52 = vadd.f32 %v1247_v26, %v1246_v49  ;;  %v1256_v23 = vrot.slane %v1255_v20, 2  ;;  %v1307_v55 = vrot.slane %v1306_v27, 4  ;;  %v1436_v62 = vld [vmem:[%s3666_s25 + $0x20] sm:$0xff] (%p4335_p2)  ;;  %v1438_v61 = vld [vmem:[%s3666_s25 + $0x28] sm:$0xff] (%p4335_p2) }
 0x1df   : > { %v1204_v6 = vadd.f32 %v1203_v58, %v1202_v42  ;;  %v1300_v54 = vrot.slane %v1299_v19, 2  ;;  %1832 = vst.msk [vmem:[%s3666_s25 + $0x38] sm:$0xff] %vm976_vm4, %v1347_v24  ;;  %v1350_v57 = vsel %vm976_vm4, %v1347_v24, 0.0  ;;  %v1358_v17 = vmul.f32 %v1347_v24, %v1347_v24  ;;  %1437 = vst [vmem:[%s1386_s14 + $0x40] sm:$0xff] (%p4335_p2), %v1436_v62 }
 0x1e0   : > { %v1196_v56 = vrot.slane %v1195_v10, 1  ;;  %v1249_v8 = vrot.slane %v1248_v52, 1  ;;  %v1257_v2 = vadd.f32 %v1256_v23, %v1255_v20  ;;  %v1308_v14 = vadd.f32 %v1307_v55, %v1306_v27  ;;  %1439 = vst [vmem:[%s1386_s14 + $0x50] sm:$0xff] (%p4335_p2), %v1438_v61 }
 0x1e1   : > { %v1205_v43 = vrot.slane %v1204_v6, 1  ;;  %v1301_v29 = vadd.f32 %v1300_v54, %v1299_v19  ;;  %v1351_v0 = vrot.slane %v1350_v57, 4  ;;  %v1359_v40 = vsel %vm976_vm4, %v1358_v17, 0.0  ;;  %v1440_v53 = vld [vmem:[%s3666_s25 + $0x30] sm:$0xff] (%p4335_p2) }
 0x1e2   : > { %v1197_v15 = vadd.f32 %v1196_v56, %v1195_v10  ;;  %v1250_v44 = vadd.f32 %v1249_v8, %v1248_v52  ;;  %v1258_v46 = vrot.slane %v1257_v2, 1  ;;  %v1309_v34 = vrot.slane %v1308_v14, 2  ;;  %1441 = vst [vmem:[%s1386_s14 + $0x60] sm:$0xff] (%p4335_p2), %v1440_v53 }
 0x1e3   : > { %v1206_v45 = vadd.f32 %v1205_v43, %v1204_v6  ;;  %v1302_v16 = vrot.slane %v1301_v29, 1  ;;  %v1360_v18 = vrot.slane %v1359_v40, 4  ;;  %v1352_v7 = vadd.f32 %v1351_v0, %v1350_v57 }
 0x1e4   : > { %1198 = vst.msk [vmem:[%s3689_s10 + $0x4] sm:$0x1] %vm985_vm5, %v1197_v15  ;;  %1251 = vst.msk [vmem:[%s3689_s10 + $0x5] sm:$0x1] %vm985_vm5, %v1250_v44  ;;  %v1259_v12 = vadd.f32 %v1258_v46, %v1257_v2  ;;  %v1310_v59 = vadd.f32 %v1309_v34, %v1308_v14 }
 0x1e5   : > { %1207 = vst.msk [vmem:[%s3689_s10 + $0xc] sm:$0x1] %vm985_vm5, %v1206_v45  ;;  %v1303_v5 = vadd.f32 %v1302_v16, %v1301_v29  ;;  %v1361_v33 = vadd.f32 %v1360_v18, %v1359_v40  ;;  %v1353_v11 = vrot.slane %v1352_v7, 2 }
 0x1e6   : > { %1260 = vst.msk [vmem:[%s3689_s10 + $0xd] sm:$0x1] %vm985_vm5, %v1259_v12  ;;  %v1311_v21 = vrot.slane %v1310_v59, 1  ;;  %v1442_v36 = vld [vmem:[%s3666_s25 + $0x38] sm:$0xff] (%p4335_p2) }
 0x1e7   : > { %1304 = vst.msk [vmem:[%s3689_s10 + $0x6] sm:$0x1] %vm985_vm5, %v1303_v5  ;;  %v1362_v3 = vrot.slane %v1361_v33, 2  ;;  %v1354_v22 = vadd.f32 %v1353_v11, %v1352_v7  ;;  %1443 = vst [vmem:[%s1386_s14 + $0x70] sm:$0xff] (%p4335_p2), %v1442_v36 }
 0x1e8   : > { %v1312_v13 = vadd.f32 %v1311_v21, %v1310_v59 }
 0x1e9   : > { %v1363_v41 = vadd.f32 %v1362_v3, %v1361_v33  ;;  %v1355_v48 = vrot.slane %v1354_v22, 1  ;;  %1382 = sbr.rel (!%p4335_p2) target bundleno = 496 (0x1f0), region = 72 }
 0x1ea   : > { %1313 = vst.msk [vmem:[%s3689_s10 + $0xe] sm:$0x1] %vm985_vm5, %v1312_v13 }
 0x1eb   : > { %v1364_v25 = vrot.slane %v1363_v41, 1  ;;  %v1356_v4 = vadd.f32 %v1355_v48, %v1354_v22 }
 0x1ed   : > { %v1365_v39 = vadd.f32 %v1364_v25, %v1363_v41  ;;  %1357 = vst.msk [vmem:[%s3689_s10 + $0x7] sm:$0x1] %vm985_vm5, %v1356_v4 }
 0x1ef   : > { %1366 = vst.msk [vmem:[%s3689_s10 + $0xf] sm:$0x1] %vm985_vm5, %v1365_v39 }
 0x1f0 PF: > { %s4339_s13 = sld [smem:[#allocation28_spill]]  ;;  %s4342_s25 = sld [smem:[#allocation19_spill]] }
 0x1f1   : > { %s4341_s24 = sld [smem:[#allocation18_spill]]  ;;  %s4343_s26 = sld [smem:[#allocation36_spill]] }
 0x1f2   : > { %s4344_s27 = sld [smem:[#allocation20_spill]]  ;;  %s4345_s28 = sld [smem:[#allocation21_spill]] }
 0x1f3   : > { %s4346_s29 = sld [smem:[#allocation33_spill]]  ;;  %s4347_s30 = sld [smem:[#allocation22_spill]] }
 0x1f4   : > { %s4348_s8 = sld [smem:[#allocation23_spill]]  ;;  %s4349_s9 = sld [smem:[#allocation34_spill]] }
 0x1f5   : > { %s4350_s10 = sld [smem:[#allocation26_spill]]  ;;  %s4351_s11 = sld [smem:[#allocation27_spill]] }
 0x1f6   : > { %s26_s14 = sadd.s32 1, %s4339_s13   ;;  %s4352_s12 = sld [smem:[#allocation31_spill]] }
 0x1f7   : > { %p3769_p3 = scmp.ge.s32.totalorder %s26_s14, 6   ;;  %s4353_s13 = sld [smem:[#allocation32_spill]] }
 0x1f9   :  { %25 = sbr.rel (!%p3769_p3) target bundleno = 21 (0x15), region = 187 }
 0x200   :  { %1474 = vsyncpa [#allocation3], 1 }
 0x201   :  { %1476 = vsyncpa [#allocation3 + $0x1], 1 }
 0x202   :  { %1477 = vsyncpa [#allocation6], 1 }
 0x203   :  { %1479 = vsyncpa [#allocation6 + $0x1], 1 }
 0x204   :  { %1480 = vsyncpa [#allocation4], 1 }
 0x205   :  { %1482 = vsyncpa [#allocation4 + $0x1], 1 }
 0x206   :  { %1483 = vsyncpa [#allocation10], 1 }

</bundles_post_ra>
